<compile_context>
chip_gen: v6e
topology: v6e:2x2x1
jax: 0.10.0
libtpu: 0.0.40
codegen_flags: <defaults>
</compile_context>

<pallas_src>
import jax
import jax.numpy as jnp
from jax.experimental import pallas as pl
from jax.experimental.pallas import tpu as pltpu


# ---------------------------------------------------------------------------
# Fused Pallas kernel: one grid step == one image.
# ---------------------------------------------------------------------------
def _mnist_kernel(p1_ref, w1_ref, b1_ref, w2_ref, b2_ref,
                  wf1_ref, bf1_ref, wf2_ref, bf2_ref, out_ref):
    # ---- conv1 as 4 phase matmuls, maxpool1 as elementwise max over phases --
    # p1_ref[0, p] : [192, 32]   rows = u*16 + v  (u,v < 12, pitch 16),
    #                            cols = conv1 taps i*5+j (25 real, 32 padded)
    pooled = None
    for p in range(4):
        z = jnp.dot(p1_ref[0, p], w1_ref[...],
                    preferred_element_type=jnp.float32)            # [192, 128]
        pooled = z if pooled is None else jnp.maximum(pooled, z)
    # bias + ReLU commute with the max over phases.
    h1 = jnp.maximum(pooled + b1_ref[...], 0.0)                    # [192, 128]

    # ---- conv2: in-kernel im2col (static row slices) + 25 accumulated dots --
    # h1 row (y*16 + x) holds the pooled conv1 pixel (y, x), channels on lanes.
    acc = None
    for i in range(5):
        for j in range(5):
            rows = [h1[(a + i) * 16 + j:(a + i) * 16 + j + 8, :]
                    for a in range(8)]
            patch = jnp.concatenate(rows, axis=0)                  # [64, 128]
            z = jnp.dot(patch, w2_ref[i * 5 + j],
                        preferred_element_type=jnp.float32)        # [64, 128]
            acc = z if acc is None else acc + z
    h2 = jnp.maximum(acc + b2_ref[...], 0.0)     # [64, 128], row = y*8 + x

    # ---- maxpool2 (2x2, stride 2) via shifted-row maxima (lane-dense) -------
    m1 = jnp.maximum(h2, jnp.concatenate([h2[1:, :], h2[:1, :]], axis=0))
    m2 = jnp.maximum(m1, jnp.concatenate([m1[8:, :], m1[:8, :]], axis=0))
    # pooled value for output position (a, b) sits at row 16*a + 2*b of m2.

    # ---- flatten: gather the 16 pooled rows, concat along lanes -> [1,2048] -
    pieces = [m2[16 * a + 2 * b:16 * a + 2 * b + 1, :]
              for a in range(4) for b in range(4)]
    flat = jnp.concatenate(pieces, axis=1)                         # [1, 2048]

    # ---- fc1 + ReLU, fc2 (weights already permuted to this flatten order) ---
    h3 = jnp.maximum(
        jnp.dot(flat, wf1_ref[...], preferred_element_type=jnp.float32)
        + bf1_ref[...], 0.0)                                       # [1, 128]
    logits = (jnp.dot(h3, wf2_ref[...], preferred_element_type=jnp.float32)
              + bf2_ref[...])                                      # [1, 128]

    # Full (8,128) lane-dense store; caller slices row 0 / first 10 lanes.
    out_ref[0] = jnp.concatenate([logits] * 8, axis=0)


# ---------------------------------------------------------------------------
# Wrapper-side layout prep for conv1 (tiny 1-channel input -> phase patches)
# ---------------------------------------------------------------------------
def _conv1_phase_patches(x):
    """Returns [B, 4, 192, 32] with
       [b, di*2+dj, u*16+v, i*5+j] = x[b, 0, 2u+di+i, 2v+dj+j]
    (u,v < 12, i,j < 5).  Rows v in [12,16) and tap cols [25,32) are zero."""
    B = x.shape[0]
    xb = x[:, 0].astype(jnp.float32)                               # [B,28,28]
    taps = [xb[:, i:i + 24, j:j + 24] for i in range(5) for j in range(5)]
    p = jnp.stack(taps, axis=-1)                                   # [B,24,24,25]
    p = p.reshape(B, 12, 2, 12, 2, 25).transpose(0, 2, 4, 1, 3, 5)  # [B,2,2,12,12,25]
    p = jnp.pad(p, ((0, 0), (0, 0), (0, 0), (0, 0), (0, 4), (0, 7)))
    return p.reshape(B, 4, 192, 32)


# ---------------------------------------------------------------------------
# Forward pass
# ---------------------------------------------------------------------------
def mnist_forward(packed, x):
    B = x.shape[0]
    patches = _conv1_phase_patches(x)
    out = pl.pallas_call(
        _mnist_kernel,
        out_shape=jax.ShapeDtypeStruct((B, 8, 128), jnp.float32),
        grid=(B,),
        in_specs=[
            pl.BlockSpec((1, 4, 192, 32), lambda b: (b, 0, 0, 0)),   # conv1 patches
            pl.BlockSpec((32, 128), lambda b: (0, 0)),               # w1p
            pl.BlockSpec((1, 128), lambda b: (0, 0)),                # b1p
            pl.BlockSpec((25, 128, 128), lambda b: (0, 0, 0)),       # w2p
            pl.BlockSpec((1, 128), lambda b: (0, 0)),                # b2p
            pl.BlockSpec((2048, 128), lambda b: (0, 0)),             # fc1 w
            pl.BlockSpec((1, 128), lambda b: (0, 0)),                # fc1 b
            pl.BlockSpec((128, 128), lambda b: (0, 0)),              # fc2 w
            pl.BlockSpec((1, 128), lambda b: (0, 0)),                # fc2 b
        ],
        out_specs=pl.BlockSpec((1, 8, 128), lambda b: (b, 0, 0)),
        compiler_params=pltpu.CompilerParams(
            dimension_semantics=("parallel",)),
    )(patches,
      packed["w1p"], packed["b1p"], packed["w2p"], packed["b2p"],
      packed["wfc1p"], packed["bfc1p"], packed["wfc2p"], packed["bfc2p"])
    # TODO(synk): nn.Dropout2d(p=0.25) is identity in eval/inference; no RNG drop applied.
    return out[:, 0, :10]


# ---------------------------------------------------------------------------
# Parameters: PyTorch-like init, then packed ONCE into lane-padded matmul form
# ---------------------------------------------------------------------------
def init_params(key):
    ks = jax.random.split(key, 8)

    def u(k, shape, fan_in):
        bound = 1.0 / jnp.sqrt(jnp.float32(fan_in))
        return jax.random.uniform(k, shape, jnp.float32, -bound, bound)

    return dict(
        conv1_w=u(ks[0], (10, 1, 5, 5), 1 * 5 * 5),
        conv1_b=u(ks[1], (10,), 1 * 5 * 5),
        conv2_w=u(ks[2], (20, 10, 5, 5), 10 * 5 * 5),
        conv2_b=u(ks[3], (20,), 10 * 5 * 5),
        fc1_w=u(ks[4], (100, 320), 320),
        fc1_b=u(ks[5], (100,), 320),
        fc2_w=u(ks[6], (10, 100), 100),
        fc2_b=u(ks[7], (10,), 100),
    )


def pack_params(p):
    """Pack / zero-pad all weights to N=128 lanes and to the kernel's layouts."""
    f32 = jnp.float32
    # conv1: [25 taps (i*5+j), 10 out-ch] -> [32, 128]
    w1 = p["conv1_w"].reshape(10, 25).T
    w1p = jnp.zeros((32, 128), f32).at[:25, :10].set(w1)
    b1p = jnp.zeros((1, 128), f32).at[0, :10].set(p["conv1_b"])
    # conv2: per tap [10 in-ch, 20 out-ch] -> [25, 128, 128]
    w2 = jnp.transpose(p["conv2_w"], (2, 3, 1, 0)).reshape(25, 10, 20)
    w2p = jnp.zeros((25, 128, 128), f32).at[:, :10, :20].set(w2)
    b2p = jnp.zeros((1, 128), f32).at[0, :20].set(p["conv2_b"])
    # fc1: torch flatten index c*16 + a*4 + b  ->  kernel flatten (a*4+b)*128 + c
    wf1 = jnp.transpose(p["fc1_w"].reshape(100, 20, 4, 4), (2, 3, 1, 0))  # [a,b,c,o]
    wfc1p = jnp.zeros((4, 4, 128, 128), f32).at[:, :, :20, :100].set(wf1)
    wfc1p = wfc1p.reshape(2048, 128)
    bfc1p = jnp.zeros((1, 128), f32).at[0, :100].set(p["fc1_b"])
    # fc2
    wfc2p = jnp.zeros((128, 128), f32).at[:100, :10].set(p["fc2_w"].T)
    bfc2p = jnp.zeros((1, 128), f32).at[0, :10].set(p["fc2_b"])
    return dict(w1p=w1p, b1p=b1p, w2p=w2p, b2p=b2p,
                wfc1p=wfc1p, bfc1p=bfc1p, wfc2p=wfc2p, bfc2p=bfc2p)


# ---------------------------------------------------------------------------
# Pure-JAX reference of the PyTorch module (for a correctness sanity check)
# ---------------------------------------------------------------------------
def _ref_conv(x, w, b):  # valid cross-correlation, stride 1, NCHW / OIHW
    O, C, k, _ = w.shape
    H, W = x.shape[2], x.shape[3]
    oh, ow = H - k + 1, W - k + 1
    cols = jnp.stack([x[:, :, i:i + oh, j:j + ow]
                      for i in range(k) for j in range(k)], axis=2)
    y = jnp.einsum('bcthw,oct->bohw', cols, w.reshape(O, C, k * k))
    return y + b[None, :, None, None]


def _ref_pool(x):  # 2x2 / stride 2
    B, C, H, W = x.shape
    return x.reshape(B, C, H // 2, 2, W // 2, 2).max(axis=(3, 5))


def _ref_forward(raw, x):
    a = jax.nn.relu(_ref_conv(x, raw["conv1_w"], raw["conv1_b"]))
    a = _ref_pool(a)
    a = jax.nn.relu(_ref_conv(a, raw["conv2_w"], raw["conv2_b"]))
    a = _ref_pool(a)
    a = a.reshape(a.shape[0], -1)                       # torch channel-major flatten
    a = jax.nn.relu(a @ raw["fc1_w"].T + raw["fc1_b"])
    return a @ raw["fc2_w"].T + raw["fc2_b"]


if __name__ == "__main__":
    key = jax.random.PRNGKey(0)
    pkey, xkey = jax.random.split(key)
    raw = init_params(pkey)
    packed = pack_params(raw)
    # MNIST-shaped input: batch=2, channels=1, 28x28 (required for 20*4*4 flatten)
    x = jax.random.normal(xkey, (2, 1, 28, 28), jnp.float32)

    fwd = jax.jit(mnist_forward)
    logits = fwd(packed, x)
    jax.block_until_ready(logits)
    assert logits.shape == (2, 10) and logits.dtype == jnp.float32

    ref = _ref_forward(raw, x)
    max_err = float(jnp.max(jnp.abs(logits - ref)))
    assert jnp.allclose(logits, ref, atol=5e-2, rtol=5e-2), max_err
    print("KERNEL_OK")
</pallas_src>

<mosaic_0001>
module attributes {stable_mosaic.version = 11 : i64} {
  func.func @_mnist_kernel(%arg0: i32, %arg1: memref<1x4x192x32xf32, #tpu.memory_space<vmem>>, %arg2: memref<32x128xf32, #tpu.memory_space<vmem>>, %arg3: memref<1x128xf32, #tpu.memory_space<vmem>>, %arg4: memref<25x128x128xf32, #tpu.memory_space<vmem>>, %arg5: memref<1x128xf32, #tpu.memory_space<vmem>>, %arg6: memref<2048x128xf32, #tpu.memory_space<vmem>>, %arg7: memref<1x128xf32, #tpu.memory_space<vmem>>, %arg8: memref<128x128xf32, #tpu.memory_space<vmem>>, %arg9: memref<1x128xf32, #tpu.memory_space<vmem>>, %arg10: memref<1x8x128xf32, #tpu.memory_space<vmem>>) attributes {dimension_semantics = [#tpu.dimension_semantics<parallel>], iteration_bounds = array<i64: 2>, scalar_prefetch = 0 : i64, scratch_operands = 0 : i64, tpu.core_type = #tpu.core_type<tc>, window_params = [{transform_indices = @transform_0, window_bounds = array<i64: 1, 4, 192, 32>}, {pipeline_mode = #tpu.pipeline_mode<synchronous>, transform_indices = @transform_1, window_bounds = array<i64: 32, 128>}, {pipeline_mode = #tpu.pipeline_mode<synchronous>, transform_indices = @transform_2, window_bounds = array<i64: 1, 128>}, {pipeline_mode = #tpu.pipeline_mode<synchronous>, transform_indices = @transform_3, window_bounds = array<i64: 25, 128, 128>}, {pipeline_mode = #tpu.pipeline_mode<synchronous>, transform_indices = @transform_4, window_bounds = array<i64: 1, 128>}, {pipeline_mode = #tpu.pipeline_mode<synchronous>, transform_indices = @transform_5, window_bounds = array<i64: 2048, 128>}, {pipeline_mode = #tpu.pipeline_mode<synchronous>, transform_indices = @transform_6, window_bounds = array<i64: 1, 128>}, {pipeline_mode = #tpu.pipeline_mode<synchronous>, transform_indices = @transform_7, window_bounds = array<i64: 128, 128>}, {pipeline_mode = #tpu.pipeline_mode<synchronous>, transform_indices = @transform_8, window_bounds = array<i64: 1, 128>}, {transform_indices = @transform_9, window_bounds = array<i64: 1, 8, 128>}]} {
    %c0 = arith.constant 0 : index
    %c0_0 = arith.constant 0 : index
    %c0_1 = arith.constant 0 : index
    %c0_2 = arith.constant 0 : index
    %0 = vector.load %arg1[%c0, %c0_0, %c0_1, %c0_2] : memref<1x4x192x32xf32, #tpu.memory_space<vmem>>, vector<1x1x192x32xf32>
    %1 = vector.shape_cast %0 : vector<1x1x192x32xf32> to vector<192x32xf32>
    %c0_3 = arith.constant 0 : index
    %c0_4 = arith.constant 0 : index
    %2 = vector.load %arg2[%c0_3, %c0_4] : memref<32x128xf32, #tpu.memory_space<vmem>>, vector<32x128xf32>
    %cst = arith.constant dense<0.000000e+00> : vector<192x128xf32>
    %3 = tpu.matmul %1, %2, %cst {dimension_numbers = #tpu.dot_dimension_numbers<[1], [0], [0], [1], [0, 0, 1, 1], [], []>} : vector<192x32xf32>, vector<32x128xf32>, vector<192x128xf32> -> vector<192x128xf32>
    %c0_5 = arith.constant 0 : index
    %c1 = arith.constant 1 : index
    %c0_6 = arith.constant 0 : index
    %c0_7 = arith.constant 0 : index
    %4 = vector.load %arg1[%c0_5, %c1, %c0_6, %c0_7] : memref<1x4x192x32xf32, #tpu.memory_space<vmem>>, vector<1x1x192x32xf32>
    %5 = vector.shape_cast %4 : vector<1x1x192x32xf32> to vector<192x32xf32>
    %c0_8 = arith.constant 0 : index
    %c0_9 = arith.constant 0 : index
    %6 = vector.load %arg2[%c0_8, %c0_9] : memref<32x128xf32, #tpu.memory_space<vmem>>, vector<32x128xf32>
    %cst_10 = arith.constant dense<0.000000e+00> : vector<192x128xf32>
    %7 = tpu.matmul %5, %6, %cst_10 {dimension_numbers = #tpu.dot_dimension_numbers<[1], [0], [0], [1], [0, 0, 1, 1], [], []>} : vector<192x32xf32>, vector<32x128xf32>, vector<192x128xf32> -> vector<192x128xf32>
    %8 = arith.maximumf %3, %7 : vector<192x128xf32>
    %c0_11 = arith.constant 0 : index
    %c2 = arith.constant 2 : index
    %c0_12 = arith.constant 0 : index
    %c0_13 = arith.constant 0 : index
    %9 = vector.load %arg1[%c0_11, %c2, %c0_12, %c0_13] : memref<1x4x192x32xf32, #tpu.memory_space<vmem>>, vector<1x1x192x32xf32>
    %10 = vector.shape_cast %9 : vector<1x1x192x32xf32> to vector<192x32xf32>
    %c0_14 = arith.constant 0 : index
    %c0_15 = arith.constant 0 : index
    %11 = vector.load %arg2[%c0_14, %c0_15] : memref<32x128xf32, #tpu.memory_space<vmem>>, vector<32x128xf32>
    %cst_16 = arith.constant dense<0.000000e+00> : vector<192x128xf32>
    %12 = tpu.matmul %10, %11, %cst_16 {dimension_numbers = #tpu.dot_dimension_numbers<[1], [0], [0], [1], [0, 0, 1, 1], [], []>} : vector<192x32xf32>, vector<32x128xf32>, vector<192x128xf32> -> vector<192x128xf32>
    %13 = arith.maximumf %8, %12 : vector<192x128xf32>
    %c0_17 = arith.constant 0 : index
    %c3 = arith.constant 3 : index
    %c0_18 = arith.constant 0 : index
    %c0_19 = arith.constant 0 : index
    %14 = vector.load %arg1[%c0_17, %c3, %c0_18, %c0_19] : memref<1x4x192x32xf32, #tpu.memory_space<vmem>>, vector<1x1x192x32xf32>
    %15 = vector.shape_cast %14 : vector<1x1x192x32xf32> to vector<192x32xf32>
    %c0_20 = arith.constant 0 : index
    %c0_21 = arith.constant 0 : index
    %16 = vector.load %arg2[%c0_20, %c0_21] : memref<32x128xf32, #tpu.memory_space<vmem>>, vector<32x128xf32>
    %cst_22 = arith.constant dense<0.000000e+00> : vector<192x128xf32>
    %17 = tpu.matmul %15, %16, %cst_22 {dimension_numbers = #tpu.dot_dimension_numbers<[1], [0], [0], [1], [0, 0, 1, 1], [], []>} : vector<192x32xf32>, vector<32x128xf32>, vector<192x128xf32> -> vector<192x128xf32>
    %18 = arith.maximumf %13, %17 : vector<192x128xf32>
    %c0_23 = arith.constant 0 : index
    %c0_24 = arith.constant 0 : index
    %19 = vector.load %arg3[%c0_23, %c0_24] : memref<1x128xf32, #tpu.memory_space<vmem>>, vector<1x128xf32>
    %20 = vector.broadcast %19 : vector<1x128xf32> to vector<192x128xf32>
    %21 = arith.addf %18, %20 : vector<192x128xf32>
    %cst_25 = arith.constant 0.000000e+00 : f32
    %22 = vector.broadcast %cst_25 : f32 to vector<192x128xf32>
    %23 = arith.maximumf %21, %22 : vector<192x128xf32>
    %24 = vector.extract_strided_slice %23 {offsets = [0, 0], sizes = [8, 128], strides = [1, 1]} : vector<192x128xf32> to vector<8x128xf32>
    %25 = vector.extract_strided_slice %23 {offsets = [16, 0], sizes = [8, 128], strides = [1, 1]} : vector<192x128xf32> to vector<8x128xf32>
    %26 = vector.extract_strided_slice %23 {offsets = [32, 0], sizes = [8, 128], strides = [1, 1]} : vector<192x128xf32> to vector<8x128xf32>
    %27 = vector.extract_strided_slice %23 {offsets = [48, 0], sizes = [8, 128], strides = [1, 1]} : vector<192x128xf32> to vector<8x128xf32>
    %28 = vector.extract_strided_slice %23 {offsets = [64, 0], sizes = [8, 128], strides = [1, 1]} : vector<192x128xf32> to vector<8x128xf32>
    %29 = vector.extract_strided_slice %23 {offsets = [80, 0], sizes = [8, 128], strides = [1, 1]} : vector<192x128xf32> to vector<8x128xf32>
    %30 = vector.extract_strided_slice %23 {offsets = [96, 0], sizes = [8, 128], strides = [1, 1]} : vector<192x128xf32> to vector<8x128xf32>
    %31 = vector.extract_strided_slice %23 {offsets = [112, 0], sizes = [8, 128], strides = [1, 1]} : vector<192x128xf32> to vector<8x128xf32>
    %32 = tpu.concatenate %24, %25, %26, %27, %28, %29, %30, %31 in 0 : vector<8x128xf32>, vector<8x128xf32>, vector<8x128xf32>, vector<8x128xf32>, vector<8x128xf32>, vector<8x128xf32>, vector<8x128xf32>, vector<8x128xf32> -> vector<64x128xf32>
    %c0_26 = arith.constant 0 : index
    %c0_27 = arith.constant 0 : index
    %c0_28 = arith.constant 0 : index
    %33 = vector.load %arg4[%c0_26, %c0_27, %c0_28] : memref<25x128x128xf32, #tpu.memory_space<vmem>>, vector<1x128x128xf32>
    %34 = vector.shape_cast %33 : vector<1x128x128xf32> to vector<128x128xf32>
    %cst_29 = arith.constant dense<0.000000e+00> : vector<64x128xf32>
    %35 = tpu.matmul %32, %34, %cst_29 {dimension_numbers = #tpu.dot_dimension_numbers<[1], [0], [0], [1], [0, 0, 1, 1], [], []>} : vector<64x128xf32>, vector<128x128xf32>, vector<64x128xf32> -> vector<64x128xf32>
    %36 = vector.extract_strided_slice %23 {offsets = [1, 0], sizes = [8, 128], strides = [1, 1]} : vector<192x128xf32> to vector<8x128xf32>
    %37 = vector.extract_strided_slice %23 {offsets = [17, 0], sizes = [8, 128], strides = [1, 1]} : vector<192x128xf32> to vector<8x128xf32>
    %38 = vector.extract_strided_slice %23 {offsets = [33, 0], sizes = [8, 128], strides = [1, 1]} : vector<192x128xf32> to vector<8x128xf32>
    %39 = vector.extract_strided_slice %23 {offsets = [49, 0], sizes = [8, 128], strides = [1, 1]} : vector<192x128xf32> to vector<8x128xf32>
    %40 = vector.extract_strided_slice %23 {offsets = [65, 0], sizes = [8, 128], strides = [1, 1]} : vector<192x128xf32> to vector<8x128xf32>
    %41 = vector.extract_strided_slice %23 {offsets = [81, 0], sizes = [8, 128], strides = [1, 1]} : vector<192x128xf32> to vector<8x128xf32>
    %42 = vector.extract_strided_slice %23 {offsets = [97, 0], sizes = [8, 128], strides = [1, 1]} : vector<192x128xf32> to vector<8x128xf32>
    %43 = vector.extract_strided_slice %23 {offsets = [113, 0], sizes = [8, 128], strides = [1, 1]} : vector<192x128xf32> to vector<8x128xf32>
    %44 = tpu.concatenate %36, %37, %38, %39, %40, %41, %42, %43 in 0 : vector<8x128xf32>, vector<8x128xf32>, vector<8x128xf32>, vector<8x128xf32>, vector<8x128xf32>, vector<8x128xf32>, vector<8x128xf32>, vector<8x128xf32> -> vector<64x128xf32>
    %c1_30 = arith.constant 1 : index
    %c0_31 = arith.constant 0 : index
    %c0_32 = arith.constant 0 : index
    %45 = vector.load %arg4[%c1_30, %c0_31, %c0_32] : memref<25x128x128xf32, #tpu.memory_space<vmem>>, vector<1x128x128xf32>
    %46 = vector.shape_cast %45 : vector<1x128x128xf32> to vector<128x128xf32>
    %cst_33 = arith.constant dense<0.000000e+00> : vector<64x128xf32>
    %47 = tpu.matmul %44, %46, %cst_33 {dimension_numbers = #tpu.dot_dimension_numbers<[1], [0], [0], [1], [0, 0, 1, 1], [], []>} : vector<64x128xf32>, vector<128x128xf32>, vector<64x128xf32> -> vector<64x128xf32>
    %48 = arith.addf %35, %47 : vector<64x128xf32>
    %49 = vector.extract_strided_slice %23 {offsets = [2, 0], sizes = [8, 128], strides = [1, 1]} : vector<192x128xf32> to vector<8x128xf32>
    %50 = vector.extract_strided_slice %23 {offsets = [18, 0], sizes = [8, 128], strides = [1, 1]} : vector<192x128xf32> to vector<8x128xf32>
    %51 = vector.extract_strided_slice %23 {offsets = [34, 0], sizes = [8, 128], strides = [1, 1]} : vector<192x128xf32> to vector<8x128xf32>
    %52 = vector.extract_strided_slice %23 {offsets = [50, 0], sizes = [8, 128], strides = [1, 1]} : vector<192x128xf32> to vector<8x128xf32>
    %53 = vector.extract_strided_slice %23 {offsets = [66, 0], sizes = [8, 128], strides = [1, 1]} : vector<192x128xf32> to vector<8x128xf32>
    %54 = vector.extract_strided_slice %23 {offsets = [82, 0], sizes = [8, 128], strides = [1, 1]} : vector<192x128xf32> to vector<8x128xf32>
    %55 = vector.extract_strided_slice %23 {offsets = [98, 0], sizes = [8, 128], strides = [1, 1]} : vector<192x128xf32> to vector<8x128xf32>
    %56 = vector.extract_strided_slice %23 {offsets = [114, 0], sizes = [8, 128], strides = [1, 1]} : vector<192x128xf32> to vector<8x128xf32>
    %57 = tpu.concatenate %49, %50, %51, %52, %53, %54, %55, %56 in 0 : vector<8x128xf32>, vector<8x128xf32>, vector<8x128xf32>, vector<8x128xf32>, vector<8x128xf32>, vector<8x128xf32>, vector<8x128xf32>, vector<8x128xf32> -> vector<64x128xf32>
    %c2_34 = arith.constant 2 : index
    %c0_35 = arith.constant 0 : index
    %c0_36 = arith.constant 0 : index
    %58 = vector.load %arg4[%c2_34, %c0_35, %c0_36] : memref<25x128x128xf32, #tpu.memory_space<vmem>>, vector<1x128x128xf32>
    %59 = vector.shape_cast %58 : vector<1x128x128xf32> to vector<128x128xf32>
    %cst_37 = arith.constant dense<0.000000e+00> : vector<64x128xf32>
    %60 = tpu.matmul %57, %59, %cst_37 {dimension_numbers = #tpu.dot_dimension_numbers<[1], [0], [0], [1], [0, 0, 1, 1], [], []>} : vector<64x128xf32>, vector<128x128xf32>, vector<64x128xf32> -> vector<64x128xf32>
    %61 = arith.addf %48, %60 : vector<64x128xf32>
    %62 = vector.extract_strided_slice %23 {offsets = [3, 0], sizes = [8, 128], strides = [1, 1]} : vector<192x128xf32> to vector<8x128xf32>
    %63 = vector.extract_strided_slice %23 {offsets = [19, 0], sizes = [8, 128], strides = [1, 1]} : vector<192x128xf32> to vector<8x128xf32>
    %64 = vector.extract_strided_slice %23 {offsets = [35, 0], sizes = [8, 128], strides = [1, 1]} : vector<192x128xf32> to vector<8x128xf32>
    %65 = vector.extract_strided_slice %23 {offsets = [51, 0], sizes = [8, 128], strides = [1, 1]} : vector<192x128xf32> to vector<8x128xf32>
    %66 = vector.extract_strided_slice %23 {offsets = [67, 0], sizes = [8, 128], strides = [1, 1]} : vector<192x128xf32> to vector<8x128xf32>
    %67 = vector.extract_strided_slice %23 {offsets = [83, 0], sizes = [8, 128], strides = [1, 1]} : vector<192x128xf32> to vector<8x128xf32>
    %68 = vector.extract_strided_slice %23 {offsets = [99, 0], sizes = [8, 128], strides = [1, 1]} : vector<192x128xf32> to vector<8x128xf32>
    %69 = vector.extract_strided_slice %23 {offsets = [115, 0], sizes = [8, 128], strides = [1, 1]} : vector<192x128xf32> to vector<8x128xf32>
    %70 = tpu.concatenate %62, %63, %64, %65, %66, %67, %68, %69 in 0 : vector<8x128xf32>, vector<8x128xf32>, vector<8x128xf32>, vector<8x128xf32>, vector<8x128xf32>, vector<8x128xf32>, vector<8x128xf32>, vector<8x128xf32> -> vector<64x128xf32>
    %c3_38 = arith.constant 3 : index
    %c0_39 = arith.constant 0 : index
    %c0_40 = arith.constant 0 : index
    %71 = vector.load %arg4[%c3_38, %c0_39, %c0_40] : memref<25x128x128xf32, #tpu.memory_space<vmem>>, vector<1x128x128xf32>
    %72 = vector.shape_cast %71 : vector<1x128x128xf32> to vector<128x128xf32>
    %cst_41 = arith.constant dense<0.000000e+00> : vector<64x128xf32>
    %73 = tpu.matmul %70, %72, %cst_41 {dimension_numbers = #tpu.dot_dimension_numbers<[1], [0], [0], [1], [0, 0, 1, 1], [], []>} : vector<64x128xf32>, vector<128x128xf32>, vector<64x128xf32> -> vector<64x128xf32>
    %74 = arith.addf %61, %73 : vector<64x128xf32>
    %75 = vector.extract_strided_slice %23 {offsets = [4, 0], sizes = [8, 128], strides = [1, 1]} : vector<192x128xf32> to vector<8x128xf32>
    %76 = vector.extract_strided_slice %23 {offsets = [20, 0], sizes = [8, 128], strides = [1, 1]} : vector<192x128xf32> to vector<8x128xf32>
    %77 = vector.extract_strided_slice %23 {offsets = [36, 0], sizes = [8, 128], strides = [1, 1]} : vector<192x128xf32> to vector<8x128xf32>
    %78 = vector.extract_strided_slice %23 {offsets = [52, 0], sizes = [8, 128], strides = [1, 1]} : vector<192x128xf32> to vector<8x128xf32>
    %79 = vector.extract_strided_slice %23 {offsets = [68, 0], sizes = [8, 128], strides = [1, 1]} : vector<192x128xf32> to vector<8x128xf32>
    %80 = vector.extract_strided_slice %23 {offsets = [84, 0], sizes = [8, 128], strides = [1, 1]} : vector<192x128xf32> to vector<8x128xf32>
    %81 = vector.extract_strided_slice %23 {offsets = [100, 0], sizes = [8, 128], strides = [1, 1]} : vector<192x128xf32> to vector<8x128xf32>
    %82 = vector.extract_strided_slice %23 {offsets = [116, 0], sizes = [8, 128], strides = [1, 1]} : vector<192x128xf32> to vector<8x128xf32>
    %83 = tpu.concatenate %75, %76, %77, %78, %79, %80, %81, %82 in 0 : vector<8x128xf32>, vector<8x128xf32>, vector<8x128xf32>, vector<8x128xf32>, vector<8x128xf32>, vector<8x128xf32>, vector<8x128xf32>, vector<8x128xf32> -> vector<64x128xf32>
    %c4 = arith.constant 4 : index
    %c0_42 = arith.constant 0 : index
    %c0_43 = arith.constant 0 : index
    %84 = vector.load %arg4[%c4, %c0_42, %c0_43] : memref<25x128x128xf32, #tpu.memory_space<vmem>>, vector<1x128x128xf32>
    %85 = vector.shape_cast %84 : vector<1x128x128xf32> to vector<128x128xf32>
    %cst_44 = arith.constant dense<0.000000e+00> : vector<64x128xf32>
    %86 = tpu.matmul %83, %85, %cst_44 {dimension_numbers = #tpu.dot_dimension_numbers<[1], [0], [0], [1], [0, 0, 1, 1], [], []>} : vector<64x128xf32>, vector<128x128xf32>, vector<64x128xf32> -> vector<64x128xf32>
    %87 = arith.addf %74, %86 : vector<64x128xf32>
    %88 = vector.extract_strided_slice %23 {offsets = [16, 0], sizes = [8, 128], strides = [1, 1]} : vector<192x128xf32> to vector<8x128xf32>
    %89 = vector.extract_strided_slice %23 {offsets = [32, 0], sizes = [8, 128], strides = [1, 1]} : vector<192x128xf32> to vector<8x128xf32>
    %90 = vector.extract_strided_slice %23 {offsets = [48, 0], sizes = [8, 128], strides = [1, 1]} : vector<192x128xf32> to vector<8x128xf32>
    %91 = vector.extract_strided_slice %23 {offsets = [64, 0], sizes = [8, 128], strides = [1, 1]} : vector<192x128xf32> to vector<8x128xf32>
    %92 = vector.extract_strided_slice %23 {offsets = [80, 0], sizes = [8, 128], strides = [1, 1]} : vector<192x128xf32> to vector<8x128xf32>
    %93 = vector.extract_strided_slice %23 {offsets = [96, 0], sizes = [8, 128], strides = [1, 1]} : vector<192x128xf32> to vector<8x128xf32>
    %94 = vector.extract_strided_slice %23 {offsets = [112, 0], sizes = [8, 128], strides = [1, 1]} : vector<192x128xf32> to vector<8x128xf32>
    %95 = vector.extract_strided_slice %23 {offsets = [128, 0], sizes = [8, 128], strides = [1, 1]} : vector<192x128xf32> to vector<8x128xf32>
    %96 = tpu.concatenate %88, %89, %90, %91, %92, %93, %94, %95 in 0 : vector<8x128xf32>, vector<8x128xf32>, vector<8x128xf32>, vector<8x128xf32>, vector<8x128xf32>, vector<8x128xf32>, vector<8x128xf32>, vector<8x128xf32> -> vector<64x128xf32>
    %c5 = arith.constant 5 : index
    %c0_45 = arith.constant 0 : index
    %c0_46 = arith.constant 0 : index
    %97 = vector.load %arg4[%c5, %c0_45, %c0_46] : memref<25x128x128xf32, #tpu.memory_space<vmem>>, vector<1x128x128xf32>
    %98 = vector.shape_cast %97 : vector<1x128x128xf32> to vector<128x128xf32>
    %cst_47 = arith.constant dense<0.000000e+00> : vector<64x128xf32>
    %99 = tpu.matmul %96, %98, %cst_47 {dimension_numbers = #tpu.dot_dimension_numbers<[1], [0], [0], [1], [0, 0, 1, 1], [], []>} : vector<64x128xf32>, vector<128x128xf32>, vector<64x128xf32> -> vector<64x128xf32>
    %100 = arith.addf %87, %99 : vector<64x128xf32>
    %101 = vector.extract_strided_slice %23 {offsets = [17, 0], sizes = [8, 128], strides = [1, 1]} : vector<192x128xf32> to vector<8x128xf32>
    %102 = vector.extract_strided_slice %23 {offsets = [33, 0], sizes = [8, 128], strides = [1, 1]} : vector<192x128xf32> to vector<8x128xf32>
    %103 = vector.extract_strided_slice %23 {offsets = [49, 0], sizes = [8, 128], strides = [1, 1]} : vector<192x128xf32> to vector<8x128xf32>
    %104 = vector.extract_strided_slice %23 {offsets = [65, 0], sizes = [8, 128], strides = [1, 1]} : vector<192x128xf32> to vector<8x128xf32>
    %105 = vector.extract_strided_slice %23 {offsets = [81, 0], sizes = [8, 128], strides = [1, 1]} : vector<192x128xf32> to vector<8x128xf32>
    %106 = vector.extract_strided_slice %23 {offsets = [97, 0], sizes = [8, 128], strides = [1, 1]} : vector<192x128xf32> to vector<8x128xf32>
    %107 = vector.extract_strided_slice %23 {offsets = [113, 0], sizes = [8, 128], strides = [1, 1]} : vector<192x128xf32> to vector<8x128xf32>
    %108 = vector.extract_strided_slice %23 {offsets = [129, 0], sizes = [8, 128], strides = [1, 1]} : vector<192x128xf32> to vector<8x128xf32>
    %109 = tpu.concatenate %101, %102, %103, %104, %105, %106, %107, %108 in 0 : vector<8x128xf32>, vector<8x128xf32>, vector<8x128xf32>, vector<8x128xf32>, vector<8x128xf32>, vector<8x128xf32>, vector<8x128xf32>, vector<8x128xf32> -> vector<64x128xf32>
    %c6 = arith.constant 6 : index
    %c0_48 = arith.constant 0 : index
    %c0_49 = arith.constant 0 : index
    %110 = vector.load %arg4[%c6, %c0_48, %c0_49] : memref<25x128x128xf32, #tpu.memory_space<vmem>>, vector<1x128x128xf32>
    %111 = vector.shape_cast %110 : vector<1x128x128xf32> to vector<128x128xf32>
    %cst_50 = arith.constant dense<0.000000e+00> : vector<64x128xf32>
    %112 = tpu.matmul %109, %111, %cst_50 {dimension_numbers = #tpu.dot_dimension_numbers<[1], [0], [0], [1], [0, 0, 1, 1], [], []>} : vector<64x128xf32>, vector<128x128xf32>, vector<64x128xf32> -> vector<64x128xf32>
    %113 = arith.addf %100, %112 : vector<64x128xf32>
    %114 = vector.extract_strided_slice %23 {offsets = [18, 0], sizes = [8, 128], strides = [1, 1]} : vector<192x128xf32> to vector<8x128xf32>
    %115 = vector.extract_strided_slice %23 {offsets = [34, 0], sizes = [8, 128], strides = [1, 1]} : vector<192x128xf32> to vector<8x128xf32>
    %116 = vector.extract_strided_slice %23 {offsets = [50, 0], sizes = [8, 128], strides = [1, 1]} : vector<192x128xf32> to vector<8x128xf32>
    %117 = vector.extract_strided_slice %23 {offsets = [66, 0], sizes = [8, 128], strides = [1, 1]} : vector<192x128xf32> to vector<8x128xf32>
    %118 = vector.extract_strided_slice %23 {offsets = [82, 0], sizes = [8, 128], strides = [1, 1]} : vector<192x128xf32> to vector<8x128xf32>
    %119 = vector.extract_strided_slice %23 {offsets = [98, 0], sizes = [8, 128], strides = [1, 1]} : vector<192x128xf32> to vector<8x128xf32>
    %120 = vector.extract_strided_slice %23 {offsets = [114, 0], sizes = [8, 128], strides = [1, 1]} : vector<192x128xf32> to vector<8x128xf32>
    %121 = vector.extract_strided_slice %23 {offsets = [130, 0], sizes = [8, 128], strides = [1, 1]} : vector<192x128xf32> to vector<8x128xf32>
    %122 = tpu.concatenate %114, %115, %116, %117, %118, %119, %120, %121 in 0 : vector<8x128xf32>, vector<8x128xf32>, vector<8x128xf32>, vector<8x128xf32>, vector<8x128xf32>, vector<8x128xf32>, vector<8x128xf32>, vector<8x128xf32> -> vector<64x128xf32>
    %c7 = arith.constant 7 : index
    %c0_51 = arith.constant 0 : index
    %c0_52 = arith.constant 0 : index
    %123 = vector.load %arg4[%c7, %c0_51, %c0_52] : memref<25x128x128xf32, #tpu.memory_space<vmem>>, vector<1x128x128xf32>
    %124 = vector.shape_cast %123 : vector<1x128x128xf32> to vector<128x128xf32>
    %cst_53 = arith.constant dense<0.000000e+00> : vector<64x128xf32>
    %125 = tpu.matmul %122, %124, %cst_53 {dimension_numbers = #tpu.dot_dimension_numbers<[1], [0], [0], [1], [0, 0, 1, 1], [], []>} : vector<64x128xf32>, vector<128x128xf32>, vector<64x128xf32> -> vector<64x128xf32>
    %126 = arith.addf %113, %125 : vector<64x128xf32>
    %127 = vector.extract_strided_slice %23 {offsets = [19, 0], sizes = [8, 128], strides = [1, 1]} : vector<192x128xf32> to vector<8x128xf32>
    %128 = vector.extract_strided_slice %23 {offsets = [35, 0], sizes = [8, 128], strides = [1, 1]} : vector<192x128xf32> to vector<8x128xf32>
    %129 = vector.extract_strided_slice %23 {offsets = [51, 0], sizes = [8, 128], strides = [1, 1]} : vector<192x128xf32> to vector<8x128xf32>
    %130 = vector.extract_strided_slice %23 {offsets = [67, 0], sizes = [8, 128], strides = [1, 1]} : vector<192x128xf32> to vector<8x128xf32>
    %131 = vector.extract_strided_slice %23 {offsets = [83, 0], sizes = [8, 128], strides = [1, 1]} : vector<192x128xf32> to vector<8x128xf32>
    %132 = vector.extract_strided_slice %23 {offsets = [99, 0], sizes = [8, 128], strides = [1, 1]} : vector<192x128xf32> to vector<8x128xf32>
    %133 = vector.extract_strided_slice %23 {offsets = [115, 0], sizes = [8, 128], strides = [1, 1]} : vector<192x128xf32> to vector<8x128xf32>
    %134 = vector.extract_strided_slice %23 {offsets = [131, 0], sizes = [8, 128], strides = [1, 1]} : vector<192x128xf32> to vector<8x128xf32>
    %135 = tpu.concatenate %127, %128, %129, %130, %131, %132, %133, %134 in 0 : vector<8x128xf32>, vector<8x128xf32>, vector<8x128xf32>, vector<8x128xf32>, vector<8x128xf32>, vector<8x128xf32>, vector<8x128xf32>, vector<8x128xf32> -> vector<64x128xf32>
    %c8 = arith.constant 8 : index
    %c0_54 = arith.constant 0 : index
    %c0_55 = arith.constant 0 : index
    %136 = vector.load %arg4[%c8, %c0_54, %c0_55] : memref<25x128x128xf32, #tpu.memory_space<vmem>>, vector<1x128x128xf32>
    %137 = vector.shape_cast %136 : vector<1x128x128xf32> to vector<128x128xf32>
    %cst_56 = arith.constant dense<0.000000e+00> : vector<64x128xf32>
    %138 = tpu.matmul %135, %137, %cst_56 {dimension_numbers = #tpu.dot_dimension_numbers<[1], [0], [0], [1], [0, 0, 1, 1], [], []>} : vector<64x128xf32>, vector<128x128xf32>, vector<64x128xf32> -> vector<64x128xf32>
    %139 = arith.addf %126, %138 : vector<64x128xf32>
    %140 = vector.extract_strided_slice %23 {offsets = [20, 0], sizes = [8, 128], strides = [1, 1]} : vector<192x128xf32> to vector<8x128xf32>
    %141 = vector.extract_strided_slice %23 {offsets = [36, 0], sizes = [8, 128], strides = [1, 1]} : vector<192x128xf32> to vector<8x128xf32>
    %142 = vector.extract_strided_slice %23 {offsets = [52, 0], sizes = [8, 128], strides = [1, 1]} : vector<192x128xf32> to vector<8x128xf32>
    %143 = vector.extract_strided_slice %23 {offsets = [68, 0], sizes = [8, 128], strides = [1, 1]} : vector<192x128xf32> to vector<8x128xf32>
    %144 = vector.extract_strided_slice %23 {offsets = [84, 0], sizes = [8, 128], strides = [1, 1]} : vector<192x128xf32> to vector<8x128xf32>
    %145 = vector.extract_strided_slice %23 {offsets = [100, 0], sizes = [8, 128], strides = [1, 1]} : vector<192x128xf32> to vector<8x128xf32>
    %146 = vector.extract_strided_slice %23 {offsets = [116, 0], sizes = [8, 128], strides = [1, 1]} : vector<192x128xf32> to vector<8x128xf32>
    %147 = vector.extract_strided_slice %23 {offsets = [132, 0], sizes = [8, 128], strides = [1, 1]} : vector<192x128xf32> to vector<8x128xf32>
    %148 = tpu.concatenate %140, %141, %142, %143, %144, %145, %146, %147 in 0 : vector<8x128xf32>, vector<8x128xf32>, vector<8x128xf32>, vector<8x128xf32>, vector<8x128xf32>, vector<8x128xf32>, vector<8x128xf32>, vector<8x128xf32> -> vector<64x128xf32>
    %c9 = arith.constant 9 : index
    %c0_57 = arith.constant 0 : index
    %c0_58 = arith.constant 0 : index
    %149 = vector.load %arg4[%c9, %c0_57, %c0_58] : memref<25x128x128xf32, #tpu.memory_space<vmem>>, vector<1x128x128xf32>
    %150 = vector.shape_cast %149 : vector<1x128x128xf32> to vector<128x128xf32>
    %cst_59 = arith.constant dense<0.000000e+00> : vector<64x128xf32>
    %151 = tpu.matmul %148, %150, %cst_59 {dimension_numbers = #tpu.dot_dimension_numbers<[1], [0], [0], [1], [0, 0, 1, 1], [], []>} : vector<64x128xf32>, vector<128x128xf32>, vector<64x128xf32> -> vector<64x128xf32>
    %152 = arith.addf %139, %151 : vector<64x128xf32>
    %153 = vector.extract_strided_slice %23 {offsets = [32, 0], sizes = [8, 128], strides = [1, 1]} : vector<192x128xf32> to vector<8x128xf32>
    %154 = vector.extract_strided_slice %23 {offsets = [48, 0], sizes = [8, 128], strides = [1, 1]} : vector<192x128xf32> to vector<8x128xf32>
    %155 = vector.extract_strided_slice %23 {offsets = [64, 0], sizes = [8, 128], strides = [1, 1]} : vector<192x128xf32> to vector<8x128xf32>
    %156 = vector.extract_strided_slice %23 {offsets = [80, 0], sizes = [8, 128], strides = [1, 1]} : vector<192x128xf32> to vector<8x128xf32>
    %157 = vector.extract_strided_slice %23 {offsets = [96, 0], sizes = [8, 128], strides = [1, 1]} : vector<192x128xf32> to vector<8x128xf32>
    %158 = vector.extract_strided_slice %23 {offsets = [112, 0], sizes = [8, 128], strides = [1, 1]} : vector<192x128xf32> to vector<8x128xf32>
    %159 = vector.extract_strided_slice %23 {offsets = [128, 0], sizes = [8, 128], strides = [1, 1]} : vector<192x128xf32> to vector<8x128xf32>
    %160 = vector.extract_strided_slice %23 {offsets = [144, 0], sizes = [8, 128], strides = [1, 1]} : vector<192x128xf32> to vector<8x128xf32>
    %161 = tpu.concatenate %153, %154, %155, %156, %157, %158, %159, %160 in 0 : vector<8x128xf32>, vector<8x128xf32>, vector<8x128xf32>, vector<8x128xf32>, vector<8x128xf32>, vector<8x128xf32>, vector<8x128xf32>, vector<8x128xf32> -> vector<64x128xf32>
    %c10 = arith.constant 10 : index
    %c0_60 = arith.constant 0 : index
    %c0_61 = arith.constant 0 : index
    %162 = vector.load %arg4[%c10, %c0_60, %c0_61] : memref<25x128x128xf32, #tpu.memory_space<vmem>>, vector<1x128x128xf32>
    %163 = vector.shape_cast %162 : vector<1x128x128xf32> to vector<128x128xf32>
    %cst_62 = arith.constant dense<0.000000e+00> : vector<64x128xf32>
    %164 = tpu.matmul %161, %163, %cst_62 {dimension_numbers = #tpu.dot_dimension_numbers<[1], [0], [0], [1], [0, 0, 1, 1], [], []>} : vector<64x128xf32>, vector<128x128xf32>, vector<64x128xf32> -> vector<64x128xf32>
    %165 = arith.addf %152, %164 : vector<64x128xf32>
    %166 = vector.extract_strided_slice %23 {offsets = [33, 0], sizes = [8, 128], strides = [1, 1]} : vector<192x128xf32> to vector<8x128xf32>
    %167 = vector.extract_strided_slice %23 {offsets = [49, 0], sizes = [8, 128], strides = [1, 1]} : vector<192x128xf32> to vector<8x128xf32>
    %168 = vector.extract_strided_slice %23 {offsets = [65, 0], sizes = [8, 128], strides = [1, 1]} : vector<192x128xf32> to vector<8x128xf32>
    %169 = vector.extract_strided_slice %23 {offsets = [81, 0], sizes = [8, 128], strides = [1, 1]} : vector<192x128xf32> to vector<8x128xf32>
    %170 = vector.extract_strided_slice %23 {offsets = [97, 0], sizes = [8, 128], strides = [1, 1]} : vector<192x128xf32> to vector<8x128xf32>
    %171 = vector.extract_strided_slice %23 {offsets = [113, 0], sizes = [8, 128], strides = [1, 1]} : vector<192x128xf32> to vector<8x128xf32>
    %172 = vector.extract_strided_slice %23 {offsets = [129, 0], sizes = [8, 128], strides = [1, 1]} : vector<192x128xf32> to vector<8x128xf32>
    %173 = vector.extract_strided_slice %23 {offsets = [145, 0], sizes = [8, 128], strides = [1, 1]} : vector<192x128xf32> to vector<8x128xf32>
    %174 = tpu.concatenate %166, %167, %168, %169, %170, %171, %172, %173 in 0 : vector<8x128xf32>, vector<8x128xf32>, vector<8x128xf32>, vector<8x128xf32>, vector<8x128xf32>, vector<8x128xf32>, vector<8x128xf32>, vector<8x128xf32> -> vector<64x128xf32>
    %c11 = arith.constant 11 : index
    %c0_63 = arith.constant 0 : index
    %c0_64 = arith.constant 0 : index
    %175 = vector.load %arg4[%c11, %c0_63, %c0_64] : memref<25x128x128xf32, #tpu.memory_space<vmem>>, vector<1x128x128xf32>
    %176 = vector.shape_cast %175 : vector<1x128x128xf32> to vector<128x128xf32>
    %cst_65 = arith.constant dense<0.000000e+00> : vector<64x128xf32>
    %177 = tpu.matmul %174, %176, %cst_65 {dimension_numbers = #tpu.dot_dimension_numbers<[1], [0], [0], [1], [0, 0, 1, 1], [], []>} : vector<64x128xf32>, vector<128x128xf32>, vector<64x128xf32> -> vector<64x128xf32>
    %178 = arith.addf %165, %177 : vector<64x128xf32>
    %179 = vector.extract_strided_slice %23 {offsets = [34, 0], sizes = [8, 128], strides = [1, 1]} : vector<192x128xf32> to vector<8x128xf32>
    %180 = vector.extract_strided_slice %23 {offsets = [50, 0], sizes = [8, 128], strides = [1, 1]} : vector<192x128xf32> to vector<8x128xf32>
    %181 = vector.extract_strided_slice %23 {offsets = [66, 0], sizes = [8, 128], strides = [1, 1]} : vector<192x128xf32> to vector<8x128xf32>
    %182 = vector.extract_strided_slice %23 {offsets = [82, 0], sizes = [8, 128], strides = [1, 1]} : vector<192x128xf32> to vector<8x128xf32>
    %183 = vector.extract_strided_slice %23 {offsets = [98, 0], sizes = [8, 128], strides = [1, 1]} : vector<192x128xf32> to vector<8x128xf32>
    %184 = vector.extract_strided_slice %23 {offsets = [114, 0], sizes = [8, 128], strides = [1, 1]} : vector<192x128xf32> to vector<8x128xf32>
    %185 = vector.extract_strided_slice %23 {offsets = [130, 0], sizes = [8, 128], strides = [1, 1]} : vector<192x128xf32> to vector<8x128xf32>
    %186 = vector.extract_strided_slice %23 {offsets = [146, 0], sizes = [8, 128], strides = [1, 1]} : vector<192x128xf32> to vector<8x128xf32>
    %187 = tpu.concatenate %179, %180, %181, %182, %183, %184, %185, %186 in 0 : vector<8x128xf32>, vector<8x128xf32>, vector<8x128xf32>, vector<8x128xf32>, vector<8x128xf32>, vector<8x128xf32>, vector<8x128xf32>, vector<8x128xf32> -> vector<64x128xf32>
    %c12 = arith.constant 12 : index
    %c0_66 = arith.constant 0 : index
    %c0_67 = arith.constant 0 : index
    %188 = vector.load %arg4[%c12, %c0_66, %c0_67] : memref<25x128x128xf32, #tpu.memory_space<vmem>>, vector<1x128x128xf32>
    %189 = vector.shape_cast %188 : vector<1x128x128xf32> to vector<128x128xf32>
    %cst_68 = arith.constant dense<0.000000e+00> : vector<64x128xf32>
    %190 = tpu.matmul %187, %189, %cst_68 {dimension_numbers = #tpu.dot_dimension_numbers<[1], [0], [0], [1], [0, 0, 1, 1], [], []>} : vector<64x128xf32>, vector<128x128xf32>, vector<64x128xf32> -> vector<64x128xf32>
    %191 = arith.addf %178, %190 : vector<64x128xf32>
    %192 = vector.extract_strided_slice %23 {offsets = [35, 0], sizes = [8, 128], strides = [1, 1]} : vector<192x128xf32> to vector<8x128xf32>
    %193 = vector.extract_strided_slice %23 {offsets = [51, 0], sizes = [8, 128], strides = [1, 1]} : vector<192x128xf32> to vector<8x128xf32>
    %194 = vector.extract_strided_slice %23 {offsets = [67, 0], sizes = [8, 128], strides = [1, 1]} : vector<192x128xf32> to vector<8x128xf32>
    %195 = vector.extract_strided_slice %23 {offsets = [83, 0], sizes = [8, 128], strides = [1, 1]} : vector<192x128xf32> to vector<8x128xf32>
    %196 = vector.extract_strided_slice %23 {offsets = [99, 0], sizes = [8, 128], strides = [1, 1]} : vector<192x128xf32> to vector<8x128xf32>
    %197 = vector.extract_strided_slice %23 {offsets = [115, 0], sizes = [8, 128], strides = [1, 1]} : vector<192x128xf32> to vector<8x128xf32>
    %198 = vector.extract_strided_slice %23 {offsets = [131, 0], sizes = [8, 128], strides = [1, 1]} : vector<192x128xf32> to vector<8x128xf32>
    %199 = vector.extract_strided_slice %23 {offsets = [147, 0], sizes = [8, 128], strides = [1, 1]} : vector<192x128xf32> to vector<8x128xf32>
    %200 = tpu.concatenate %192, %193, %194, %195, %196, %197, %198, %199 in 0 : vector<8x128xf32>, vector<8x128xf32>, vector<8x128xf32>, vector<8x128xf32>, vector<8x128xf32>, vector<8x128xf32>, vector<8x128xf32>, vector<8x128xf32> -> vector<64x128xf32>
    %c13 = arith.constant 13 : index
    %c0_69 = arith.constant 0 : index
    %c0_70 = arith.constant 0 : index
    %201 = vector.load %arg4[%c13, %c0_69, %c0_70] : memref<25x128x128xf32, #tpu.memory_space<vmem>>, vector<1x128x128xf32>
    %202 = vector.shape_cast %201 : vector<1x128x128xf32> to vector<128x128xf32>
    %cst_71 = arith.constant dense<0.000000e+00> : vector<64x128xf32>
    %203 = tpu.matmul %200, %202, %cst_71 {dimension_numbers = #tpu.dot_dimension_numbers<[1], [0], [0], [1], [0, 0, 1, 1], [], []>} : vector<64x128xf32>, vector<128x128xf32>, vector<64x128xf32> -> vector<64x128xf32>
    %204 = arith.addf %191, %203 : vector<64x128xf32>
    %205 = vector.extract_strided_slice %23 {offsets = [36, 0], sizes = [8, 128], strides = [1, 1]} : vector<192x128xf32> to vector<8x128xf32>
    %206 = vector.extract_strided_slice %23 {offsets = [52, 0], sizes = [8, 128], strides = [1, 1]} : vector<192x128xf32> to vector<8x128xf32>
    %207 = vector.extract_strided_slice %23 {offsets = [68, 0], sizes = [8, 128], strides = [1, 1]} : vector<192x128xf32> to vector<8x128xf32>
    %208 = vector.extract_strided_slice %23 {offsets = [84, 0], sizes = [8, 128], strides = [1, 1]} : vector<192x128xf32> to vector<8x128xf32>
    %209 = vector.extract_strided_slice %23 {offsets = [100, 0], sizes = [8, 128], strides = [1, 1]} : vector<192x128xf32> to vector<8x128xf32>
    %210 = vector.extract_strided_slice %23 {offsets = [116, 0], sizes = [8, 128], strides = [1, 1]} : vector<192x128xf32> to vector<8x128xf32>
    %211 = vector.extract_strided_slice %23 {offsets = [132, 0], sizes = [8, 128], strides = [1, 1]} : vector<192x128xf32> to vector<8x128xf32>
    %212 = vector.extract_strided_slice %23 {offsets = [148, 0], sizes = [8, 128], strides = [1, 1]} : vector<192x128xf32> to vector<8x128xf32>
    %213 = tpu.concatenate %205, %206, %207, %208, %209, %210, %211, %212 in 0 : vector<8x128xf32>, vector<8x128xf32>, vector<8x128xf32>, vector<8x128xf32>, vector<8x128xf32>, vector<8x128xf32>, vector<8x128xf32>, vector<8x128xf32> -> vector<64x128xf32>
    %c14 = arith.constant 14 : index
    %c0_72 = arith.constant 0 : index
    %c0_73 = arith.constant 0 : index
    %214 = vector.load %arg4[%c14, %c0_72, %c0_73] : memref<25x128x128xf32, #tpu.memory_space<vmem>>, vector<1x128x128xf32>
    %215 = vector.shape_cast %214 : vector<1x128x128xf32> to vector<128x128xf32>
    %cst_74 = arith.constant dense<0.000000e+00> : vector<64x128xf32>
    %216 = tpu.matmul %213, %215, %cst_74 {dimension_numbers = #tpu.dot_dimension_numbers<[1], [0], [0], [1], [0, 0, 1, 1], [], []>} : vector<64x128xf32>, vector<128x128xf32>, vector<64x128xf32> -> vector<64x128xf32>
    %217 = arith.addf %204, %216 : vector<64x128xf32>
    %218 = vector.extract_strided_slice %23 {offsets = [48, 0], sizes = [8, 128], strides = [1, 1]} : vector<192x128xf32> to vector<8x128xf32>
    %219 = vector.extract_strided_slice %23 {offsets = [64, 0], sizes = [8, 128], strides = [1, 1]} : vector<192x128xf32> to vector<8x128xf32>
    %220 = vector.extract_strided_slice %23 {offsets = [80, 0], sizes = [8, 128], strides = [1, 1]} : vector<192x128xf32> to vector<8x128xf32>
    %221 = vector.extract_strided_slice %23 {offsets = [96, 0], sizes = [8, 128], strides = [1, 1]} : vector<192x128xf32> to vector<8x128xf32>
    %222 = vector.extract_strided_slice %23 {offsets = [112, 0], sizes = [8, 128], strides = [1, 1]} : vector<192x128xf32> to vector<8x128xf32>
    %223 = vector.extract_strided_slice %23 {offsets = [128, 0], sizes = [8, 128], strides = [1, 1]} : vector<192x128xf32> to vector<8x128xf32>
    %224 = vector.extract_strided_slice %23 {offsets = [144, 0], sizes = [8, 128], strides = [1, 1]} : vector<192x128xf32> to vector<8x128xf32>
    %225 = vector.extract_strided_slice %23 {offsets = [160, 0], sizes = [8, 128], strides = [1, 1]} : vector<192x128xf32> to vector<8x128xf32>
    %226 = tpu.concatenate %218, %219, %220, %221, %222, %223, %224, %225 in 0 : vector<8x128xf32>, vector<8x128xf32>, vector<8x128xf32>, vector<8x128xf32>, vector<8x128xf32>, vector<8x128xf32>, vector<8x128xf32>, vector<8x128xf32> -> vector<64x128xf32>
    %c15 = arith.constant 15 : index
    %c0_75 = arith.constant 0 : index
    %c0_76 = arith.constant 0 : index
    %227 = vector.load %arg4[%c15, %c0_75, %c0_76] : memref<25x128x128xf32, #tpu.memory_space<vmem>>, vector<1x128x128xf32>
    %228 = vector.shape_cast %227 : vector<1x128x128xf32> to vector<128x128xf32>
    %cst_77 = arith.constant dense<0.000000e+00> : vector<64x128xf32>
    %229 = tpu.matmul %226, %228, %cst_77 {dimension_numbers = #tpu.dot_dimension_numbers<[1], [0], [0], [1], [0, 0, 1, 1], [], []>} : vector<64x128xf32>, vector<128x128xf32>, vector<64x128xf32> -> vector<64x128xf32>
    %230 = arith.addf %217, %229 : vector<64x128xf32>
    %231 = vector.extract_strided_slice %23 {offsets = [49, 0], sizes = [8, 128], strides = [1, 1]} : vector<192x128xf32> to vector<8x128xf32>
    %232 = vector.extract_strided_slice %23 {offsets = [65, 0], sizes = [8, 128], strides = [1, 1]} : vector<192x128xf32> to vector<8x128xf32>
    %233 = vector.extract_strided_slice %23 {offsets = [81, 0], sizes = [8, 128], strides = [1, 1]} : vector<192x128xf32> to vector<8x128xf32>
    %234 = vector.extract_strided_slice %23 {offsets = [97, 0], sizes = [8, 128], strides = [1, 1]} : vector<192x128xf32> to vector<8x128xf32>
    %235 = vector.extract_strided_slice %23 {offsets = [113, 0], sizes = [8, 128], strides = [1, 1]} : vector<192x128xf32> to vector<8x128xf32>
    %236 = vector.extract_strided_slice %23 {offsets = [129, 0], sizes = [8, 128], strides = [1, 1]} : vector<192x128xf32> to vector<8x128xf32>
    %237 = vector.extract_strided_slice %23 {offsets = [145, 0], sizes = [8, 128], strides = [1, 1]} : vector<192x128xf32> to vector<8x128xf32>
    %238 = vector.extract_strided_slice %23 {offsets = [161, 0], sizes = [8, 128], strides = [1, 1]} : vector<192x128xf32> to vector<8x128xf32>
    %239 = tpu.concatenate %231, %232, %233, %234, %235, %236, %237, %238 in 0 : vector<8x128xf32>, vector<8x128xf32>, vector<8x128xf32>, vector<8x128xf32>, vector<8x128xf32>, vector<8x128xf32>, vector<8x128xf32>, vector<8x128xf32> -> vector<64x128xf32>
    %c16 = arith.constant 16 : index
    %c0_78 = arith.constant 0 : index
    %c0_79 = arith.constant 0 : index
    %240 = vector.load %arg4[%c16, %c0_78, %c0_79] : memref<25x128x128xf32, #tpu.memory_space<vmem>>, vector<1x128x128xf32>
    %241 = vector.shape_cast %240 : vector<1x128x128xf32> to vector<128x128xf32>
    %cst_80 = arith.constant dense<0.000000e+00> : vector<64x128xf32>
    %242 = tpu.matmul %239, %241, %cst_80 {dimension_numbers = #tpu.dot_dimension_numbers<[1], [0], [0], [1], [0, 0, 1, 1], [], []>} : vector<64x128xf32>, vector<128x128xf32>, vector<64x128xf32> -> vector<64x128xf32>
    %243 = arith.addf %230, %242 : vector<64x128xf32>
    %244 = vector.extract_strided_slice %23 {offsets = [50, 0], sizes = [8, 128], strides = [1, 1]} : vector<192x128xf32> to vector<8x128xf32>
    %245 = vector.extract_strided_slice %23 {offsets = [66, 0], sizes = [8, 128], strides = [1, 1]} : vector<192x128xf32> to vector<8x128xf32>
    %246 = vector.extract_strided_slice %23 {offsets = [82, 0], sizes = [8, 128], strides = [1, 1]} : vector<192x128xf32> to vector<8x128xf32>
    %247 = vector.extract_strided_slice %23 {offsets = [98, 0], sizes = [8, 128], strides = [1, 1]} : vector<192x128xf32> to vector<8x128xf32>
    %248 = vector.extract_strided_slice %23 {offsets = [114, 0], sizes = [8, 128], strides = [1, 1]} : vector<192x128xf32> to vector<8x128xf32>
    %249 = vector.extract_strided_slice %23 {offsets = [130, 0], sizes = [8, 128], strides = [1, 1]} : vector<192x128xf32> to vector<8x128xf32>
    %250 = vector.extract_strided_slice %23 {offsets = [146, 0], sizes = [8, 128], strides = [1, 1]} : vector<192x128xf32> to vector<8x128xf32>
    %251 = vector.extract_strided_slice %23 {offsets = [162, 0], sizes = [8, 128], strides = [1, 1]} : vector<192x128xf32> to vector<8x128xf32>
    %252 = tpu.concatenate %244, %245, %246, %247, %248, %249, %250, %251 in 0 : vector<8x128xf32>, vector<8x128xf32>, vector<8x128xf32>, vector<8x128xf32>, vector<8x128xf32>, vector<8x128xf32>, vector<8x128xf32>, vector<8x128xf32> -> vector<64x128xf32>
    %c17 = arith.constant 17 : index
    %c0_81 = arith.constant 0 : index
    %c0_82 = arith.constant 0 : index
    %253 = vector.load %arg4[%c17, %c0_81, %c0_82] : memref<25x128x128xf32, #tpu.memory_space<vmem>>, vector<1x128x128xf32>
    %254 = vector.shape_cast %253 : vector<1x128x128xf32> to vector<128x128xf32>
    %cst_83 = arith.constant dense<0.000000e+00> : vector<64x128xf32>
    %255 = tpu.matmul %252, %254, %cst_83 {dimension_numbers = #tpu.dot_dimension_numbers<[1], [0], [0], [1], [0, 0, 1, 1], [], []>} : vector<64x128xf32>, vector<128x128xf32>, vector<64x128xf32> -> vector<64x128xf32>
    %256 = arith.addf %243, %255 : vector<64x128xf32>
    %257 = vector.extract_strided_slice %23 {offsets = [51, 0], sizes = [8, 128], strides = [1, 1]} : vector<192x128xf32> to vector<8x128xf32>
    %258 = vector.extract_strided_slice %23 {offsets = [67, 0], sizes = [8, 128], strides = [1, 1]} : vector<192x128xf32> to vector<8x128xf32>
    %259 = vector.extract_strided_slice %23 {offsets = [83, 0], sizes = [8, 128], strides = [1, 1]} : vector<192x128xf32> to vector<8x128xf32>
    %260 = vector.extract_strided_slice %23 {offsets = [99, 0], sizes = [8, 128], strides = [1, 1]} : vector<192x128xf32> to vector<8x128xf32>
    %261 = vector.extract_strided_slice %23 {offsets = [115, 0], sizes = [8, 128], strides = [1, 1]} : vector<192x128xf32> to vector<8x128xf32>
    %262 = vector.extract_strided_slice %23 {offsets = [131, 0], sizes = [8, 128], strides = [1, 1]} : vector<192x128xf32> to vector<8x128xf32>
    %263 = vector.extract_strided_slice %23 {offsets = [147, 0], sizes = [8, 128], strides = [1, 1]} : vector<192x128xf32> to vector<8x128xf32>
    %264 = vector.extract_strided_slice %23 {offsets = [163, 0], sizes = [8, 128], strides = [1, 1]} : vector<192x128xf32> to vector<8x128xf32>
    %265 = tpu.concatenate %257, %258, %259, %260, %261, %262, %263, %264 in 0 : vector<8x128xf32>, vector<8x128xf32>, vector<8x128xf32>, vector<8x128xf32>, vector<8x128xf32>, vector<8x128xf32>, vector<8x128xf32>, vector<8x128xf32> -> vector<64x128xf32>
    %c18 = arith.constant 18 : index
    %c0_84 = arith.constant 0 : index
    %c0_85 = arith.constant 0 : index
    %266 = vector.load %arg4[%c18, %c0_84, %c0_85] : memref<25x128x128xf32, #tpu.memory_space<vmem>>, vector<1x128x128xf32>
    %267 = vector.shape_cast %266 : vector<1x128x128xf32> to vector<128x128xf32>
    %cst_86 = arith.constant dense<0.000000e+00> : vector<64x128xf32>
    %268 = tpu.matmul %265, %267, %cst_86 {dimension_numbers = #tpu.dot_dimension_numbers<[1], [0], [0], [1], [0, 0, 1, 1], [], []>} : vector<64x128xf32>, vector<128x128xf32>, vector<64x128xf32> -> vector<64x128xf32>
    %269 = arith.addf %256, %268 : vector<64x128xf32>
    %270 = vector.extract_strided_slice %23 {offsets = [52, 0], sizes = [8, 128], strides = [1, 1]} : vector<192x128xf32> to vector<8x128xf32>
    %271 = vector.extract_strided_slice %23 {offsets = [68, 0], sizes = [8, 128], strides = [1, 1]} : vector<192x128xf32> to vector<8x128xf32>
    %272 = vector.extract_strided_slice %23 {offsets = [84, 0], sizes = [8, 128], strides = [1, 1]} : vector<192x128xf32> to vector<8x128xf32>
    %273 = vector.extract_strided_slice %23 {offsets = [100, 0], sizes = [8, 128], strides = [1, 1]} : vector<192x128xf32> to vector<8x128xf32>
    %274 = vector.extract_strided_slice %23 {offsets = [116, 0], sizes = [8, 128], strides = [1, 1]} : vector<192x128xf32> to vector<8x128xf32>
    %275 = vector.extract_strided_slice %23 {offsets = [132, 0], sizes = [8, 128], strides = [1, 1]} : vector<192x128xf32> to vector<8x128xf32>
    %276 = vector.extract_strided_slice %23 {offsets = [148, 0], sizes = [8, 128], strides = [1, 1]} : vector<192x128xf32> to vector<8x128xf32>
    %277 = vector.extract_strided_slice %23 {offsets = [164, 0], sizes = [8, 128], strides = [1, 1]} : vector<192x128xf32> to vector<8x128xf32>
    %278 = tpu.concatenate %270, %271, %272, %273, %274, %275, %276, %277 in 0 : vector<8x128xf32>, vector<8x128xf32>, vector<8x128xf32>, vector<8x128xf32>, vector<8x128xf32>, vector<8x128xf32>, vector<8x128xf32>, vector<8x128xf32> -> vector<64x128xf32>
    %c19 = arith.constant 19 : index
    %c0_87 = arith.constant 0 : index
    %c0_88 = arith.constant 0 : index
    %279 = vector.load %arg4[%c19, %c0_87, %c0_88] : memref<25x128x128xf32, #tpu.memory_space<vmem>>, vector<1x128x128xf32>
    %280 = vector.shape_cast %279 : vector<1x128x128xf32> to vector<128x128xf32>
    %cst_89 = arith.constant dense<0.000000e+00> : vector<64x128xf32>
    %281 = tpu.matmul %278, %280, %cst_89 {dimension_numbers = #tpu.dot_dimension_numbers<[1], [0], [0], [1], [0, 0, 1, 1], [], []>} : vector<64x128xf32>, vector<128x128xf32>, vector<64x128xf32> -> vector<64x128xf32>
    %282 = arith.addf %269, %281 : vector<64x128xf32>
    %283 = vector.extract_strided_slice %23 {offsets = [64, 0], sizes = [8, 128], strides = [1, 1]} : vector<192x128xf32> to vector<8x128xf32>
    %284 = vector.extract_strided_slice %23 {offsets = [80, 0], sizes = [8, 128], strides = [1, 1]} : vector<192x128xf32> to vector<8x128xf32>
    %285 = vector.extract_strided_slice %23 {offsets = [96, 0], sizes = [8, 128], strides = [1, 1]} : vector<192x128xf32> to vector<8x128xf32>
    %286 = vector.extract_strided_slice %23 {offsets = [112, 0], sizes = [8, 128], strides = [1, 1]} : vector<192x128xf32> to vector<8x128xf32>
    %287 = vector.extract_strided_slice %23 {offsets = [128, 0], sizes = [8, 128], strides = [1, 1]} : vector<192x128xf32> to vector<8x128xf32>
    %288 = vector.extract_strided_slice %23 {offsets = [144, 0], sizes = [8, 128], strides = [1, 1]} : vector<192x128xf32> to vector<8x128xf32>
    %289 = vector.extract_strided_slice %23 {offsets = [160, 0], sizes = [8, 128], strides = [1, 1]} : vector<192x128xf32> to vector<8x128xf32>
    %290 = vector.extract_strided_slice %23 {offsets = [176, 0], sizes = [8, 128], strides = [1, 1]} : vector<192x128xf32> to vector<8x128xf32>
    %291 = tpu.concatenate %283, %284, %285, %286, %287, %288, %289, %290 in 0 : vector<8x128xf32>, vector<8x128xf32>, vector<8x128xf32>, vector<8x128xf32>, vector<8x128xf32>, vector<8x128xf32>, vector<8x128xf32>, vector<8x128xf32> -> vector<64x128xf32>
    %c20 = arith.constant 20 : index
    %c0_90 = arith.constant 0 : index
    %c0_91 = arith.constant 0 : index
    %292 = vector.load %arg4[%c20, %c0_90, %c0_91] : memref<25x128x128xf32, #tpu.memory_space<vmem>>, vector<1x128x128xf32>
    %293 = vector.shape_cast %292 : vector<1x128x128xf32> to vector<128x128xf32>
    %cst_92 = arith.constant dense<0.000000e+00> : vector<64x128xf32>
    %294 = tpu.matmul %291, %293, %cst_92 {dimension_numbers = #tpu.dot_dimension_numbers<[1], [0], [0], [1], [0, 0, 1, 1], [], []>} : vector<64x128xf32>, vector<128x128xf32>, vector<64x128xf32> -> vector<64x128xf32>
    %295 = arith.addf %282, %294 : vector<64x128xf32>
    %296 = vector.extract_strided_slice %23 {offsets = [65, 0], sizes = [8, 128], strides = [1, 1]} : vector<192x128xf32> to vector<8x128xf32>
    %297 = vector.extract_strided_slice %23 {offsets = [81, 0], sizes = [8, 128], strides = [1, 1]} : vector<192x128xf32> to vector<8x128xf32>
    %298 = vector.extract_strided_slice %23 {offsets = [97, 0], sizes = [8, 128], strides = [1, 1]} : vector<192x128xf32> to vector<8x128xf32>
    %299 = vector.extract_strided_slice %23 {offsets = [113, 0], sizes = [8, 128], strides = [1, 1]} : vector<192x128xf32> to vector<8x128xf32>
    %300 = vector.extract_strided_slice %23 {offsets = [129, 0], sizes = [8, 128], strides = [1, 1]} : vector<192x128xf32> to vector<8x128xf32>
    %301 = vector.extract_strided_slice %23 {offsets = [145, 0], sizes = [8, 128], strides = [1, 1]} : vector<192x128xf32> to vector<8x128xf32>
    %302 = vector.extract_strided_slice %23 {offsets = [161, 0], sizes = [8, 128], strides = [1, 1]} : vector<192x128xf32> to vector<8x128xf32>
    %303 = vector.extract_strided_slice %23 {offsets = [177, 0], sizes = [8, 128], strides = [1, 1]} : vector<192x128xf32> to vector<8x128xf32>
    %304 = tpu.concatenate %296, %297, %298, %299, %300, %301, %302, %303 in 0 : vector<8x128xf32>, vector<8x128xf32>, vector<8x128xf32>, vector<8x128xf32>, vector<8x128xf32>, vector<8x128xf32>, vector<8x128xf32>, vector<8x128xf32> -> vector<64x128xf32>
    %c21 = arith.constant 21 : index
    %c0_93 = arith.constant 0 : index
    %c0_94 = arith.constant 0 : index
    %305 = vector.load %arg4[%c21, %c0_93, %c0_94] : memref<25x128x128xf32, #tpu.memory_space<vmem>>, vector<1x128x128xf32>
    %306 = vector.shape_cast %305 : vector<1x128x128xf32> to vector<128x128xf32>
    %cst_95 = arith.constant dense<0.000000e+00> : vector<64x128xf32>
    %307 = tpu.matmul %304, %306, %cst_95 {dimension_numbers = #tpu.dot_dimension_numbers<[1], [0], [0], [1], [0, 0, 1, 1], [], []>} : vector<64x128xf32>, vector<128x128xf32>, vector<64x128xf32> -> vector<64x128xf32>
    %308 = arith.addf %295, %307 : vector<64x128xf32>
    %309 = vector.extract_strided_slice %23 {offsets = [66, 0], sizes = [8, 128], strides = [1, 1]} : vector<192x128xf32> to vector<8x128xf32>
    %310 = vector.extract_strided_slice %23 {offsets = [82, 0], sizes = [8, 128], strides = [1, 1]} : vector<192x128xf32> to vector<8x128xf32>
    %311 = vector.extract_strided_slice %23 {offsets = [98, 0], sizes = [8, 128], strides = [1, 1]} : vector<192x128xf32> to vector<8x128xf32>
    %312 = vector.extract_strided_slice %23 {offsets = [114, 0], sizes = [8, 128], strides = [1, 1]} : vector<192x128xf32> to vector<8x128xf32>
    %313 = vector.extract_strided_slice %23 {offsets = [130, 0], sizes = [8, 128], strides = [1, 1]} : vector<192x128xf32> to vector<8x128xf32>
    %314 = vector.extract_strided_slice %23 {offsets = [146, 0], sizes = [8, 128], strides = [1, 1]} : vector<192x128xf32> to vector<8x128xf32>
    %315 = vector.extract_strided_slice %23 {offsets = [162, 0], sizes = [8, 128], strides = [1, 1]} : vector<192x128xf32> to vector<8x128xf32>
    %316 = vector.extract_strided_slice %23 {offsets = [178, 0], sizes = [8, 128], strides = [1, 1]} : vector<192x128xf32> to vector<8x128xf32>
    %317 = tpu.concatenate %309, %310, %311, %312, %313, %314, %315, %316 in 0 : vector<8x128xf32>, vector<8x128xf32>, vector<8x128xf32>, vector<8x128xf32>, vector<8x128xf32>, vector<8x128xf32>, vector<8x128xf32>, vector<8x128xf32> -> vector<64x128xf32>
    %c22 = arith.constant 22 : index
    %c0_96 = arith.constant 0 : index
    %c0_97 = arith.constant 0 : index
    %318 = vector.load %arg4[%c22, %c0_96, %c0_97] : memref<25x128x128xf32, #tpu.memory_space<vmem>>, vector<1x128x128xf32>
    %319 = vector.shape_cast %318 : vector<1x128x128xf32> to vector<128x128xf32>
    %cst_98 = arith.constant dense<0.000000e+00> : vector<64x128xf32>
    %320 = tpu.matmul %317, %319, %cst_98 {dimension_numbers = #tpu.dot_dimension_numbers<[1], [0], [0], [1], [0, 0, 1, 1], [], []>} : vector<64x128xf32>, vector<128x128xf32>, vector<64x128xf32> -> vector<64x128xf32>
    %321 = arith.addf %308, %320 : vector<64x128xf32>
    %322 = vector.extract_strided_slice %23 {offsets = [67, 0], sizes = [8, 128], strides = [1, 1]} : vector<192x128xf32> to vector<8x128xf32>
    %323 = vector.extract_strided_slice %23 {offsets = [83, 0], sizes = [8, 128], strides = [1, 1]} : vector<192x128xf32> to vector<8x128xf32>
    %324 = vector.extract_strided_slice %23 {offsets = [99, 0], sizes = [8, 128], strides = [1, 1]} : vector<192x128xf32> to vector<8x128xf32>
    %325 = vector.extract_strided_slice %23 {offsets = [115, 0], sizes = [8, 128], strides = [1, 1]} : vector<192x128xf32> to vector<8x128xf32>
    %326 = vector.extract_strided_slice %23 {offsets = [131, 0], sizes = [8, 128], strides = [1, 1]} : vector<192x128xf32> to vector<8x128xf32>
    %327 = vector.extract_strided_slice %23 {offsets = [147, 0], sizes = [8, 128], strides = [1, 1]} : vector<192x128xf32> to vector<8x128xf32>
    %328 = vector.extract_strided_slice %23 {offsets = [163, 0], sizes = [8, 128], strides = [1, 1]} : vector<192x128xf32> to vector<8x128xf32>
    %329 = vector.extract_strided_slice %23 {offsets = [179, 0], sizes = [8, 128], strides = [1, 1]} : vector<192x128xf32> to vector<8x128xf32>
    %330 = tpu.concatenate %322, %323, %324, %325, %326, %327, %328, %329 in 0 : vector<8x128xf32>, vector<8x128xf32>, vector<8x128xf32>, vector<8x128xf32>, vector<8x128xf32>, vector<8x128xf32>, vector<8x128xf32>, vector<8x128xf32> -> vector<64x128xf32>
    %c23 = arith.constant 23 : index
    %c0_99 = arith.constant 0 : index
    %c0_100 = arith.constant 0 : index
    %331 = vector.load %arg4[%c23, %c0_99, %c0_100] : memref<25x128x128xf32, #tpu.memory_space<vmem>>, vector<1x128x128xf32>
    %332 = vector.shape_cast %331 : vector<1x128x128xf32> to vector<128x128xf32>
    %cst_101 = arith.constant dense<0.000000e+00> : vector<64x128xf32>
    %333 = tpu.matmul %330, %332, %cst_101 {dimension_numbers = #tpu.dot_dimension_numbers<[1], [0], [0], [1], [0, 0, 1, 1], [], []>} : vector<64x128xf32>, vector<128x128xf32>, vector<64x128xf32> -> vector<64x128xf32>
    %334 = arith.addf %321, %333 : vector<64x128xf32>
    %335 = vector.extract_strided_slice %23 {offsets = [68, 0], sizes = [8, 128], strides = [1, 1]} : vector<192x128xf32> to vector<8x128xf32>
    %336 = vector.extract_strided_slice %23 {offsets = [84, 0], sizes = [8, 128], strides = [1, 1]} : vector<192x128xf32> to vector<8x128xf32>
    %337 = vector.extract_strided_slice %23 {offsets = [100, 0], sizes = [8, 128], strides = [1, 1]} : vector<192x128xf32> to vector<8x128xf32>
    %338 = vector.extract_strided_slice %23 {offsets = [116, 0], sizes = [8, 128], strides = [1, 1]} : vector<192x128xf32> to vector<8x128xf32>
    %339 = vector.extract_strided_slice %23 {offsets = [132, 0], sizes = [8, 128], strides = [1, 1]} : vector<192x128xf32> to vector<8x128xf32>
    %340 = vector.extract_strided_slice %23 {offsets = [148, 0], sizes = [8, 128], strides = [1, 1]} : vector<192x128xf32> to vector<8x128xf32>
    %341 = vector.extract_strided_slice %23 {offsets = [164, 0], sizes = [8, 128], strides = [1, 1]} : vector<192x128xf32> to vector<8x128xf32>
    %342 = vector.extract_strided_slice %23 {offsets = [180, 0], sizes = [8, 128], strides = [1, 1]} : vector<192x128xf32> to vector<8x128xf32>
    %343 = tpu.concatenate %335, %336, %337, %338, %339, %340, %341, %342 in 0 : vector<8x128xf32>, vector<8x128xf32>, vector<8x128xf32>, vector<8x128xf32>, vector<8x128xf32>, vector<8x128xf32>, vector<8x128xf32>, vector<8x128xf32> -> vector<64x128xf32>
    %c24 = arith.constant 24 : index
    %c0_102 = arith.constant 0 : index
    %c0_103 = arith.constant 0 : index
    %344 = vector.load %arg4[%c24, %c0_102, %c0_103] : memref<25x128x128xf32, #tpu.memory_space<vmem>>, vector<1x128x128xf32>
    %345 = vector.shape_cast %344 : vector<1x128x128xf32> to vector<128x128xf32>
    %cst_104 = arith.constant dense<0.000000e+00> : vector<64x128xf32>
    %346 = tpu.matmul %343, %345, %cst_104 {dimension_numbers = #tpu.dot_dimension_numbers<[1], [0], [0], [1], [0, 0, 1, 1], [], []>} : vector<64x128xf32>, vector<128x128xf32>, vector<64x128xf32> -> vector<64x128xf32>
    %347 = arith.addf %334, %346 : vector<64x128xf32>
    %c0_105 = arith.constant 0 : index
    %c0_106 = arith.constant 0 : index
    %348 = vector.load %arg5[%c0_105, %c0_106] : memref<1x128xf32, #tpu.memory_space<vmem>>, vector<1x128xf32>
    %349 = vector.broadcast %348 : vector<1x128xf32> to vector<64x128xf32>
    %350 = arith.addf %347, %349 : vector<64x128xf32>
    %cst_107 = arith.constant 0.000000e+00 : f32
    %351 = vector.broadcast %cst_107 : f32 to vector<64x128xf32>
    %352 = arith.maximumf %350, %351 : vector<64x128xf32>
    %353 = vector.extract_strided_slice %352 {offsets = [1, 0], sizes = [63, 128], strides = [1, 1]} : vector<64x128xf32> to vector<63x128xf32>
    %354 = vector.extract_strided_slice %352 {offsets = [0, 0], sizes = [1, 128], strides = [1, 1]} : vector<64x128xf32> to vector<1x128xf32>
    %355 = tpu.concatenate %353, %354 in 0 : vector<63x128xf32>, vector<1x128xf32> -> vector<64x128xf32>
    %356 = arith.maximumf %352, %355 : vector<64x128xf32>
    %357 = vector.extract_strided_slice %356 {offsets = [8, 0], sizes = [56, 128], strides = [1, 1]} : vector<64x128xf32> to vector<56x128xf32>
    %358 = vector.extract_strided_slice %356 {offsets = [0, 0], sizes = [8, 128], strides = [1, 1]} : vector<64x128xf32> to vector<8x128xf32>
    %359 = tpu.concatenate %357, %358 in 0 : vector<56x128xf32>, vector<8x128xf32> -> vector<64x128xf32>
    %360 = arith.maximumf %356, %359 : vector<64x128xf32>
    %361 = vector.extract_strided_slice %360 {offsets = [0, 0], sizes = [1, 128], strides = [1, 1]} : vector<64x128xf32> to vector<1x128xf32>
    %362 = vector.extract_strided_slice %360 {offsets = [2, 0], sizes = [1, 128], strides = [1, 1]} : vector<64x128xf32> to vector<1x128xf32>
    %363 = vector.extract_strided_slice %360 {offsets = [4, 0], sizes = [1, 128], strides = [1, 1]} : vector<64x128xf32> to vector<1x128xf32>
    %364 = vector.extract_strided_slice %360 {offsets = [6, 0], sizes = [1, 128], strides = [1, 1]} : vector<64x128xf32> to vector<1x128xf32>
    %365 = vector.extract_strided_slice %360 {offsets = [16, 0], sizes = [1, 128], strides = [1, 1]} : vector<64x128xf32> to vector<1x128xf32>
    %366 = vector.extract_strided_slice %360 {offsets = [18, 0], sizes = [1, 128], strides = [1, 1]} : vector<64x128xf32> to vector<1x128xf32>
    %367 = vector.extract_strided_slice %360 {offsets = [20, 0], sizes = [1, 128], strides = [1, 1]} : vector<64x128xf32> to vector<1x128xf32>
    %368 = vector.extract_strided_slice %360 {offsets = [22, 0], sizes = [1, 128], strides = [1, 1]} : vector<64x128xf32> to vector<1x128xf32>
    %369 = vector.extract_strided_slice %360 {offsets = [32, 0], sizes = [1, 128], strides = [1, 1]} : vector<64x128xf32> to vector<1x128xf32>
    %370 = vector.extract_strided_slice %360 {offsets = [34, 0], sizes = [1, 128], strides = [1, 1]} : vector<64x128xf32> to vector<1x128xf32>
    %371 = vector.extract_strided_slice %360 {offsets = [36, 0], sizes = [1, 128], strides = [1, 1]} : vector<64x128xf32> to vector<1x128xf32>
    %372 = vector.extract_strided_slice %360 {offsets = [38, 0], sizes = [1, 128], strides = [1, 1]} : vector<64x128xf32> to vector<1x128xf32>
    %373 = vector.extract_strided_slice %360 {offsets = [48, 0], sizes = [1, 128], strides = [1, 1]} : vector<64x128xf32> to vector<1x128xf32>
    %374 = vector.extract_strided_slice %360 {offsets = [50, 0], sizes = [1, 128], strides = [1, 1]} : vector<64x128xf32> to vector<1x128xf32>
    %375 = vector.extract_strided_slice %360 {offsets = [52, 0], sizes = [1, 128], strides = [1, 1]} : vector<64x128xf32> to vector<1x128xf32>
    %376 = vector.extract_strided_slice %360 {offsets = [54, 0], sizes = [1, 128], strides = [1, 1]} : vector<64x128xf32> to vector<1x128xf32>
    %377 = tpu.concatenate %361, %362, %363, %364, %365, %366, %367, %368, %369, %370, %371, %372, %373, %374, %375, %376 in 1 : vector<1x128xf32>, vector<1x128xf32>, vector<1x128xf32>, vector<1x128xf32>, vector<1x128xf32>, vector<1x128xf32>, vector<1x128xf32>, vector<1x128xf32>, vector<1x128xf32>, vector<1x128xf32>, vector<1x128xf32>, vector<1x128xf32>, vector<1x128xf32>, vector<1x128xf32>, vector<1x128xf32>, vector<1x128xf32> -> vector<1x2048xf32>
    %c0_108 = arith.constant 0 : index
    %c0_109 = arith.constant 0 : index
    %378 = vector.load %arg6[%c0_108, %c0_109] : memref<2048x128xf32, #tpu.memory_space<vmem>>, vector<2048x128xf32>
    %cst_110 = arith.constant dense<0.000000e+00> : vector<1x128xf32>
    %379 = tpu.matmul %377, %378, %cst_110 {dimension_numbers = #tpu.dot_dimension_numbers<[1], [0], [0], [1], [0, 0, 1, 1], [], []>} : vector<1x2048xf32>, vector<2048x128xf32>, vector<1x128xf32> -> vector<1x128xf32>
    %c0_111 = arith.constant 0 : index
    %c0_112 = arith.constant 0 : index
    %380 = vector.load %arg7[%c0_111, %c0_112] : memref<1x128xf32, #tpu.memory_space<vmem>>, vector<1x128xf32>
    %381 = arith.addf %379, %380 : vector<1x128xf32>
    %cst_113 = arith.constant 0.000000e+00 : f32
    %382 = vector.broadcast %cst_113 : f32 to vector<1x128xf32>
    %383 = arith.maximumf %381, %382 : vector<1x128xf32>
    %c0_114 = arith.constant 0 : index
    %c0_115 = arith.constant 0 : index
    %384 = vector.load %arg8[%c0_114, %c0_115] : memref<128x128xf32, #tpu.memory_space<vmem>>, vector<128x128xf32>
    %cst_116 = arith.constant dense<0.000000e+00> : vector<1x128xf32>
    %385 = tpu.matmul %383, %384, %cst_116 {dimension_numbers = #tpu.dot_dimension_numbers<[1], [0], [0], [1], [0, 0, 1, 1], [], []>} : vector<1x128xf32>, vector<128x128xf32>, vector<1x128xf32> -> vector<1x128xf32>
    %c0_117 = arith.constant 0 : index
    %c0_118 = arith.constant 0 : index
    %386 = vector.load %arg9[%c0_117, %c0_118] : memref<1x128xf32, #tpu.memory_space<vmem>>, vector<1x128xf32>
    %387 = arith.addf %385, %386 : vector<1x128xf32>
    %388 = tpu.concatenate %387, %387, %387, %387, %387, %387, %387, %387 in 0 : vector<1x128xf32>, vector<1x128xf32>, vector<1x128xf32>, vector<1x128xf32>, vector<1x128xf32>, vector<1x128xf32>, vector<1x128xf32>, vector<1x128xf32> -> vector<8x128xf32>
    %c0_119 = arith.constant 0 : index
    %c0_120 = arith.constant 0 : index
    %c0_121 = arith.constant 0 : index
    %389 = vector.load %arg10[%c0_119, %c0_120, %c0_121] : memref<1x8x128xf32, #tpu.memory_space<vmem>>, vector<1x8x128xf32>
    %390 = vector.shape_cast %389 : vector<1x8x128xf32> to vector<8x128xf32>
    %391 = vector.shape_cast %388 : vector<8x128xf32> to vector<1x8x128xf32>
    tpu.vector_store %arg10[%c0_119, %c0_120, %c0_121], %391 {strides = array<i32>} : memref<1x8x128xf32, #tpu.memory_space<vmem>>, vector<1x8x128xf32>,
    return
  }
  func.func @transform_0(%arg0: i32) -> (i32, i32, i32, i32) {
    %c0_i32 = arith.constant 0 : i32
    %c0_i32_0 = arith.constant 0 : i32
    %c0_i32_1 = arith.constant 0 : i32
    %c0_i32_2 = arith.constant 0 : i32
    return %arg0, %c0_i32, %c0_i32_0, %c0_i32_1 : i32, i32, i32, i32
  }
  func.func @transform_1(%arg0: i32) -> (i32, i32) {
    %c0_i32 = arith.constant 0 : i32
    %c0_i32_0 = arith.constant 0 : i32
    %c0_i32_1 = arith.constant 0 : i32
    return %c0_i32, %c0_i32_0 : i32, i32
  }
  func.func @transform_2(%arg0: i32) -> (i32, i32) {
    %c0_i32 = arith.constant 0 : i32
    %c0_i32_0 = arith.constant 0 : i32
    %c0_i32_1 = arith.constant 0 : i32
    return %c0_i32, %c0_i32_0 : i32, i32
  }
  func.func @transform_3(%arg0: i32) -> (i32, i32, i32) {
    %c0_i32 = arith.constant 0 : i32
    %c0_i32_0 = arith.constant 0 : i32
    %c0_i32_1 = arith.constant 0 : i32
    %c0_i32_2 = arith.constant 0 : i32
    return %c0_i32, %c0_i32_0, %c0_i32_1 : i32, i32, i32
  }
  func.func @transform_4(%arg0: i32) -> (i32, i32) {
    %c0_i32 = arith.constant 0 : i32
    %c0_i32_0 = arith.constant 0 : i32
    %c0_i32_1 = arith.constant 0 : i32
    return %c0_i32, %c0_i32_0 : i32, i32
  }
  func.func @transform_5(%arg0: i32) -> (i32, i32) {
    %c0_i32 = arith.constant 0 : i32
    %c0_i32_0 = arith.constant 0 : i32
    %c0_i32_1 = arith.constant 0 : i32
    return %c0_i32, %c0_i32_0 : i32, i32
  }
  func.func @transform_6(%arg0: i32) -> (i32, i32) {
    %c0_i32 = arith.constant 0 : i32
    %c0_i32_0 = arith.constant 0 : i32
    %c0_i32_1 = arith.constant 0 : i32
    return %c0_i32, %c0_i32_0 : i32, i32
  }
  func.func @transform_7(%arg0: i32) -> (i32, i32) {
    %c0_i32 = arith.constant 0 : i32
    %c0_i32_0 = arith.constant 0 : i32
    %c0_i32_1 = arith.constant 0 : i32
    return %c0_i32, %c0_i32_0 : i32, i32
  }
  func.func @transform_8(%arg0: i32) -> (i32, i32) {
    %c0_i32 = arith.constant 0 : i32
    %c0_i32_0 = arith.constant 0 : i32
    %c0_i32_1 = arith.constant 0 : i32
    return %c0_i32, %c0_i32_0 : i32, i32
  }
  func.func @transform_9(%arg0: i32) -> (i32, i32, i32) {
    %c0_i32 = arith.constant 0 : i32
    %c0_i32_0 = arith.constant 0 : i32
    %c0_i32_1 = arith.constant 0 : i32
    return %arg0, %c0_i32, %c0_i32_0 : i32, i32, i32
  }
}

</mosaic_0001>

<bundles_post_ra>
// kernel: mnist_forward.1
= control target key start
LH: loop header
LB: loop body
LE: loop exit
PB: predicated region body
PF: predicated region fallthrough
CT: control target
= control target key end

     0   :  { %s9079_s30 = smov 0   ;;  %s12362_s0 = inlined_call_operand.vmem [shape: f32[2,4,192,32], index: 0, kind: input, shape index: {}]   ;;  %s12363_s1 = inlined_call_operand.vmem [shape: f32[32,128], index: 1, kind: input, shape index: {}]   ;;  %s12364_s2 = inlined_call_operand.vmem [shape: f32[1,128], index: 2, kind: input, shape index: {}]   ;;  %s12365_s3 = inlined_call_operand.vmem [shape: f32[25,128,128], index: 3, kind: input, shape index: {}]   ;;  %s12366_s4 = inlined_call_operand.vmem [shape: f32[1,128], index: 4, kind: input, shape index: {}]   ;;  %s12367_s5 = inlined_call_operand.vmem [shape: f32[2048,128], index: 5, kind: input, shape index: {}]   ;;  %s12368_s6 = inlined_call_operand.vmem [shape: f32[1,128], index: 6, kind: input, shape index: {}]   ;;  %s12369_s7 = inlined_call_operand.vmem [shape: f32[128,128], index: 7, kind: input, shape index: {}]   ;;  %s12370_s8 = inlined_call_operand.vmem [shape: f32[1,128], index: 8, kind: input, shape index: {}]   ;;  %s12371_s9 = inlined_call_operand.vmem [shape: f32[2,8,128], index: 9, kind: output, shape index: {}]  }
   0x1 LB: > { %s6123_s10 = sadd.s32 4294967295, %s9025_s30   ;;  %p6127_p0 = scmp.ge.s32.totalorder %s9025_s30, 1  ;;  %s9025_s30 = sphi %s9079_s30, %s19_s30  }
   0x2   : > { %p287_p1 = scmp.lt.s32.totalorder %s9025_s30, 3 }
   0x4   : > { %p288_p2 = pnand %p6127_p0, %p287_p1 }
   0x6   : > { %291 = sbr.rel (%p288_p2) target bundleno = 1474 (0x5c2), region = 56 }
   0xb   : > { %v358_v0 = vld [vmem:[%s12363_s1 + $0x18] sm:$0xff]  ;;  %v357_v1 = vld [vmem:[%s12363_s1 + $0x10] sm:$0xff]  ;;  %p322_p3 = scmp.lt.s32.totalorder %s6123_s10, 1  ;;  %v356_v2 = vld [vmem:[%s12363_s1 + $0x8] sm:$0xff]  ;;  %vm359_vm0 = vcmask 261120   ;;  %vm1608_vm1 = vcmask 1046528  }
   0xc   : > { %7695 = vmatprep.subr.mxu0 %v358_v0  ;;  %7739 = vmatprep.subr.mxu1 %v358_v0  ;;  %v9101_v3 = vld [vmem:[%s12363_s1] sm:$0xff]  ;;  %vm2208_vm2 = vcmask 1043456   ;;  %vm2045_vm3 = vcmask 1044480   ;;  %vm1882_vm4 = vcmask 1045504   ;;  %vm9028_vm5 = vmmov 0  }
   0xd   : > { %7696 = vmatpush3.msra.mxu0 %v358_v0  ;;  %7740 = vmatpush3.msra.mxu1 %v358_v0  ;;  %s12385_s10 = smov (!%p322_p3, %s6123_s10), 1  ;;  %vm6059_vm6 = vcmask 1040384   ;;  %vm6061_vm7 = vcmask 1041408   ;;  %vm6063_vm8 = vcmask 1042432  }
   0xe   : > { %7697 = vmatprep.subr.mxu0 %v357_v1  ;;  %7741 = vmatprep.subr.mxu1 %v357_v1  ;;  %s9006_s19 = smul.u32 768, %s12385_s10  ;;  %s6129_s11 = sshll.u32 %s12385_s10, 3 }
   0xf   : > { %7698 = vmatpush3.msra.mxu0 %v357_v1  ;;  %7742 = vmatpush3.msra.mxu1 %v357_v1  ;;  %s330_s14 = scalar_lea.vmem %s12371_s9, %s6129_s11 }
  0x10   : > { %7699 = vmatprep.subr.mxu0 %v356_v2  ;;  %7743 = vmatprep.subr.mxu1 %v356_v2  ;;  %s9107_s22 = scalar_lea.vmem %s12362_s0, %s9006_s19 }
  0x11   : > { %7700 = vmatpush3.msra.mxu0 %v356_v2  ;;  %7744 = vmatpush3.msra.mxu1 %v356_v2  ;;  %v331_v4 = vld [vmem:[%s9107_s22] sm:$0xff]  ;;  %v332_v6 = vld [vmem:[%s9107_s22 + $0x8] sm:$0xff]  ;;  %v333_v8 = vld [vmem:[%s9107_s22 + $0x10] sm:$0xff] }
  0x12   : > { %7701 = vmatprep.subr.mxu0 %v9101_v3  ;;  %7745 = vmatprep.subr.mxu1 %v9101_v3  ;;  %v6154_v5 = vld [vmem:[%s9107_s22 + $0xc0] sm:$0xff]  ;;  %v6155_v7 = vld [vmem:[%s9107_s22 + $0xc8] sm:$0xff]  ;;  %v6156_v9 = vld [vmem:[%s9107_s22 + $0xd0] sm:$0xff] }
  0x13   : > { %7702 = vmatpush3.msra.mxu0 %v9101_v3  ;;  %7703 = vmatprep.mubr.msk.f32.mxu0 %vm359_vm0, %v331_v4  ;;  %v334_v10 = vld [vmem:[%s9107_s22 + $0x18] sm:$0xff]  ;;  %v335_v12 = vld [vmem:[%s9107_s22 + $0x20] sm:$0xff]  ;;  %v336_v14 = vld [vmem:[%s9107_s22 + $0x28] sm:$0xff] }
  0x14   : > { %7746 = vmatpush3.msra.mxu1 %v9101_v3  ;;  %7747 = vmatprep.mubr.msk.f32.mxu1 %vm359_vm0, %v6154_v5  ;;  %v6157_v11 = vld [vmem:[%s9107_s22 + $0xd8] sm:$0xff]  ;;  %v6158_v13 = vld [vmem:[%s9107_s22 + $0xe0] sm:$0xff]  ;;  %v6159_v15 = vld [vmem:[%s9107_s22 + $0xe8] sm:$0xff] }
  0x15   : > { %7704 = vmatmul.mubr.msk.f32.vlgmr.msra.gmra.mxu0 %vm359_vm0, %v332_v6  ;;  %7748 = vmatmul.mubr.msk.f32.vlgmr.msra.gmra.mxu1 %vm359_vm0, %v6155_v7  ;;  %v337_v16 = vld [vmem:[%s9107_s22 + $0x30] sm:$0xff]  ;;  %v338_v18 = vld [vmem:[%s9107_s22 + $0x38] sm:$0xff]  ;;  %v339_v20 = vld [vmem:[%s9107_s22 + $0x40] sm:$0xff] }
  0x16   : > { %7783 = vmatprep.subr.mxu0 %v358_v0  ;;  %7827 = vmatprep.subr.mxu1 %v358_v0  ;;  %v6160_v17 = vld [vmem:[%s9107_s22 + $0xf0] sm:$0xff]  ;;  %v6161_v19 = vld [vmem:[%s9107_s22 + $0xf8] sm:$0xff]  ;;  %v6162_v21 = vld [vmem:[%s9107_s22 + $0x100] sm:$0xff] }
  0x17   : > { %7784 = vmatpush3.msra.mxu0 %v358_v0  ;;  %7706 = vmatprep.mubr.msk.f32.mxu0 %vm359_vm0, %v333_v8  ;;  %v340_v22 = vld [vmem:[%s9107_s22 + $0x48] sm:$0xff]  ;;  %v341_v24 = vld [vmem:[%s9107_s22 + $0x50] sm:$0xff]  ;;  %v342_v26 = vld [vmem:[%s9107_s22 + $0x58] sm:$0xff] }
  0x18   : > { %7750 = vmatprep.mubr.msk.f32.mxu1 %vm359_vm0, %v6156_v9  ;;  %7828 = vmatpush3.msra.mxu1 %v358_v0  ;;  %v6163_v23 = vld [vmem:[%s9107_s22 + $0x108] sm:$0xff]  ;;  %v6164_v25 = vld [vmem:[%s9107_s22 + $0x110] sm:$0xff]  ;;  %v6165_v27 = vld [vmem:[%s9107_s22 + $0x118] sm:$0xff] }
  0x19   : > { %7707 = vmatmul.mubr.msk.f32.gmra.mxu0 %vm359_vm0, %v334_v10  ;;  %7751 = vmatmul.mubr.msk.f32.gmra.mxu1 %vm359_vm0, %v6157_v11  ;;  %v343_v28 = vld [vmem:[%s9107_s22 + $0x60] sm:$0xff]  ;;  %v344_v30 = vld [vmem:[%s9107_s22 + $0x68] sm:$0xff]  ;;  %v345_v32 = vld [vmem:[%s9107_s22 + $0x70] sm:$0xff] }
  0x1a   : > { %7709 = vmatprep.mubr.msk.f32.mxu0 %vm359_vm0, %v335_v12  ;;  %7753 = vmatprep.mubr.msk.f32.mxu1 %vm359_vm0, %v6158_v13  ;;  %v6166_v29 = vld [vmem:[%s9107_s22 + $0x120] sm:$0xff]  ;;  %v6167_v31 = vld [vmem:[%s9107_s22 + $0x128] sm:$0xff]  ;;  %v6168_v33 = vld [vmem:[%s9107_s22 + $0x130] sm:$0xff] }
  0x1b   : > { %7785 = vmatprep.subr.mxu0 %v357_v1  ;;  %7829 = vmatprep.subr.mxu1 %v357_v1  ;;  %v346_v34 = vld [vmem:[%s9107_s22 + $0x78] sm:$0xff]  ;;  %v347_v36 = vld [vmem:[%s9107_s22 + $0x80] sm:$0xff]  ;;  %v348_v38 = vld [vmem:[%s9107_s22 + $0x88] sm:$0xff] }
  0x1c   : > { %7786 = vmatpush3.msra.mxu0 %v357_v1  ;;  %7830 = vmatpush3.msra.mxu1 %v357_v1  ;;  %v6169_v35 = vld [vmem:[%s9107_s22 + $0x138] sm:$0xff]  ;;  %v6170_v37 = vld [vmem:[%s9107_s22 + $0x140] sm:$0xff]  ;;  %v6171_v39 = vld [vmem:[%s9107_s22 + $0x148] sm:$0xff] }
  0x1d   : > { %7710 = vmatmul.mubr.msk.f32.gmra.mxu0 %vm359_vm0, %v336_v14  ;;  %7754 = vmatmul.mubr.msk.f32.gmra.mxu1 %vm359_vm0, %v6159_v15  ;;  %v349_v40 = vld [vmem:[%s9107_s22 + $0x90] sm:$0xff]  ;;  %v350_v42 = vld [vmem:[%s9107_s22 + $0x98] sm:$0xff]  ;;  %v351_v44 = vld [vmem:[%s9107_s22 + $0xa0] sm:$0xff] }
  0x1e   : > { %7712 = vmatprep.mubr.msk.f32.mxu0 %vm359_vm0, %v337_v16  ;;  %7756 = vmatprep.mubr.msk.f32.mxu1 %vm359_vm0, %v6160_v17  ;;  %v6172_v41 = vld [vmem:[%s9107_s22 + $0x150] sm:$0xff]  ;;  %v6173_v43 = vld [vmem:[%s9107_s22 + $0x158] sm:$0xff]  ;;  %v6174_v45 = vld [vmem:[%s9107_s22 + $0x160] sm:$0xff] }
  0x1f   : > { %7787 = vmatprep.subr.mxu0 %v356_v2  ;;  %7831 = vmatprep.subr.mxu1 %v356_v2  ;;  %v352_v46 = vld [vmem:[%s9107_s22 + $0xa8] sm:$0xff]  ;;  %v353_v48 = vld [vmem:[%s9107_s22 + $0xb0] sm:$0xff]  ;;  %v354_v50 = vld [vmem:[%s9107_s22 + $0xb8] sm:$0xff] }
  0x20   : > { %7788 = vmatpush3.msra.mxu0 %v356_v2  ;;  %7832 = vmatpush3.msra.mxu1 %v356_v2  ;;  %v6175_v47 = vld [vmem:[%s9107_s22 + $0x168] sm:$0xff]  ;;  %v6176_v49 = vld [vmem:[%s9107_s22 + $0x170] sm:$0xff]  ;;  %v6177_v51 = vld [vmem:[%s9107_s22 + $0x178] sm:$0xff] }
  0x21   : > { %7713 = vmatmul.mubr.msk.f32.gmra.mxu0 %vm359_vm0, %v338_v18  ;;  %7757 = vmatmul.mubr.msk.f32.gmra.mxu1 %vm359_vm0, %v6161_v19  ;;  %v6202_v52 = vld [vmem:[%s9107_s22 + $0x180] sm:$0xff]  ;;  %v6203_v54 = vld [vmem:[%s9107_s22 + $0x188] sm:$0xff]  ;;  %v6204_v56 = vld [vmem:[%s9107_s22 + $0x190] sm:$0xff] }
  0x22   : > { %7715 = vmatprep.mubr.msk.f32.mxu0 %vm359_vm0, %v339_v20  ;;  %7759 = vmatprep.mubr.msk.f32.mxu1 %vm359_vm0, %v6162_v21  ;;  %v6250_v53 = vld [vmem:[%s9107_s22 + $0x240] sm:$0xff]  ;;  %v6251_v55 = vld [vmem:[%s9107_s22 + $0x248] sm:$0xff]  ;;  %v6252_v57 = vld [vmem:[%s9107_s22 + $0x250] sm:$0xff] }
  0x23   : > { %7789 = vmatprep.subr.mxu0 %v9101_v3  ;;  %7833 = vmatprep.subr.mxu1 %v9101_v3  ;;  %v6205_v58 = vld [vmem:[%s9107_s22 + $0x198] sm:$0xff]  ;;  %v6206_v60 = vld [vmem:[%s9107_s22 + $0x1a0] sm:$0xff]  ;;  %v6207_v62 = vld [vmem:[%s9107_s22 + $0x1a8] sm:$0xff] }
  0x24   : > { %7790 = vmatpush3.msra.mxu0 %v9101_v3  ;;  %7834 = vmatpush3.msra.mxu1 %v9101_v3  ;;  %v6253_v59 = vld [vmem:[%s9107_s22 + $0x258] sm:$0xff]  ;;  %v6254_v61 = vld [vmem:[%s9107_s22 + $0x260] sm:$0xff]  ;;  %v6255_v63 = vld [vmem:[%s9107_s22 + $0x268] sm:$0xff] }
  0x25   : > { %7716 = vmatmul.mubr.msk.f32.gmra.mxu0 %vm359_vm0, %v340_v22  ;;  %7760 = vmatmul.mubr.msk.f32.gmra.mxu1 %vm359_vm0, %v6163_v23  ;;  %v6208_v0 = vld [vmem:[%s9107_s22 + $0x1b0] sm:$0xff]  ;;  %v6209_v2 = vld [vmem:[%s9107_s22 + $0x1b8] sm:$0xff]  ;;  %v6210_v4 = vld [vmem:[%s9107_s22 + $0x1c0] sm:$0xff] }
  0x26   : > { %7718 = vmatprep.mubr.msk.f32.mxu0 %vm359_vm0, %v341_v24  ;;  %7762 = vmatprep.mubr.msk.f32.mxu1 %vm359_vm0, %v6164_v25  ;;  %v6256_v1 = vld [vmem:[%s9107_s22 + $0x270] sm:$0xff]  ;;  %v6257_v3 = vld [vmem:[%s9107_s22 + $0x278] sm:$0xff]  ;;  %v6258_v5 = vld [vmem:[%s9107_s22 + $0x280] sm:$0xff] }
  0x27   : > { %v6211_v6 = vld [vmem:[%s9107_s22 + $0x1c8] sm:$0xff]  ;;  %v6212_v8 = vld [vmem:[%s9107_s22 + $0x1d0] sm:$0xff]  ;;  %v6213_v10 = vld [vmem:[%s9107_s22 + $0x1d8] sm:$0xff] }
  0x28   : > { %v6259_v7 = vld [vmem:[%s9107_s22 + $0x288] sm:$0xff]  ;;  %v6260_v9 = vld [vmem:[%s9107_s22 + $0x290] sm:$0xff]  ;;  %v6261_v11 = vld [vmem:[%s9107_s22 + $0x298] sm:$0xff] }
  0x29   : > { %7719 = vmatmul.mubr.msk.f32.gmra.mxu0 %vm359_vm0, %v342_v26  ;;  %7763 = vmatmul.mubr.msk.f32.gmra.mxu1 %vm359_vm0, %v6165_v27  ;;  %v6214_v12 = vld [vmem:[%s9107_s22 + $0x1e0] sm:$0xff]  ;;  %v6215_v14 = vld [vmem:[%s9107_s22 + $0x1e8] sm:$0xff]  ;;  %v6216_v16 = vld [vmem:[%s9107_s22 + $0x1f0] sm:$0xff] }
  0x2a   : > { %7721 = vmatprep.mubr.msk.f32.mxu0 %vm359_vm0, %v343_v28  ;;  %7765 = vmatprep.mubr.msk.f32.mxu1 %vm359_vm0, %v6166_v29  ;;  %v6262_v13 = vld [vmem:[%s9107_s22 + $0x2a0] sm:$0xff]  ;;  %v6263_v15 = vld [vmem:[%s9107_s22 + $0x2a8] sm:$0xff]  ;;  %v6264_v17 = vld [vmem:[%s9107_s22 + $0x2b0] sm:$0xff] }
  0x2b   : > { %v6217_v18 = vld [vmem:[%s9107_s22 + $0x1f8] sm:$0xff]  ;;  %v6218_v20 = vld [vmem:[%s9107_s22 + $0x200] sm:$0xff]  ;;  %v6219_v22 = vld [vmem:[%s9107_s22 + $0x208] sm:$0xff] }
  0x2c   : > { %v6265_v19 = vld [vmem:[%s9107_s22 + $0x2b8] sm:$0xff]  ;;  %v6266_v21 = vld [vmem:[%s9107_s22 + $0x2c0] sm:$0xff]  ;;  %v6267_v23 = vld [vmem:[%s9107_s22 + $0x2c8] sm:$0xff] }
  0x2d   : > { %7722 = vmatmul.mubr.msk.f32.gmra.mxu0 %vm359_vm0, %v344_v30  ;;  %7766 = vmatmul.mubr.msk.f32.gmra.mxu1 %vm359_vm0, %v6167_v31  ;;  %v6220_v24 = vld [vmem:[%s9107_s22 + $0x210] sm:$0xff]  ;;  %v6221_v26 = vld [vmem:[%s9107_s22 + $0x218] sm:$0xff]  ;;  %v6222_v28 = vld [vmem:[%s9107_s22 + $0x220] sm:$0xff] }
  0x2e   : > { %7724 = vmatprep.mubr.msk.f32.mxu0 %vm359_vm0, %v345_v32  ;;  %7768 = vmatprep.mubr.msk.f32.mxu1 %vm359_vm0, %v6168_v33  ;;  %v6268_v25 = vld [vmem:[%s9107_s22 + $0x2d0] sm:$0xff]  ;;  %v6269_v27 = vld [vmem:[%s9107_s22 + $0x2d8] sm:$0xff]  ;;  %v6270_v29 = vld [vmem:[%s9107_s22 + $0x2e0] sm:$0xff] }
  0x2f   : > { %v6314_v30 = vld [vmem:[%s12365_s3 + $0xf8] sm:$0xff]  ;;  %v6223_v31 = vld [vmem:[%s9107_s22 + $0x228] sm:$0xff]  ;;  %v6224_v33 = vld [vmem:[%s9107_s22 + $0x230] sm:$0xff] }
  0x30   : > { %v6271_v32 = vld [vmem:[%s9107_s22 + $0x2e8] sm:$0xff]  ;;  %7871 = vmatprep.subr.mxu0 %v6314_v30 }
  0x31   : > { %7725 = vmatmul.mubr.msk.f32.gmra.mxu0 %vm359_vm0, %v346_v34  ;;  %7769 = vmatmul.mubr.msk.f32.gmra.mxu1 %vm359_vm0, %v6169_v35  ;;  %v6272_v34 = vld [vmem:[%s9107_s22 + $0x2f0] sm:$0xff] }
  0x32   : > { %7727 = vmatprep.mubr.msk.f32.mxu0 %vm359_vm0, %v347_v36  ;;  %7771 = vmatprep.mubr.msk.f32.mxu1 %vm359_vm0, %v6170_v37  ;;  %v6313_v35 = vld [vmem:[%s12365_s3 + $0xf0] sm:$0xff]  ;;  %v6225_v36 = vld [vmem:[%s9107_s22 + $0x238] sm:$0xff] }
  0x33   : > { %v6273_v37 = vld [vmem:[%s9107_s22 + $0x2f8] sm:$0xff] }
  0x35   : > { %7728 = vmatmul.mubr.msk.f32.gmra.mxu0 %vm359_vm0, %v348_v38  ;;  %7772 = vmatmul.mubr.msk.f32.gmra.mxu1 %vm359_vm0, %v6171_v39  ;;  %v6312_v38 = vld [vmem:[%s12365_s3 + $0xe8] sm:$0xff]  ;;  %v6311_v39 = vld [vmem:[%s12365_s3 + $0xe0] sm:$0xff] }
  0x36   : > { %7730 = vmatprep.mubr.msk.f32.mxu0 %vm359_vm0, %v349_v40  ;;  %7774 = vmatprep.mubr.msk.f32.mxu1 %vm359_vm0, %v6172_v41  ;;  %v1605_v40 = vld [vmem:[%s12365_s3 + $0x78] sm:$0xff] }
  0x37   : > { %7915 = vmatprep.subr.mxu1 %v1605_v40  ;;  %v6310_v41 = vld [vmem:[%s12365_s3 + $0xd8] sm:$0xff] }
  0x39   : > { %7731 = vmatmul.mubr.msk.f32.gmra.mxu0 %vm359_vm0, %v350_v42  ;;  %7775 = vmatmul.mubr.msk.f32.gmra.mxu1 %vm359_vm0, %v6173_v43  ;;  %v1604_v42 = vld [vmem:[%s12365_s3 + $0x70] sm:$0xff] }
  0x3a   : > { %7733 = vmatprep.mubr.msk.f32.mxu0 %vm359_vm0, %v351_v44  ;;  %7777 = vmatprep.mubr.msk.f32.mxu1 %vm359_vm0, %v6174_v45  ;;  %v6309_v43 = vld [vmem:[%s12365_s3 + $0xd0] sm:$0xff]  ;;  %v1603_v44 = vld [vmem:[%s12365_s3 + $0x68] sm:$0xff]  ;;  %v1602_v45 = vld [vmem:[%s12365_s3 + $0x60] sm:$0xff] }
  0x3d   : > { %7734 = vmatmul.mubr.msk.f32.gmra.mxu0 %vm359_vm0, %v352_v46  ;;  %7778 = vmatmul.mubr.msk.f32.gmra.mxu1 %vm359_vm0, %v6175_v47  ;;  %v6308_v46 = vld [vmem:[%s12365_s3 + $0xc8] sm:$0xff]  ;;  %v1601_v47 = vld [vmem:[%s12365_s3 + $0x58] sm:$0xff] }
  0x3e   : > { %7736 = vmatprep.mubr.msk.f32.mxu0 %vm359_vm0, %v353_v48  ;;  %7780 = vmatprep.mubr.msk.f32.mxu1 %vm359_vm0, %v6176_v49  ;;  %v6307_v48 = vld [vmem:[%s12365_s3 + $0xc0] sm:$0xff]  ;;  %v1600_v49 = vld [vmem:[%s12365_s3 + $0x50] sm:$0xff] }
  0x41   : > { %7737 = vmatmul.mubr.msk.f32.gmra.mxu0 %vm359_vm0, %v354_v50  ;;  %7781 = vmatmul.mubr.msk.f32.gmra.mxu1 %vm359_vm0, %v6177_v51  ;;  %v1599_v50 = vld [vmem:[%s12365_s3 + $0x48] sm:$0xff]  ;;  %v6306_v51 = vld [vmem:[%s12365_s3 + $0xb8] sm:$0xff] }
  0x42   : > { %7791 = vmatprep.mubr.msk.f32.mxu0 %vm359_vm0, %v6202_v52  ;;  %7835 = vmatprep.mubr.msk.f32.mxu1 %vm359_vm0, %v6250_v53  ;;  %v1598_v52 = vld [vmem:[%s12365_s3 + $0x40] sm:$0xff]  ;;  %v6305_v53 = vld [vmem:[%s12365_s3 + $0xb0] sm:$0xff] }
  0x45   : > { %7792 = vmatmul.mubr.msk.f32.vlgmr.msra.gmra.mxu0 %vm359_vm0, %v6203_v54  ;;  %7836 = vmatmul.mubr.msk.f32.vlgmr.msra.gmra.mxu1 %vm359_vm0, %v6251_v55  ;;  %v1597_v54 = vld [vmem:[%s12365_s3 + $0x38] sm:$0xff]  ;;  %v1596_v55 = vld [vmem:[%s12365_s3 + $0x30] sm:$0xff] }
  0x46   : > { %7794 = vmatprep.mubr.msk.f32.mxu0 %vm359_vm0, %v6204_v56  ;;  %7838 = vmatprep.mubr.msk.f32.mxu1 %vm359_vm0, %v6252_v57  ;;  %v6304_v56 = vld [vmem:[%s12365_s3 + $0xa8] sm:$0xff] }
  0x47   : > { %7872 = vmatpush3.msra.mxu0 %v6314_v30  ;;  %7916 = vmatpush3.msra.mxu1 %v1605_v40  ;;  %v1595_v57 = vld [vmem:[%s12365_s3 + $0x28] sm:$0xff] }
  0x48   : > { %7873 = vmatprep.subr.mxu0 %v6313_v35  ;;  %7917 = vmatprep.subr.mxu1 %v1604_v42 }
  0x49   : > { %7795 = vmatmul.mubr.msk.f32.gmra.mxu0 %vm359_vm0, %v6205_v58  ;;  %7839 = vmatmul.mubr.msk.f32.gmra.mxu1 %vm359_vm0, %v6253_v59  ;;  %v1594_v58 = vld [vmem:[%s12365_s3 + $0x20] sm:$0xff]  ;;  %v1593_v59 = vld [vmem:[%s12365_s3 + $0x18] sm:$0xff] }
  0x4a   : > { %7797 = vmatprep.mubr.msk.f32.mxu0 %vm359_vm0, %v6206_v60  ;;  %7841 = vmatprep.mubr.msk.f32.mxu1 %vm359_vm0, %v6254_v61  ;;  %v6303_v60 = vld [vmem:[%s12365_s3 + $0xa0] sm:$0xff]  ;;  %v1592_v61 = vld [vmem:[%s12365_s3 + $0x10] sm:$0xff] }
  0x4b   : > { %7874 = vmatpush3.msra.mxu0 %v6313_v35  ;;  %7918 = vmatpush3.msra.mxu1 %v1604_v42 }
  0x4c   : > { %7875 = vmatprep.subr.mxu0 %v6312_v38  ;;  %7919 = vmatprep.subr.mxu1 %v1603_v44 }
  0x4d   : > { %7798 = vmatmul.mubr.msk.f32.gmra.mxu0 %vm359_vm0, %v6207_v62  ;;  %7842 = vmatmul.mubr.msk.f32.gmra.mxu1 %vm359_vm0, %v6255_v63  ;;  %v6302_v62 = vld [vmem:[%s12365_s3 + $0x98] sm:$0xff]  ;;  %v1591_v63 = vld [vmem:[%s12365_s3 + $0x8] sm:$0xff] }
  0x4e   : > { %7800 = vmatprep.mubr.msk.f32.mxu0 %vm359_vm0, %v6208_v0  ;;  %7844 = vmatprep.mubr.msk.f32.mxu1 %vm359_vm0, %v6256_v1  ;;  %v6301_v0 = vld [vmem:[%s12365_s3 + $0x90] sm:$0xff]  ;;  %v1590_v1 = vld [vmem:[%s12365_s3] sm:$0xff] }
  0x4f   : > { %7876 = vmatpush3.msra.mxu0 %v6312_v38  ;;  %7920 = vmatpush3.msra.mxu1 %v1603_v44 }
  0x50   : > { %7877 = vmatprep.subr.mxu0 %v6311_v39  ;;  %7921 = vmatprep.subr.mxu1 %v1602_v45 }
  0x51   : > { %7801 = vmatmul.mubr.msk.f32.gmra.mxu0 %vm359_vm0, %v6209_v2  ;;  %7845 = vmatmul.mubr.msk.f32.gmra.mxu1 %vm359_vm0, %v6257_v3  ;;  %v6300_v2 = vld [vmem:[%s12365_s3 + $0x88] sm:$0xff]  ;;  %v9405_v3 = vld [vmem:[%s12365_s3 + $0x1f8] sm:$0xff] }
  0x52   : > { %7803 = vmatprep.mubr.msk.f32.mxu0 %vm359_vm0, %v6210_v4  ;;  %7847 = vmatprep.mubr.msk.f32.mxu1 %vm359_vm0, %v6258_v5  ;;  %v6299_v4 = vld [vmem:[%s12365_s3 + $0x80] sm:$0xff]  ;;  %v9414_v5 = vld [vmem:[%s12365_s3 + $0x178] sm:$0xff] }
  0x53   : > { %7878 = vmatpush3.msra.mxu0 %v6311_v39  ;;  %7922 = vmatpush3.msra.mxu1 %v1602_v45 }
  0x54   : > { %7879 = vmatprep.subr.mxu0 %v6310_v41  ;;  %7923 = vmatprep.subr.mxu1 %v1601_v47 }
  0x55   : > { %7804 = vmatmul.mubr.msk.f32.gmra.mxu0 %vm359_vm0, %v6211_v6  ;;  %7848 = vmatmul.mubr.msk.f32.gmra.mxu1 %vm359_vm0, %v6259_v7 }
  0x56   : > { %7806 = vmatprep.mubr.msk.f32.mxu0 %vm359_vm0, %v6212_v8  ;;  %7850 = vmatprep.mubr.msk.f32.mxu1 %vm359_vm0, %v6260_v9 }
  0x57   : > { %7880 = vmatpush3.msra.mxu0 %v6310_v41  ;;  %7924 = vmatpush3.msra.mxu1 %v1601_v47 }
  0x58   : > { %7881 = vmatprep.subr.mxu0 %v6309_v43  ;;  %7925 = vmatprep.subr.mxu1 %v1600_v49 }
  0x59   : > { %7807 = vmatmul.mubr.msk.f32.gmra.mxu0 %vm359_vm0, %v6213_v10  ;;  %7851 = vmatmul.mubr.msk.f32.gmra.mxu1 %vm359_vm0, %v6261_v11 }
  0x5a   : > { %7809 = vmatprep.mubr.msk.f32.mxu0 %vm359_vm0, %v6214_v12  ;;  %7853 = vmatprep.mubr.msk.f32.mxu1 %vm359_vm0, %v6262_v13 }
  0x5b   : > { %7882 = vmatpush3.msra.mxu0 %v6309_v43  ;;  %7926 = vmatpush3.msra.mxu1 %v1600_v49 }
  0x5c   : > { %7883 = vmatprep.subr.mxu0 %v6308_v46  ;;  %7927 = vmatprep.subr.mxu1 %v1599_v50 }
  0x5d   : > { %7810 = vmatmul.mubr.msk.f32.gmra.mxu0 %vm359_vm0, %v6215_v14  ;;  %7854 = vmatmul.mubr.msk.f32.gmra.mxu1 %vm359_vm0, %v6263_v15 }
  0x5e   : > { %7812 = vmatprep.mubr.msk.f32.mxu0 %vm359_vm0, %v6216_v16  ;;  %7856 = vmatprep.mubr.msk.f32.mxu1 %vm359_vm0, %v6264_v17 }
  0x5f   : > { %7884 = vmatpush3.msra.mxu0 %v6308_v46  ;;  %7928 = vmatpush3.msra.mxu1 %v1599_v50 }
  0x60   : > { %7885 = vmatprep.subr.mxu0 %v6307_v48  ;;  %7929 = vmatprep.subr.mxu1 %v1598_v52 }
  0x61   : > { %7813 = vmatmul.mubr.msk.f32.gmra.mxu0 %vm359_vm0, %v6217_v18  ;;  %7857 = vmatmul.mubr.msk.f32.gmra.mxu1 %vm359_vm0, %v6265_v19 }
  0x62   : > { %7815 = vmatprep.mubr.msk.f32.mxu0 %vm359_vm0, %v6218_v20  ;;  %7859 = vmatprep.mubr.msk.f32.mxu1 %vm359_vm0, %v6266_v21 }
  0x63   : > { %7886 = vmatpush3.msra.mxu0 %v6307_v48  ;;  %7930 = vmatpush3.msra.mxu1 %v1598_v52 }
  0x64   : > { %7887 = vmatprep.subr.mxu0 %v6306_v51  ;;  %7931 = vmatprep.subr.mxu1 %v1597_v54 }
  0x65   : > { %7816 = vmatmul.mubr.msk.f32.gmra.mxu0 %vm359_vm0, %v6219_v22  ;;  %7860 = vmatmul.mubr.msk.f32.gmra.mxu1 %vm359_vm0, %v6267_v23 }
  0x66   : > { %7818 = vmatprep.mubr.msk.f32.mxu0 %vm359_vm0, %v6220_v24  ;;  %7862 = vmatprep.mubr.msk.f32.mxu1 %vm359_vm0, %v6268_v25 }
  0x67   : > { %7888 = vmatpush3.msra.mxu0 %v6306_v51  ;;  %7932 = vmatpush3.msra.mxu1 %v1597_v54 }
  0x68   : > { %7889 = vmatprep.subr.mxu0 %v6305_v53  ;;  %7933 = vmatprep.subr.mxu1 %v1596_v55 }
  0x69   : > { %7819 = vmatmul.mubr.msk.f32.gmra.mxu0 %vm359_vm0, %v6221_v26  ;;  %7863 = vmatmul.mubr.msk.f32.gmra.mxu1 %vm359_vm0, %v6269_v27 }
  0x6a   : > { %7821 = vmatprep.mubr.msk.f32.mxu0 %vm359_vm0, %v6222_v28  ;;  %7865 = vmatprep.mubr.msk.f32.mxu1 %vm359_vm0, %v6270_v29 }
  0x6b   : > { %7890 = vmatpush3.msra.mxu0 %v6305_v53  ;;  %7934 = vmatpush3.msra.mxu1 %v1596_v55 }
  0x6c   : > { %7891 = vmatprep.subr.mxu0 %v6304_v56  ;;  %7935 = vmatprep.subr.mxu1 %v1595_v57 }
  0x6d   : > { %7822 = vmatmul.mubr.msk.f32.gmra.mxu0 %vm359_vm0, %v6223_v31  ;;  %7866 = vmatmul.mubr.msk.f32.gmra.mxu1 %vm359_vm0, %v6271_v32 }
  0x6e   : > { %7824 = vmatprep.mubr.msk.f32.mxu0 %vm359_vm0, %v6224_v33  ;;  %7868 = vmatprep.mubr.msk.f32.mxu1 %vm359_vm0, %v6272_v34 }
  0x6f   : > { %7892 = vmatpush3.msra.mxu0 %v6304_v56  ;;  %7936 = vmatpush3.msra.mxu1 %v1595_v57 }
  0x70   : > { %7937 = vmatprep.subr.mxu1 %v1594_v58  ;;  %7893 = vmatprep.subr.mxu0 %v6303_v60 }
  0x71   : > { %7825 = vmatmul.mubr.msk.f32.gmra.mxu0 %vm359_vm0, %v6225_v36  ;;  %7869 = vmatmul.mubr.msk.f32.gmra.mxu1 %vm359_vm0, %v6273_v37 }
  0x72   : > { %7938 = vmatpush3.msra.mxu1 %v1594_v58  ;;  %7894 = vmatpush3.msra.mxu0 %v6303_v60 }
  0x73   : > { %7939 = vmatprep.subr.mxu1 %v1593_v59  ;;  %7895 = vmatprep.subr.mxu0 %v6302_v62 }
  0x74   : > { %7940 = vmatpush3.msra.mxu1 %v1593_v59  ;;  %7896 = vmatpush3.msra.mxu0 %v6302_v62 }
  0x75   : > { %7941 = vmatprep.subr.mxu1 %v1592_v61  ;;  %7897 = vmatprep.subr.mxu0 %v6301_v0 }
  0x76   : > { %7942 = vmatpush3.msra.mxu1 %v1592_v61  ;;  %7898 = vmatpush3.msra.mxu0 %v6301_v0 }
  0x77   : > { %7943 = vmatprep.subr.mxu1 %v1591_v63  ;;  %7899 = vmatprep.subr.mxu0 %v6300_v2 }
  0x78   : > { %7944 = vmatpush3.msra.mxu1 %v1591_v63  ;;  %7900 = vmatpush3.msra.mxu0 %v6300_v2  ;;  %v9516_v63 = vld [vmem:[%s12364_s2] ss:$0 sm:$0xff] }
  0x79   : > { %7945 = vmatprep.subr.mxu1 %v1590_v1  ;;  %7901 = vmatprep.subr.mxu0 %v6299_v4 }
  0x7a   : > { %7946 = vmatpush3.msra.mxu1 %v1590_v1  ;;  %7902 = vmatpush3.msra.mxu0 %v6299_v4 }
  0x7b   : > { %8003 = vmatprep.subr.mxu1 %v9405_v3  ;;  %7959 = vmatprep.subr.mxu0 %v9414_v5 }
  0xd5   : > { %v7705_v6 = vpop.f32.mrf.mxu0  ;;  %v7749_v7 = vpop.f32.mrf.mxu1 }
  0xd6   : > { %v900_v58 = vmax.f32 %v7705_v6, %v7749_v7 }
  0xd7   : > { %v498_v8 = vpop.f32.mrf.mxu0  ;;  %v780_v9 = vpop.f32.mrf.mxu1 }
  0xd8   : > { %v899_v61 = vmax.f32 %v498_v8, %v780_v9 }
  0xd9   : > { %v9417_v10 = vpop.f32.mrf.mxu0  ;;  %v9419_v11 = vpop.f32.mrf.mxu1 }
  0xda   : > { %v902_v2 = vmax.f32 %v9417_v10, %v9419_v11 }
  0xdb   : > { %v9421_v12 = vpop.f32.mrf.mxu0  ;;  %v9423_v13 = vpop.f32.mrf.mxu1 }
  0xdc   : > { %v901_v6 = vmax.f32 %v9421_v12, %v9423_v13 }
  0xdd   : > { %v9425_v14 = vpop.f32.mrf.mxu0  ;;  %v9427_v15 = vpop.f32.mrf.mxu1 }
  0xde   : > { %v904_v40 = vmax.f32 %v9425_v14, %v9427_v15 }
  0xdf   : > { %v9429_v16 = vpop.f32.mrf.mxu0  ;;  %v9431_v17 = vpop.f32.mrf.mxu1 }
  0xe0   : > { %v903_v11 = vmax.f32 %v9429_v16, %v9431_v17 }
  0xe1   : > { %v9433_v18 = vpop.f32.mrf.mxu0  ;;  %v9435_v19 = vpop.f32.mrf.mxu1 }
  0xe2   : > { %v906_v14 = vmax.f32 %v9433_v18, %v9435_v19 }
  0xe3   : > { %v9437_v20 = vpop.f32.mrf.mxu0  ;;  %v9439_v21 = vpop.f32.mrf.mxu1 }
  0xe4   : > { %v905_v17 = vmax.f32 %v9437_v20, %v9439_v21 }
  0xe5   : > { %v9441_v22 = vpop.f32.mrf.mxu0  ;;  %v9443_v23 = vpop.f32.mrf.mxu1 }
  0xe7   : > { %v9445_v24 = vpop.f32.mrf.mxu0  ;;  %v9447_v25 = vpop.f32.mrf.mxu1 }
  0xe9   : > { %v9449_v26 = vpop.f32.mrf.mxu0  ;;  %v9451_v27 = vpop.f32.mrf.mxu1 }
  0xeb   : > { %v9453_v28 = vpop.f32.mrf.mxu0  ;;  %v9455_v29 = vpop.f32.mrf.mxu1 }
  0xed   : > { %v9457_v30 = vpop.f32.mrf.mxu0  ;;  %v9459_v31 = vpop.f32.mrf.mxu1 }
  0xef   : > { %v9461_v32 = vpop.f32.mrf.mxu0  ;;  %v9463_v33 = vpop.f32.mrf.mxu1 }
  0xf1   : > { %v9465_v34 = vpop.f32.mrf.mxu0  ;;  %v9467_v35 = vpop.f32.mrf.mxu1 }
  0xf3   : > { %v9469_v36 = vpop.f32.mrf.mxu0  ;;  %v9471_v37 = vpop.f32.mrf.mxu1 }
  0xf5   : > { %v9473_v38 = vpop.f32.mrf.mxu0  ;;  %v9475_v39 = vpop.f32.mrf.mxu1 }
  0xf7   : > { %v9479_v41 = vpop.f32.mrf.mxu0  ;;  %v9481_v42 = vpop.f32.mrf.mxu1 }
  0xf9   : > { %v9483_v43 = vpop.f32.mrf.mxu0  ;;  %v9485_v44 = vpop.f32.mrf.mxu1 }
  0xfb   : > { %v9489_v46 = vpop.f32.mrf.mxu0  ;;  %v9491_v47 = vpop.f32.mrf.mxu1 }
  0xfd   : > { %v9493_v48 = vpop.f32.mrf.mxu0  ;;  %v9495_v49 = vpop.f32.mrf.mxu1 }
  0xff   : > { %v9499_v51 = vpop.f32.mrf.mxu0  ;;  %v9501_v52 = vpop.f32.mrf.mxu1 }
 0x101   : > { %v9503_v53 = vpop.f32.mrf.mxu0  ;;  %v9505_v54 = vpop.f32.mrf.mxu1 }
 0x103   : > { %v9509_v56 = vpop.f32.mrf.mxu0  ;;  %v9511_v57 = vpop.f32.mrf.mxu1 }
 0x104   : > { %12372 = vst [vmem:[#allocation2_spill] sm:$0xff] %v9509_v56  ;;  %12373 = vst [vmem:[#allocation3_spill] sm:$0xff] %v9511_v57 }
 0x105   : > { %v7793_v59 = vpop.f32.mrf.mxu0  ;;  %v7837_v60 = vpop.f32.mrf.mxu1 }
 0x106   : > { %v1206_v62 = vmax.f32 %v900_v58, %v7793_v59 }
 0x107   : > { %v1086_v0 = vpop.f32.mrf.mxu0  ;;  %v1392_v1 = vpop.f32.mrf.mxu1 }
 0x108   : > { %v1512_v4 = vmax.f32 %v1206_v62, %v7837_v60  ;;  %v1205_v55 = vmax.f32 %v899_v61, %v1086_v0 }
 0x109   : > { %v7796_v50 = vpop.f32.mrf.mxu0  ;;  %v7840_v45 = vpop.f32.mrf.mxu1 }
 0x10a   : > { %v1543_v7 = vadd.f32 %v9516_v63, %v1512_v4  ;;  %v1511_v8 = vmax.f32 %v1205_v55, %v1392_v1  ;;  %v1208_v9 = vmax.f32 %v902_v2, %v7796_v50 }
 0x10b   : > { %v1096_v58 = vpop.f32.mrf.mxu0  ;;  %v1402_v59 = vpop.f32.mrf.mxu1 }
 0x10c   : > { %v1542_v56 = vadd.f32 %v9516_v63, %v1511_v8  ;;  %v1514_v57 = vmax.f32 %v1208_v9, %v7840_v45  ;;  %v1207_v10 = vmax.f32 %v901_v6, %v1096_v58  ;;  %v9528_v60 = vmax.f32 %v1543_v7, 0.0  ;;  %v6345_v58 = vld [vmem:[%s12365_s3 + $0x1f0] sm:$0xff] }
 0x10d   : > { %v7799_v61 = vpop.f32.mrf.mxu0  ;;  %v7843_v12 = vpop.f32.mrf.mxu1  ;;  %v908_v8 = vmax.f32 %v9441_v22, %v9443_v23 }
 0x10e   : > { %v9530_v13 = vmax.f32 %v1542_v56, 0.0  ;;  %v1545_v50 = vadd.f32 %v9516_v63, %v1514_v57  ;;  %v1513_v55 = vmax.f32 %v1207_v10, %v1402_v59  ;;  %v1210_v62 = vmax.f32 %v904_v40, %v7799_v61 }
 0x10f   : > { %v1106_v0 = vpop.f32.mrf.mxu0  ;;  %v1412_v1 = vpop.f32.mrf.mxu1  ;;  %v1610_v4 = vrot.slane %v9528_v60, 1  ;;  %v907_v61 = vmax.f32 %v9445_v24, %v9447_v25 }
 0x110   : > { %v1544_v15 = vadd.f32 %v9516_v63, %v1513_v55  ;;  %v1209_v45 = vmax.f32 %v903_v11, %v1106_v0  ;;  %v1516_v16 = vmax.f32 %v1210_v62, %v7843_v12  ;;  %7947 = vmatprep.mubr.f32.mxu1 %v9530_v13  ;;  %v9539_v56 = vmax.f32 %v1545_v50, 0.0  ;;  %v6344_v62 = vld [vmem:[%s12365_s3 + $0x1e8] sm:$0xff] }
 0x111   : > { %v7802_v57 = vpop.f32.mrf.mxu0  ;;  %v7846_v2 = vpop.f32.mrf.mxu1  ;;  %v1609_v40 = vrot.slane %v9530_v13, 1 }
 0x112   : > { %v9543_v6 = vmax.f32 %v1544_v15, 0.0  ;;  %v1547_v18 = vadd.f32 %v9516_v63, %v1516_v16  ;;  %v1212_v19 = vmax.f32 %v906_v14, %v7802_v57  ;;  %v1515_v7 = vmax.f32 %v1209_v45, %v1412_v1  ;;  %v6329_v45 = vld [vmem:[%s12365_s3 + $0x170] sm:$0xff] }
 0x113   : > { %v1116_v9 = vpop.f32.mrf.mxu0  ;;  %v1611_v20 = vsel %vm1608_vm1, %v1609_v40, %v1610_v4  ;;  %v1422_v21 = vpop.f32.mrf.mxu1  ;;  %v1616_v55 = vrot.slane %v9539_v56, 1 }
 0x114   : > { %v1546_v59 = vadd.f32 %v9516_v63, %v1515_v7  ;;  %v1211_v10 = vmax.f32 %v905_v17, %v1116_v9  ;;  %v1518_v11 = vmax.f32 %v1212_v19, %v7846_v2  ;;  %7903 = vmatprep.mubr.f32.mxu0 %v1611_v20  ;;  %7948 = vmatmul.mubr.f32.vlgmr.msra.gmra.mxu1 %v9543_v6  ;;  %v9556_v12 = vmax.f32 %v1547_v18, 0.0  ;;  %v6328_v18 = vld [vmem:[%s12365_s3 + $0x168] sm:$0xff] }
 0x115   : > { %8004 = vmatpush3.msra.mxu1 %v9405_v3  ;;  %v7805_v22 = vpop.f32.mrf.mxu0  ;;  %v7849_v23 = vpop.f32.mrf.mxu1  ;;  %v1615_v50 = vrot.slane %v9543_v6, 1  ;;  %v910_v3 = vmax.f32 %v9449_v26, %v9451_v27  ;;  %v6343_v26 = vld [vmem:[%s12365_s3 + $0x1e0] sm:$0xff]  ;;  %v909_v27 = vmax.f32 %v9453_v28, %v9455_v29  ;;  %v912_v20 = vmax.f32 %v9457_v30, %v9459_v31 }
 0x116   : > { %v9564_v0 = vmax.f32 %v1546_v59, 0.0  ;;  %v1549_v1 = vadd.f32 %v9516_v63, %v1518_v11  ;;  %v1214_v14 = vmax.f32 %v908_v8, %v7805_v22  ;;  %v1517_v24 = vmax.f32 %v1211_v10, %v1422_v21  ;;  %8005 = vmatprep.subr.mxu1 %v6345_v58  ;;  %v6342_v59 = vld [vmem:[%s12365_s3 + $0x1d8] sm:$0xff]  ;;  %v6327_v30 = vld [vmem:[%s12365_s3 + $0x160] sm:$0xff] }
 0x117   : > { %8006 = vmatpush3.msra.mxu1 %v6345_v58  ;;  %v1126_v25 = vpop.f32.mrf.mxu0  ;;  %v9570_v15 = vsel %vm1608_vm1, %v1615_v50, %v1616_v55  ;;  %v1432_v16 = vpop.f32.mrf.mxu1  ;;  %v1622_v8 = vrot.slane %v9556_v12, 1  ;;  %v911_v31 = vmax.f32 %v9461_v32, %v9463_v33  ;;  %v6341_v50 = vld [vmem:[%s12365_s3 + $0x1d0] sm:$0xff] }
 0x118   : > { %v1548_v17 = vadd.f32 %v9516_v63, %v1517_v24  ;;  %v1213_v57 = vmax.f32 %v907_v61, %v1126_v25  ;;  %v1520_v2 = vmax.f32 %v1214_v14, %v7849_v23  ;;  %7904 = vmatmul.mubr.f32.vlgmr.msra.gmra.mxu0 %v9570_v15  ;;  %8007 = vmatprep.subr.mxu1 %v6344_v62  ;;  %v9582_v40 = vmax.f32 %v1549_v1, 0.0 }
 0x119   : > { %7960 = vmatpush3.msra.mxu0 %v9414_v5  ;;  %7950 = vmatprep.mubr.f32.mxu1 %v9564_v0  ;;  %v7808_v4 = vpop.f32.mrf.mxu0  ;;  %v7852_v19 = vpop.f32.mrf.mxu1  ;;  %v1621_v7 = vrot.slane %v9564_v0, 1  ;;  %v914_v25 = vmax.f32 %v9465_v34, %v9467_v35  ;;  %v913_v34 = vmax.f32 %v9469_v36, %v9471_v37  ;;  %v6325_v35 = vld [vmem:[%s12365_s3 + $0x150] sm:$0xff]  ;;  %v6339_v36 = vld [vmem:[%s12365_s3 + $0x1c0] sm:$0xff] }
 0x11a   : > { %v9591_v9 = vmax.f32 %v1548_v17, 0.0  ;;  %v1551_v28 = vadd.f32 %v9516_v63, %v1520_v2  ;;  %7961 = vmatprep.subr.mxu0 %v6329_v45  ;;  %8008 = vmatpush3.msra.mxu1 %v6344_v62  ;;  %v1216_v29 = vmax.f32 %v910_v3, %v7808_v4  ;;  %v1519_v5 = vmax.f32 %v1213_v57, %v1432_v16  ;;  %v6326_v3 = vld [vmem:[%s12365_s3 + $0x158] sm:$0xff]  ;;  %v6340_v57 = vld [vmem:[%s12365_s3 + $0x1c8] sm:$0xff] }
 0x11b   : > { %7962 = vmatpush3.msra.mxu0 %v6329_v45  ;;  %8009 = vmatprep.subr.mxu1 %v6343_v26  ;;  %v1136_v21 = vpop.f32.mrf.mxu0  ;;  %v9597_v58 = vsel %vm1608_vm1, %v1621_v7, %v1622_v8  ;;  %v1442_v10 = vpop.f32.mrf.mxu1  ;;  %v1628_v1 = vrot.slane %v9582_v40, 1 }
 0x11c   : > { %v1550_v11 = vadd.f32 %v9516_v63, %v1519_v5  ;;  %7963 = vmatprep.subr.mxu0 %v6328_v18  ;;  %8010 = vmatpush3.msra.mxu1 %v6343_v26  ;;  %v1215_v61 = vmax.f32 %v909_v27, %v1136_v21  ;;  %v1522_v22 = vmax.f32 %v1216_v29, %v7852_v19  ;;  %v1627_v62 = vrot.slane %v9591_v9, 1  ;;  %v6324_v21 = vld [vmem:[%s12365_s3 + $0x148] sm:$0xff] }
 0x11d   : > { %7906 = vmatprep.mubr.f32.mxu0 %v9597_v58  ;;  %7964 = vmatpush3.msra.mxu0 %v6328_v18  ;;  %v7811_v23 = vpop.f32.mrf.mxu0  ;;  %v7855_v55 = vpop.f32.mrf.mxu1  ;;  %v9614_v14 = vmax.f32 %v1551_v28, 0.0 }
 0x11e   : > { %v9616_v24 = vmax.f32 %v1550_v11, 0.0  ;;  %8011 = vmatprep.subr.mxu1 %v6342_v59  ;;  %7951 = vmatmul.mubr.f32.gmra.mxu1 %v9591_v9  ;;  %v1218_v32 = vmax.f32 %v912_v20, %v7811_v23  ;;  %v1521_v33 = vmax.f32 %v1215_v61, %v1442_v10  ;;  %v1553_v45 = vadd.f32 %v9516_v63, %v1522_v22 }
 0x11f   : > { %7965 = vmatprep.subr.mxu0 %v6327_v30  ;;  %8012 = vmatpush3.msra.mxu1 %v6342_v59  ;;  %v1146_v16 = vpop.f32.mrf.mxu0  ;;  %v9626_v17 = vsel %vm1608_vm1, %v1627_v62, %v1628_v1  ;;  %v1452_v2 = vpop.f32.mrf.mxu1  ;;  %v1634_v37 = vrot.slane %v9614_v14, 1  ;;  %v6323_v1 = vld [vmem:[%s12365_s3 + $0x140] sm:$0xff] }
 0x120   : > { %v1552_v26 = vadd.f32 %v9516_v63, %v1521_v33  ;;  %7966 = vmatpush3.msra.mxu0 %v6327_v30  ;;  %8013 = vmatprep.subr.mxu1 %v6341_v50  ;;  %v1217_v27 = vmax.f32 %v911_v31, %v1146_v16  ;;  %v1524_v4 = vmax.f32 %v1218_v32, %v7855_v55  ;;  %v1633_v7 = vrot.slane %v9616_v24, 1  ;;  %v6338_v31 = vld [vmem:[%s12365_s3 + $0x1b8] sm:$0xff] }
 0x121   : > { %7967 = vmatprep.subr.mxu0 %v6326_v3  ;;  %8014 = vmatpush3.msra.mxu1 %v6341_v50  ;;  %v7814_v18 = vpop.f32.mrf.mxu0  ;;  %v7858_v19 = vpop.f32.mrf.mxu1  ;;  %v9645_v5 = vmax.f32 %v1553_v45, 0.0  ;;  %v12374_v32 = vmax.f32 %v9473_v38, %v9475_v39  ;;  %v6322_v39 = vld [vmem:[%s12365_s3 + $0x138] sm:$0xff] }
 0x122   : > { %v9638_v8 = vmax.f32 %v1552_v26, 0.0  ;;  %7907 = vmatmul.mubr.f32.gmra.mxu0 %v9626_v17  ;;  %8015 = vmatprep.subr.mxu1 %v6340_v57  ;;  %v1220_v28 = vmax.f32 %v914_v25, %v7814_v18  ;;  %v1523_v29 = vmax.f32 %v1217_v27, %v1452_v2  ;;  %v1555_v20 = vadd.f32 %v9516_v63, %v1524_v4  ;;  %v6337_v25 = vld [vmem:[%s12365_s3 + $0x1b0] sm:$0xff] }
 0x123   : > { %7968 = vmatpush3.msra.mxu0 %v6326_v3  ;;  %7953 = vmatprep.mubr.f32.mxu1 %v9616_v24  ;;  %v1156_v59 = vpop.f32.mrf.mxu0  ;;  %v1462_v10 = vpop.f32.mrf.mxu1  ;;  %v9654_v22 = vsel %vm1608_vm1, %v1633_v7, %v1634_v37  ;;  %v1640_v16 = vrot.slane %v9645_v5, 1  ;;  %v12375_v7 = vmax.f32 %v9483_v43, %v9485_v44  ;;  %v6321_v37 = vld [vmem:[%s12365_s3 + $0x130] sm:$0xff]  ;;  %v6335_v43 = vld [vmem:[%s12365_s3 + $0x1a0] sm:$0xff] }
 0x124   : > { %7969 = vmatprep.subr.mxu0 %v6325_v35  ;;  %8016 = vmatpush3.msra.mxu1 %v6340_v57  ;;  %v1554_v11 = vadd.f32 %v9516_v63, %v1523_v29  ;;  %v1219_v61 = vmax.f32 %v913_v34, %v1156_v59  ;;  %v1526_v30 = vmax.f32 %v1220_v28, %v7858_v19  ;;  %v1639_v55 = vrot.slane %v9638_v8, 1  ;;  %v6336_v34 = vld [vmem:[%s12365_s3 + $0x1a8] sm:$0xff] }
 0x125   : > { %7970 = vmatpush3.msra.mxu0 %v6325_v35  ;;  %8017 = vmatprep.subr.mxu1 %v6339_v36  ;;  %v7817_v23 = vpop.f32.mrf.mxu0  ;;  %v7861_v50 = vpop.f32.mrf.mxu1  ;;  %v9677_v2 = vmax.f32 %v1555_v20, 0.0 }
 0x126   : > { %v9660_v62 = vmax.f32 %v1554_v11, 0.0  ;;  %7971 = vmatprep.subr.mxu0 %v6324_v21  ;;  %8018 = vmatpush3.msra.mxu1 %v6339_v36  ;;  %v1222_v33 = vmax.f32 %v12374_v32, %v7817_v23  ;;  %v1525_v3 = vmax.f32 %v1219_v61, %v1462_v10  ;;  %v1557_v27 = vadd.f32 %v9516_v63, %v1526_v30  ;;  %v6320_v11 = vld [vmem:[%s12365_s3 + $0x128] sm:$0xff] }
 0x127   : > { %7909 = vmatprep.mubr.f32.mxu0 %v9654_v22  ;;  %7972 = vmatpush3.msra.mxu0 %v6324_v21  ;;  %v9672_v45 = vpop.f32.mrf.mxu0  ;;  %v9675_v57 = vpop.f32.mrf.mxu1  ;;  %v9686_v4 = vsel %vm1608_vm1, %v1639_v55, %v1640_v16  ;;  %v1646_v59 = vrot.slane %v9677_v2, 1 }
 0x128   : > { %8019 = vmatprep.subr.mxu1 %v6338_v31  ;;  %7954 = vmatmul.mubr.f32.gmra.mxu1 %v9638_v8  ;;  %v1556_v38 = vadd.f32 %v9516_v63, %v1525_v3  ;;  %v1528_v26 = vmax.f32 %v1222_v33, %v7861_v50  ;;  %v1645_v29 = vrot.slane %v9660_v62, 1  ;;  %v9712_v10 = vmax.f32 %v1557_v27, 0.0 }
 0x129   : > { %7973 = vmatprep.subr.mxu0 %v6323_v1  ;;  %8020 = vmatpush3.msra.mxu1 %v6338_v31  ;;  %v7820_v35 = vpop.f32.mrf.mxu0  ;;  %v7864_v18 = vpop.f32.mrf.mxu1  ;;  %v12376_v50 = vmax.f32 %v9493_v48, %v9495_v49  ;;  %v6319_v48 = vld [vmem:[%s12365_s3 + $0x120] sm:$0xff]  ;;  %v2046_v49 = vrot.slane %v9530_v13, 3 }
 0x12a   : > { %7974 = vmatpush3.msra.mxu0 %v6323_v1  ;;  %8021 = vmatprep.subr.mxu1 %v6337_v25  ;;  %v9692_v19 = vadd.f32 %v9516_v63, %v1528_v26  ;;  %v1224_v28 = vmax.f32 %v12375_v7, %v7820_v35  ;;  %v9698_v36 = vmax.f32 %v1556_v38, 0.0  ;;  %v9722_v23 = vsel %vm1608_vm1, %v1645_v29, %v1646_v59  ;;  %v6334_v1 = vld [vmem:[%s12365_s3 + $0x198] sm:$0xff]  ;;  %v6333_v38 = vld [vmem:[%s12365_s3 + $0x190] sm:$0xff] }
 0x12b   : > { %7975 = vmatprep.subr.mxu0 %v6322_v39  ;;  %8022 = vmatpush3.msra.mxu1 %v6337_v25  ;;  %v9703_v20 = vpop.f32.mrf.mxu0  ;;  %v9705_v21 = vpop.f32.mrf.mxu1  ;;  %v2209_v25 = vrot.slane %v9530_v13, 4  ;;  %v2047_v35 = vrot.slane %v9528_v60, 3  ;;  %v2213_v59 = vrot.slane %v9543_v6, 4 }
 0x12c   : > { %7910 = vmatmul.mubr.f32.gmra.mxu0 %v9686_v4  ;;  %8023 = vmatprep.subr.mxu1 %v6336_v34  ;;  %v1530_v44 = vmax.f32 %v1224_v28, %v7864_v18  ;;  %v1651_v33 = vrot.slane %v9698_v36, 1  ;;  %v6318_v18 = vld [vmem:[%s12365_s3 + $0x118] sm:$0xff]  ;;  %v12377_v28 = vmax.f32 %v9503_v53, %v9505_v54  ;;  %v6332_v53 = vld [vmem:[%s12365_s3 + $0x188] sm:$0xff] }
 0x12d   : > { %7976 = vmatpush3.msra.mxu0 %v6322_v39  ;;  %7956 = vmatprep.mubr.f32.mxu1 %v9660_v62  ;;  %v7823_v61 = vpop.f32.mrf.mxu0  ;;  %v7867_v30 = vpop.f32.mrf.mxu1  ;;  %v1652_v39 = vrot.slane %v9712_v10, 1 }
 0x12e   : > { %7977 = vmatprep.subr.mxu0 %v6321_v37  ;;  %8024 = vmatpush3.msra.mxu1 %v6336_v34  ;;  %v9719_v31 = vadd.f32 %v9516_v63, %v1530_v44  ;;  %v1226_v55 = vmax.f32 %v12376_v50, %v7823_v61  ;;  %v2210_v34 = vrot.slane %v9528_v60, 4  ;;  %v1884_v61 = vrot.slane %v9528_v60, 2  ;;  %v6316_v60 = vld [vmem:[%s12365_s3 + $0x108] sm:$0xff] }
 0x12f   : > { %7978 = vmatpush3.msra.mxu0 %v6321_v37  ;;  %8025 = vmatprep.subr.mxu1 %v6335_v43  ;;  %v9730_v32 = vpop.f32.mrf.mxu0  ;;  %v9733_v3 = vpop.f32.mrf.mxu1  ;;  %v9758_v37 = vsel %vm1608_vm1, %v1651_v33, %v1652_v39  ;;  %v2050_v33 = vrot.slane %v9543_v6, 3  ;;  %v2055_v39 = vrot.slane %v9556_v12, 3 }
 0x130   : > { %7979 = vmatprep.subr.mxu0 %v6320_v11  ;;  %8026 = vmatpush3.msra.mxu1 %v6335_v43  ;;  %v1532_v16 = vmax.f32 %v1226_v55, %v7867_v30  ;;  %v1883_v43 = vrot.slane %v9530_v13, 2  ;;  %v9762_v44 = vsel %vm2208_vm2, %v2209_v25, %v2210_v34  ;;  %v6317_v13 = vld [vmem:[%s12365_s3 + $0x110] sm:$0xff]  ;;  %v2214_v30 = vrot.slane %v9539_v56, 4 }
 0x131   : > { %7912 = vmatprep.mubr.f32.mxu0 %v9722_v23  ;;  %7980 = vmatpush3.msra.mxu0 %v6320_v11  ;;  %v7826_v26 = vpop.f32.mrf.mxu0  ;;  %v7870_v27 = vpop.f32.mrf.mxu1  ;;  %v2048_v11 = vsel %vm2045_vm3, %v2046_v49, %v2047_v35  ;;  %v2051_v49 = vrot.slane %v9539_v56, 3  ;;  %v6377_v35 = vld [vmem:[%s12365_s3 + $0x2f0] sm:$0xff] }
 0x132   : > { %8027 = vmatprep.subr.mxu1 %v6334_v1  ;;  %7957 = vmatmul.mubr.f32.gmra.mxu1 %v9698_v36  ;;  %v9752_v7 = vadd.f32 %v9516_v63, %v1532_v16  ;;  %v1228_v29 = vmax.f32 %v12377_v28, %v7826_v26  ;;  %v1885_v55 = vsel %vm1882_vm4, %v1883_v43, %v1884_v61  ;;  %v6378_v16 = vld [vmem:[%s12365_s3 + $0x2f8] sm:$0xff]  ;;  %v1887_v26 = vrot.slane %v9543_v6, 2 }
 0x133   : > { %7981 = vmatprep.subr.mxu0 %v6319_v48  ;;  %8028 = vmatpush3.msra.mxu1 %v6334_v1  ;;  %v6331_v1 = vld [vmem:[%s12365_s3 + $0x180] sm:$0xff]  ;;  %v9787_v25 = vsel %vm2208_vm2, %v2213_v59, %v2214_v30  ;;  %v1891_v28 = vrot.slane %v9564_v0, 2  ;;  %v6362_v43 = vld [vmem:[%s12365_s3 + $0x278] sm:$0xff]  ;;  %v2063_v30 = vrot.slane %v9614_v14, 3 }
 0x134   : > { %7982 = vmatpush3.msra.mxu0 %v6319_v48  ;;  %8029 = vmatprep.subr.mxu1 %v6333_v38  ;;  %v1534_v54 = vmax.f32 %v1228_v29, %v7870_v27  ;;  %v2054_v48 = vrot.slane %v9564_v0, 3  ;;  %v9800_v27 = vsel %vm2045_vm3, %v2050_v33, %v2051_v49  ;;  %v2058_v29 = vrot.slane %v9591_v9, 3  ;;  %v6375_v33 = vld [vmem:[%s12365_s3 + $0x2e0] sm:$0xff] }
 0x135   : > { %8035 = vmatprep.mubr.f32.mxu1 %v2048_v11  ;;  %7983 = vmatprep.subr.mxu0 %v6318_v18  ;;  %v1892_v11 = vrot.slane %v9556_v12, 2  ;;  %v1899_v49 = vrot.slane %v9616_v24, 2 }
 0x136   : > { %8030 = vmatpush3.msra.mxu1 %v6333_v38  ;;  %7913 = vmatmul.mubr.f32.gmra.mxu0 %v9758_v37  ;;  %v9776_v50 = vadd.f32 %v9516_v63, %v1534_v54  ;;  %v6315_v38 = vld [vmem:[%s12365_s3 + $0x100] sm:$0xff]  ;;  %v9804_v34 = vsel %vm2045_vm3, %v2054_v48, %v2055_v39  ;;  %v6376_v54 = vld [vmem:[%s12365_s3 + $0x2e8] sm:$0xff]  ;;  %v1896_v48 = vrot.slane %v9582_v40, 2 }
 0x137   : > { %7984 = vmatpush3.msra.mxu0 %v6318_v18  ;;  %8031 = vmatprep.subr.mxu1 %v6332_v53  ;;  %v1888_v18 = vrot.slane %v9539_v56, 2  ;;  %v2059_v56 = vrot.slane %v9582_v40, 3 }
 0x138   : > { %12378 = vst [vmem:[#allocation4_spill] sm:$0xff] %v9776_v50  ;;  %7985 = vmatprep.subr.mxu0 %v6317_v13  ;;  %7991 = vmatprep.mubr.f32.mxu0 %v1885_v55  ;;  %v6361_v55 = vld [vmem:[%s12365_s3 + $0x270] sm:$0xff] }
 0x139   : > { %8032 = vmatpush3.msra.mxu1 %v6332_v53  ;;  %7986 = vmatpush3.msra.mxu0 %v6317_v13  ;;  %v9817_v59 = vsel %vm1882_vm4, %v1887_v26, %v1888_v18  ;;  %v2062_v53 = vrot.slane %v9616_v24, 3  ;;  %v9827_v13 = vsel %vm1882_vm4, %v1891_v28, %v1892_v11  ;;  %v9830_v61 = vsel %vm2045_vm3, %v2058_v29, %v2059_v56  ;;  %v6374_v28 = vld [vmem:[%s12365_s3 + $0x2d8] sm:$0xff]  ;;  %v6359_v56 = vld [vmem:[%s12365_s3 + $0x260] sm:$0xff] }
 0x13a   : > { %8033 = vmatprep.subr.mxu1 %v6331_v1  ;;  %7987 = vmatprep.subr.mxu0 %v6316_v60  ;;  %v1900_v26 = vrot.slane %v9614_v14, 2  ;;  %v2070_v18 = vrot.slane %v9660_v62, 3  ;;  %v2071_v11 = vrot.slane %v9677_v2, 3 }
 0x13b   : > { %8034 = vmatpush3.msra.mxu1 %v6331_v1  ;;  %7988 = vmatpush3.msra.mxu0 %v6316_v60  ;;  %v1895_v1 = vrot.slane %v9591_v9, 2  ;;  %v9840_v60 = vsel %vm2045_vm3, %v2062_v53, %v2063_v30  ;;  %v1903_v53 = vrot.slane %v9638_v8, 2  ;;  %v6373_v30 = vld [vmem:[%s12365_s3 + $0x2d0] sm:$0xff] }
 0x13c   : > { %8036 = vmatmul.mubr.f32.vlgmr.msra.gmra.mxu1 %v9800_v27  ;;  %8091 = vmatprep.subr.mxu1 %v6378_v16  ;;  %v9863_v29 = vsel %vm1882_vm4, %v1899_v49, %v1900_v26  ;;  %v6372_v26 = vld [vmem:[%s12365_s3 + $0x2c8] sm:$0xff] }
 0x13d   : > { %7989 = vmatprep.subr.mxu0 %v6315_v38  ;;  %8038 = vmatprep.mubr.f32.mxu1 %v9804_v34  ;;  %v9853_v39 = vsel %vm1882_vm4, %v1895_v1, %v1896_v48  ;;  %v1907_v1 = vrot.slane %v9660_v62, 2  ;;  %v6358_v48 = vld [vmem:[%s12365_s3 + $0x258] sm:$0xff] }
 0x13e   : > { %8092 = vmatpush3.msra.mxu1 %v6378_v16  ;;  %7990 = vmatpush3.msra.mxu0 %v6315_v38  ;;  %v2066_v16 = vrot.slane %v9638_v8, 3  ;;  %v6360_v38 = vld [vmem:[%s12365_s3 + $0x268] sm:$0xff] }
 0x13f   : > { %8093 = vmatprep.subr.mxu1 %v6377_v35  ;;  %7992 = vmatmul.mubr.f32.vlgmr.msra.gmra.mxu0 %v9817_v59 }
 0x140   : > { %8047 = vmatprep.subr.mxu0 %v6362_v43  ;;  %8094 = vmatpush3.msra.mxu1 %v6377_v35  ;;  %v2067_v35 = vrot.slane %v9645_v5, 3 }
 0x141   : > { %7994 = vmatprep.mubr.f32.mxu0 %v9827_v13  ;;  %8039 = vmatmul.mubr.f32.gmra.mxu1 %v9830_v61 }
 0x142   : > { %8048 = vmatpush3.msra.mxu0 %v6362_v43  ;;  %8095 = vmatprep.subr.mxu1 %v6376_v54  ;;  %v9866_v43 = vsel %vm2045_vm3, %v2066_v16, %v2067_v35  ;;  %v1908_v16 = vrot.slane %v9677_v2, 2 }
 0x143   : > { %8041 = vmatprep.mubr.f32.mxu1 %v9840_v60  ;;  %8049 = vmatprep.subr.mxu0 %v6361_v55 }
 0x144   : > { %8096 = vmatpush3.msra.mxu1 %v6376_v54  ;;  %8050 = vmatpush3.msra.mxu0 %v6361_v55  ;;  %v9876_v54 = vsel %vm2045_vm3, %v2070_v18, %v2071_v11  ;;  %v1904_v55 = vrot.slane %v9645_v5, 2  ;;  %v9898_v35 = vsel %vm1882_vm4, %v1907_v1, %v1908_v16  ;;  %v1911_v11 = vrot.slane %v9698_v36, 2  ;;  %v6370_v1 = vld [vmem:[%s12365_s3 + $0x2b8] sm:$0xff]  ;;  %v6368_v16 = vld [vmem:[%s12365_s3 + $0x2a8] sm:$0xff] }
 0x145   : > { %8097 = vmatprep.subr.mxu1 %v6375_v33  ;;  %7995 = vmatmul.mubr.f32.gmra.mxu0 %v9853_v39 }
 0x146   : > { %8051 = vmatprep.subr.mxu0 %v6360_v38  ;;  %8098 = vmatpush3.msra.mxu1 %v6375_v33  ;;  %v2074_v33 = vrot.slane %v9698_v36, 3  ;;  %v9889_v49 = vsel %vm1882_vm4, %v1903_v53, %v1904_v55  ;;  %v1912_v53 = vrot.slane %v9712_v10, 2 }
 0x147   : > { %7997 = vmatprep.mubr.f32.mxu0 %v9863_v29  ;;  %8042 = vmatmul.mubr.f32.gmra.mxu1 %v9866_v43 }
 0x148   : > { %8052 = vmatpush3.msra.mxu0 %v6360_v38  ;;  %8099 = vmatprep.subr.mxu1 %v6374_v28  ;;  %v2075_v38 = vrot.slane %v9712_v10, 3  ;;  %v9918_v55 = vsel %vm1882_vm4, %v1911_v11, %v1912_v53  ;;  %v6351_v11 = vld [vmem:[%s12365_s3 + $0x220] sm:$0xff]  ;;  %v6350_v53 = vld [vmem:[%s12365_s3 + $0x218] sm:$0xff] }
 0x149   : > { %8044 = vmatprep.mubr.f32.mxu1 %v9876_v54  ;;  %8053 = vmatprep.subr.mxu0 %v6359_v56 }
 0x14a   : > { %8100 = vmatpush3.msra.mxu1 %v6374_v28  ;;  %8054 = vmatpush3.msra.mxu0 %v6359_v56  ;;  %v9901_v18 = vsel %vm2045_vm3, %v2074_v33, %v2075_v38  ;;  %v6357_v28 = vld [vmem:[%s12365_s3 + $0x250] sm:$0xff]  ;;  %v6371_v56 = vld [vmem:[%s12365_s3 + $0x2c0] sm:$0xff] }
 0x14b   : > { %8101 = vmatprep.subr.mxu1 %v6373_v30  ;;  %7998 = vmatmul.mubr.f32.gmra.mxu0 %v9889_v49  ;;  %v6355_v33 = vld [vmem:[%s12365_s3 + $0x240] sm:$0xff] }
 0x14c   : > { %8055 = vmatprep.subr.mxu0 %v6358_v48  ;;  %8102 = vmatpush3.msra.mxu1 %v6373_v30  ;;  %v6356_v30 = vld [vmem:[%s12365_s3 + $0x248] sm:$0xff]  ;;  %v6367_v38 = vld [vmem:[%s12365_s3 + $0x2a0] sm:$0xff] }
 0x14d   : > { %8000 = vmatprep.mubr.f32.mxu0 %v9898_v35  ;;  %8045 = vmatmul.mubr.f32.gmra.mxu1 %v9901_v18 }
 0x14e   : > { %8056 = vmatpush3.msra.mxu0 %v6358_v48  ;;  %8103 = vmatprep.subr.mxu1 %v6372_v26  ;;  %v6354_v48 = vld [vmem:[%s12365_s3 + $0x238] sm:$0xff] }
 0x14f   : > { %8057 = vmatprep.subr.mxu0 %v6357_v28  ;;  %8104 = vmatpush3.msra.mxu1 %v6372_v26  ;;  %v6352_v26 = vld [vmem:[%s12365_s3 + $0x228] sm:$0xff] }
 0x150   : > { %8123 = vmatprep.mubr.f32.mxu1 %v9543_v6  ;;  %8058 = vmatpush3.msra.mxu0 %v6357_v28  ;;  %v6369_v6 = vld [vmem:[%s12365_s3 + $0x2b0] sm:$0xff]  ;;  %v6366_v28 = vld [vmem:[%s12365_s3 + $0x298] sm:$0xff] }
 0x151   : > { %8105 = vmatprep.subr.mxu1 %v6371_v56  ;;  %8001 = vmatmul.mubr.f32.gmra.mxu0 %v9918_v55 }
 0x152   : > { %8059 = vmatprep.subr.mxu0 %v6356_v30  ;;  %8106 = vmatpush3.msra.mxu1 %v6371_v56  ;;  %v6365_v56 = vld [vmem:[%s12365_s3 + $0x290] sm:$0xff] }
 0x153   : > { %8060 = vmatpush3.msra.mxu0 %v6356_v30  ;;  %8079 = vmatprep.mubr.f32.mxu0 %v9762_v44  ;;  %v6353_v44 = vld [vmem:[%s12365_s3 + $0x230] sm:$0xff]  ;;  %v6364_v30 = vld [vmem:[%s12365_s3 + $0x288] sm:$0xff] }
 0x154   : > { %8107 = vmatprep.subr.mxu1 %v6370_v1  ;;  %8061 = vmatprep.subr.mxu0 %v6355_v33 }
 0x155   : > { %8108 = vmatpush3.msra.mxu1 %v6370_v1  ;;  %8062 = vmatpush3.msra.mxu0 %v6355_v33  ;;  %v6349_v1 = vld [vmem:[%s12365_s3 + $0x210] sm:$0xff]  ;;  %v6363_v33 = vld [vmem:[%s12365_s3 + $0x280] sm:$0xff] }
 0x156   : > { %8109 = vmatprep.subr.mxu1 %v6369_v6  ;;  %8063 = vmatprep.subr.mxu0 %v6354_v48 }
 0x157   : > { %8110 = vmatpush3.msra.mxu1 %v6369_v6  ;;  %8064 = vmatpush3.msra.mxu0 %v6354_v48  ;;  %v6348_v6 = vld [vmem:[%s12365_s3 + $0x208] sm:$0xff]  ;;  %v6410_v48 = vld [vmem:[%s12365_s3 + $0x3f8] sm:$0xff] }
 0x158   : > { %8111 = vmatprep.subr.mxu1 %v6368_v16  ;;  %8065 = vmatprep.subr.mxu0 %v6353_v44 }
 0x159   : > { %8112 = vmatpush3.msra.mxu1 %v6368_v16  ;;  %8066 = vmatpush3.msra.mxu0 %v6353_v44  ;;  %v6347_v16 = vld [vmem:[%s12365_s3 + $0x200] sm:$0xff]  ;;  %v6409_v44 = vld [vmem:[%s12365_s3 + $0x3f0] sm:$0xff] }
 0x15a   : > { %8113 = vmatprep.subr.mxu1 %v6367_v38  ;;  %8067 = vmatprep.subr.mxu0 %v6352_v26 }
 0x15b   : > { %8114 = vmatpush3.msra.mxu1 %v6367_v38  ;;  %8068 = vmatpush3.msra.mxu0 %v6352_v26  ;;  %v2217_v38 = vrot.slane %v9564_v0, 4  ;;  %v915_v26 = vmax.f32 %v9479_v41, %v9481_v42  ;;  %v6408_v41 = vld [vmem:[%s12365_s3 + $0x3e8] sm:$0xff] }
 0x15c   : > { %8115 = vmatprep.subr.mxu1 %v6366_v28  ;;  %8069 = vmatprep.subr.mxu0 %v6351_v11 }
 0x15d   : > { %8116 = vmatpush3.msra.mxu1 %v6366_v28  ;;  %8070 = vmatpush3.msra.mxu0 %v6351_v11  ;;  %v6394_v28 = vld [vmem:[%s12365_s3 + $0x378] sm:$0xff]  ;;  %v2218_v11 = vrot.slane %v9556_v12, 4  ;;  %v2221_v12 = vrot.slane %v9591_v9, 4 }
 0x15e   : > { %8117 = vmatprep.subr.mxu1 %v6365_v56  ;;  %8071 = vmatprep.subr.mxu0 %v6350_v53 }
 0x15f   : > { %8118 = vmatpush3.msra.mxu1 %v6365_v56  ;;  %8072 = vmatpush3.msra.mxu0 %v6350_v53  ;;  %v1221_v56 = vmax.f32 %v915_v26, %v9672_v45  ;;  %v9994_v42 = vsel %vm2208_vm2, %v2217_v38, %v2218_v11  ;;  %v6393_v53 = vld [vmem:[%s12365_s3 + $0x370] sm:$0xff]  ;;  %v6407_v45 = vld [vmem:[%s12365_s3 + $0x3e0] sm:$0xff]  ;;  %v2229_v38 = vrot.slane %v9638_v8, 4  ;;  %v2233_v11 = vrot.slane %v9660_v62, 4 }
 0x160   : > { %8119 = vmatprep.subr.mxu1 %v6364_v30  ;;  %8073 = vmatprep.subr.mxu0 %v6349_v1  ;;  %v6405_v26 = vld [vmem:[%s12365_s3 + $0x3d0] sm:$0xff] }
 0x161   : > { %8120 = vmatpush3.msra.mxu1 %v6364_v30  ;;  %8074 = vmatpush3.msra.mxu0 %v6349_v1  ;;  %v2222_v30 = vrot.slane %v9582_v40, 4  ;;  %v2225_v1 = vrot.slane %v9616_v24, 4  ;;  %v6406_v40 = vld [vmem:[%s12365_s3 + $0x3d8] sm:$0xff] }
 0x162   : > { %8121 = vmatprep.subr.mxu1 %v6363_v33  ;;  %8075 = vmatprep.subr.mxu0 %v6348_v6 }
 0x163   : > { %8122 = vmatpush3.msra.mxu1 %v6363_v33  ;;  %8076 = vmatpush3.msra.mxu0 %v6348_v6  ;;  %v1527_v33 = vmax.f32 %v1221_v56, %v9675_v57  ;;  %v6392_v6 = vld [vmem:[%s12365_s3 + $0x368] sm:$0xff] }
 0x164   : > { %8124 = vmatmul.mubr.f32.vlgmr.msra.gmra.mxu1 %v9564_v0  ;;  %8179 = vmatprep.subr.mxu1 %v6410_v48 }
 0x165   : > { %8077 = vmatprep.subr.mxu0 %v6347_v16  ;;  %8126 = vmatprep.mubr.f32.mxu1 %v9591_v9 }
 0x166   : > { %8180 = vmatpush3.msra.mxu1 %v6410_v48  ;;  %8078 = vmatpush3.msra.mxu0 %v6347_v16  ;;  %v10013_v48 = vsel %vm2208_vm2, %v2221_v12, %v2222_v30  ;;  %v2226_v16 = vrot.slane %v9614_v14, 4  ;;  %v1558_v14 = vadd.f32 %v9516_v63, %v1527_v33  ;;  %v6390_v63 = vld [vmem:[%s12365_s3 + $0x358] sm:$0xff]  ;;  %v6403_v30 = vld [vmem:[%s12365_s3 + $0x3c0] sm:$0xff]  ;;  %v6388_v33 = vld [vmem:[%s12365_s3 + $0x348] sm:$0xff] }
 0x167   : > { %8181 = vmatprep.subr.mxu1 %v6409_v44  ;;  %8080 = vmatmul.mubr.f32.vlgmr.msra.gmra.mxu0 %v9787_v25 }
 0x168   : > { %8135 = vmatprep.subr.mxu0 %v6394_v28  ;;  %8182 = vmatpush3.msra.mxu1 %v6409_v44  ;;  %v10021_v57 = vsel %vm2208_vm2, %v2225_v1, %v2226_v16  ;;  %v6391_v44 = vld [vmem:[%s12365_s3 + $0x360] sm:$0xff]  ;;  %v2238_v1 = vrot.slane %v9712_v10, 4  ;;  %v6402_v16 = vld [vmem:[%s12365_s3 + $0x3b8] sm:$0xff] }
 0x169   : > { %8082 = vmatprep.mubr.f32.mxu0 %v9994_v42  ;;  %8127 = vmatmul.mubr.f32.gmra.mxu1 %v9616_v24  ;;  %v6387_v10 = vld [vmem:[%s12365_s3 + $0x340] sm:$0xff] }
 0x16a   : > { %8136 = vmatpush3.msra.mxu0 %v6394_v28  ;;  %8183 = vmatprep.subr.mxu1 %v6408_v41  ;;  %v2230_v28 = vrot.slane %v9645_v5, 4  ;;  %v6404_v5 = vld [vmem:[%s12365_s3 + $0x3c8] sm:$0xff] }
 0x16b   : > { %8129 = vmatprep.mubr.f32.mxu1 %v9638_v8  ;;  %8137 = vmatprep.subr.mxu0 %v6393_v53 }
 0x16c   : > { %8184 = vmatpush3.msra.mxu1 %v6408_v41  ;;  %8138 = vmatpush3.msra.mxu0 %v6393_v53  ;;  %v10040_v56 = vsel %vm2208_vm2, %v2229_v38, %v2230_v28  ;;  %v2234_v41 = vrot.slane %v9677_v2, 4  ;;  %v10043_v53 = vmax.f32 %v1558_v14, 0.0  ;;  %v2237_v2 = vrot.slane %v9698_v36, 4  ;;  %v6399_v38 = vld [vmem:[%s12365_s3 + $0x3a0] sm:$0xff]  ;;  %v6384_v14 = vld [vmem:[%s12365_s3 + $0x328] sm:$0xff] }
 0x16d   : > { %8185 = vmatprep.subr.mxu1 %v6407_v45  ;;  %8083 = vmatmul.mubr.f32.gmra.mxu0 %v10013_v48  ;;  %v6383_v28 = vld [vmem:[%s12365_s3 + $0x320] sm:$0xff] }
 0x16e   : > { %8139 = vmatprep.subr.mxu0 %v6392_v6  ;;  %8186 = vmatpush3.msra.mxu1 %v6407_v45  ;;  %v10050_v12 = vsel %vm2208_vm2, %v2233_v11, %v2234_v41  ;;  %v6389_v45 = vld [vmem:[%s12365_s3 + $0x350] sm:$0xff]  ;;  %v6396_v41 = vld [vmem:[%s12365_s3 + $0x388] sm:$0xff] }
 0x16f   : > { %8085 = vmatprep.mubr.f32.mxu0 %v10021_v57  ;;  %8130 = vmatmul.mubr.f32.gmra.mxu1 %v9660_v62  ;;  %v6397_v11 = vld [vmem:[%s12365_s3 + $0x390] sm:$0xff] }
 0x170   : > { %8140 = vmatpush3.msra.mxu0 %v6392_v6  ;;  %8187 = vmatprep.subr.mxu1 %v6406_v40  ;;  %v10067_v6 = vsel %vm2208_vm2, %v2237_v2, %v2238_v1  ;;  %v6380_v2 = vld [vmem:[%s12365_s3 + $0x308] sm:$0xff]  ;;  %v6379_v1 = vld [vmem:[%s12365_s3 + $0x300] sm:$0xff] }
 0x171   : > { %8132 = vmatprep.mubr.f32.mxu1 %v9698_v36  ;;  %8141 = vmatprep.subr.mxu0 %v6391_v44 }
 0x172   : > { %8188 = vmatpush3.msra.mxu1 %v6406_v40  ;;  %8142 = vmatpush3.msra.mxu0 %v6391_v44  ;;  %v6386_v40 = vld [vmem:[%s12365_s3 + $0x338] sm:$0xff]  ;;  %v6400_v44 = vld [vmem:[%s12365_s3 + $0x3a8] sm:$0xff] }
 0x173   : > { %8189 = vmatprep.subr.mxu1 %v6405_v26  ;;  %8086 = vmatmul.mubr.f32.gmra.mxu0 %v10040_v56 }
 0x174   : > { %8143 = vmatprep.subr.mxu0 %v6390_v63  ;;  %8190 = vmatpush3.msra.mxu1 %v6405_v26  ;;  %v6398_v26 = vld [vmem:[%s12365_s3 + $0x398] sm:$0xff] }
 0x175   : > { %8088 = vmatprep.mubr.f32.mxu0 %v10050_v12  ;;  %8133 = vmatmul.mubr.f32.gmra.mxu1 %v10043_v53 }
 0x176   : > { %8144 = vmatpush3.msra.mxu0 %v6390_v63  ;;  %8191 = vmatprep.subr.mxu1 %v6404_v5  ;;  %v6382_v63 = vld [vmem:[%s12365_s3 + $0x318] sm:$0xff] }
 0x177   : > { %8145 = vmatprep.subr.mxu0 %v6389_v45  ;;  %8192 = vmatpush3.msra.mxu1 %v6404_v5  ;;  %v6381_v5 = vld [vmem:[%s12365_s3 + $0x310] sm:$0xff] }
 0x178   : > { %8211 = vmatprep.mubr.f32.mxu1 %v9817_v59  ;;  %8146 = vmatpush3.msra.mxu0 %v6389_v45  ;;  %v6401_v59 = vld [vmem:[%s12365_s3 + $0x3b0] sm:$0xff]  ;;  %v6395_v45 = vld [vmem:[%s12365_s3 + $0x380] sm:$0xff] }
 0x179   : > { %8193 = vmatprep.subr.mxu1 %v6403_v30  ;;  %8089 = vmatmul.mubr.f32.gmra.mxu0 %v10067_v6 }
 0x17a   : > { %8147 = vmatprep.subr.mxu0 %v6388_v33  ;;  %8194 = vmatpush3.msra.mxu1 %v6403_v30  ;;  %v6442_v30 = vld [vmem:[%s12365_s3 + $0x4f8] sm:$0xff] }
 0x17b   : > { %8148 = vmatpush3.msra.mxu0 %v6388_v33  ;;  %8167 = vmatprep.mubr.f32.mxu0 %v9570_v15  ;;  %v6385_v15 = vld [vmem:[%s12365_s3 + $0x330] sm:$0xff] }
 0x17c   : > { %8195 = vmatprep.subr.mxu1 %v6402_v16  ;;  %8149 = vmatprep.subr.mxu0 %v6387_v10  ;;  %v6441_v33 = vld [vmem:[%s12365_s3 + $0x4f0] sm:$0xff] }
 0x17d   : > { %8196 = vmatpush3.msra.mxu1 %v6402_v16  ;;  %8150 = vmatpush3.msra.mxu0 %v6387_v10  ;;  %v6426_v16 = vld [vmem:[%s12365_s3 + $0x478] sm:$0xff]  ;;  %v6440_v10 = vld [vmem:[%s12365_s3 + $0x4e8] sm:$0xff] }
 0x17e   : > { %8197 = vmatprep.subr.mxu1 %v6401_v59  ;;  %8151 = vmatprep.subr.mxu0 %v6386_v40 }
 0x17f   : > { %8198 = vmatpush3.msra.mxu1 %v6401_v59  ;;  %8152 = vmatpush3.msra.mxu0 %v6386_v40  ;;  %v6425_v59 = vld [vmem:[%s12365_s3 + $0x470] sm:$0xff]  ;;  %v6439_v40 = vld [vmem:[%s12365_s3 + $0x4e0] sm:$0xff] }
 0x180   : > { %8199 = vmatprep.subr.mxu1 %v6400_v44  ;;  %8153 = vmatprep.subr.mxu0 %v6385_v15 }
 0x181   : > { %8200 = vmatpush3.msra.mxu1 %v6400_v44  ;;  %8154 = vmatpush3.msra.mxu0 %v6385_v15  ;;  %v6424_v44 = vld [vmem:[%s12365_s3 + $0x468] sm:$0xff]  ;;  %v6438_v15 = vld [vmem:[%s12365_s3 + $0x4d8] sm:$0xff] }
 0x182   : > { %8201 = vmatprep.subr.mxu1 %v6399_v38  ;;  %8155 = vmatprep.subr.mxu0 %v6384_v14 }
 0x183   : > { %8202 = vmatpush3.msra.mxu1 %v6399_v38  ;;  %8156 = vmatpush3.msra.mxu0 %v6384_v14  ;;  %v10154_v38 = vmax.f32 %v9692_v19, 0.0  ;;  %v6423_v14 = vld [vmem:[%s12365_s3 + $0x460] sm:$0xff]  ;;  %v6422_v19 = vld [vmem:[%s12365_s3 + $0x458] sm:$0xff] }
 0x184   : > { %8203 = vmatprep.subr.mxu1 %v6398_v26  ;;  %8157 = vmatprep.subr.mxu0 %v6383_v28 }
 0x185   : > { %8204 = vmatpush3.msra.mxu1 %v6398_v26  ;;  %8158 = vmatpush3.msra.mxu0 %v6383_v28  ;;  %v6437_v26 = vld [vmem:[%s12365_s3 + $0x4d0] sm:$0xff]  ;;  %v2637_v28 = vrot.slane %v10043_v53, 2 }
 0x186   : > { %8205 = vmatprep.subr.mxu1 %v6397_v11  ;;  %8159 = vmatprep.subr.mxu0 %v6382_v63 }
 0x187   : > { %8206 = vmatpush3.msra.mxu1 %v6397_v11  ;;  %8160 = vmatpush3.msra.mxu0 %v6382_v63  ;;  %v2638_v11 = vrot.slane %v10154_v38, 2  ;;  %v6436_v63 = vld [vmem:[%s12365_s3 + $0x4c8] sm:$0xff] }
 0x188   : > { %8207 = vmatprep.subr.mxu1 %v6396_v41  ;;  %8161 = vmatprep.subr.mxu0 %v6381_v5 }
 0x189   : > { %8208 = vmatpush3.msra.mxu1 %v6396_v41  ;;  %8162 = vmatpush3.msra.mxu0 %v6381_v5  ;;  %v10175_v41 = vsel %vm1882_vm4, %v2637_v28, %v2638_v11  ;;  %v6421_v5 = vld [vmem:[%s12365_s3 + $0x450] sm:$0xff]  ;;  %v6428_v11 = vld [vmem:[%s12365_s3 + $0x488] sm:$0xff] }
 0x18a   : > { %8209 = vmatprep.subr.mxu1 %v6395_v45  ;;  %8163 = vmatprep.subr.mxu0 %v6380_v2  ;;  %v6429_v28 = vld [vmem:[%s12365_s3 + $0x490] sm:$0xff] }
 0x18b   : > { %8210 = vmatpush3.msra.mxu1 %v6395_v45  ;;  %8164 = vmatpush3.msra.mxu0 %v6380_v2  ;;  %v2503_v45 = vrot.slane %v10043_v53, 1  ;;  %v6435_v2 = vld [vmem:[%s12365_s3 + $0x4c0] sm:$0xff] }
 0x18c   : > { %8212 = vmatmul.mubr.f32.vlgmr.msra.gmra.mxu1 %v9827_v13  ;;  %8267 = vmatprep.subr.mxu1 %v6442_v30 }
 0x18d   : > { %8165 = vmatprep.subr.mxu0 %v6379_v1  ;;  %8214 = vmatprep.mubr.f32.mxu1 %v9853_v39 }
 0x18e   : > { %8268 = vmatpush3.msra.mxu1 %v6442_v30  ;;  %8166 = vmatpush3.msra.mxu0 %v6379_v1  ;;  %v2504_v30 = vrot.slane %v10154_v38, 1  ;;  %v6420_v1 = vld [vmem:[%s12365_s3 + $0x448] sm:$0xff] }
 0x18f   : > { %8269 = vmatprep.subr.mxu1 %v6441_v33  ;;  %8168 = vmatmul.mubr.f32.vlgmr.msra.gmra.mxu0 %v9597_v58 }
 0x190   : > { %8223 = vmatprep.subr.mxu0 %v6426_v16  ;;  %8270 = vmatpush3.msra.mxu1 %v6441_v33  ;;  %v10192_v33 = vsel %vm1608_vm1, %v2503_v45, %v2504_v30  ;;  %v6412_v45 = vld [vmem:[%s12365_s3 + $0x408] sm:$0xff]  ;;  %v6411_v30 = vld [vmem:[%s12365_s3 + $0x400] sm:$0xff] }
 0x191   : > { %8170 = vmatprep.mubr.f32.mxu0 %v9626_v17  ;;  %8215 = vmatmul.mubr.f32.gmra.mxu1 %v9863_v29 }
 0x192   : > { %8224 = vmatpush3.msra.mxu0 %v6426_v16  ;;  %8271 = vmatprep.subr.mxu1 %v6440_v10  ;;  %v6434_v16 = vld [vmem:[%s12365_s3 + $0x4b8] sm:$0xff] }
 0x193   : > { %8217 = vmatprep.mubr.f32.mxu1 %v9889_v49  ;;  %8225 = vmatprep.subr.mxu0 %v6425_v59 }
 0x194   : > { %8272 = vmatpush3.msra.mxu1 %v6440_v10  ;;  %8226 = vmatpush3.msra.mxu0 %v6425_v59  ;;  %v6419_v10 = vld [vmem:[%s12365_s3 + $0x440] sm:$0xff]  ;;  %v6418_v59 = vld [vmem:[%s12365_s3 + $0x438] sm:$0xff] }
 0x195   : > { %8273 = vmatprep.subr.mxu1 %v6439_v40  ;;  %8171 = vmatmul.mubr.f32.gmra.mxu0 %v9654_v22 }
 0x196   : > { %8227 = vmatprep.subr.mxu0 %v6424_v44  ;;  %8274 = vmatpush3.msra.mxu1 %v6439_v40  ;;  %v6432_v40 = vld [vmem:[%s12365_s3 + $0x4a8] sm:$0xff] }
 0x197   : > { %8173 = vmatprep.mubr.f32.mxu0 %v9686_v4  ;;  %8218 = vmatmul.mubr.f32.gmra.mxu1 %v9898_v35 }
 0x198   : > { %8228 = vmatpush3.msra.mxu0 %v6424_v44  ;;  %8275 = vmatprep.subr.mxu1 %v6438_v15  ;;  %v6431_v44 = vld [vmem:[%s12365_s3 + $0x4a0] sm:$0xff] }
 0x199   : > { %8220 = vmatprep.mubr.f32.mxu1 %v9918_v55  ;;  %8229 = vmatprep.subr.mxu0 %v6423_v14 }
 0x19a   : > { %8276 = vmatpush3.msra.mxu1 %v6438_v15  ;;  %8230 = vmatpush3.msra.mxu0 %v6423_v14  ;;  %v6416_v15 = vld [vmem:[%s12365_s3 + $0x428] sm:$0xff]  ;;  %v6430_v14 = vld [vmem:[%s12365_s3 + $0x498] sm:$0xff] }
 0x19b   : > { %8277 = vmatprep.subr.mxu1 %v6437_v26  ;;  %8174 = vmatmul.mubr.f32.gmra.mxu0 %v9722_v23 }
 0x19c   : > { %8231 = vmatprep.subr.mxu0 %v6422_v19  ;;  %8278 = vmatpush3.msra.mxu1 %v6437_v26  ;;  %v6415_v26 = vld [vmem:[%s12365_s3 + $0x420] sm:$0xff] }
 0x19d   : > { %8176 = vmatprep.mubr.f32.mxu0 %v9758_v37  ;;  %8221 = vmatmul.mubr.f32.gmra.mxu1 %v10175_v41 }
 0x19e   : > { %8232 = vmatpush3.msra.mxu0 %v6422_v19  ;;  %8279 = vmatprep.subr.mxu1 %v6436_v63  ;;  %v6414_v19 = vld [vmem:[%s12365_s3 + $0x418] sm:$0xff] }
 0x19f   : > { %8233 = vmatprep.subr.mxu0 %v6421_v5  ;;  %8280 = vmatpush3.msra.mxu1 %v6436_v63  ;;  %v6413_v63 = vld [vmem:[%s12365_s3 + $0x410] sm:$0xff] }
 0x1a0   : > { %8299 = vmatprep.mubr.f32.mxu1 %v9787_v25  ;;  %8234 = vmatpush3.msra.mxu0 %v6421_v5  ;;  %v6433_v25 = vld [vmem:[%s12365_s3 + $0x4b0] sm:$0xff]  ;;  %v6427_v5 = vld [vmem:[%s12365_s3 + $0x480] sm:$0xff] }
 0x1a1   : > { %8281 = vmatprep.subr.mxu1 %v6435_v2  ;;  %8177 = vmatmul.mubr.f32.gmra.mxu0 %v10192_v33 }
 0x1a2   : > { %8235 = vmatprep.subr.mxu0 %v6420_v1  ;;  %8282 = vmatpush3.msra.mxu1 %v6435_v2  ;;  %v6474_v2 = vld [vmem:[%s12365_s3 + $0x5f8] sm:$0xff] }
 0x1a3   : > { %8236 = vmatpush3.msra.mxu0 %v6420_v1  ;;  %8255 = vmatprep.mubr.f32.mxu0 %v9800_v27  ;;  %v6417_v27 = vld [vmem:[%s12365_s3 + $0x430] sm:$0xff] }
 0x1a4   : > { %8283 = vmatprep.subr.mxu1 %v6434_v16  ;;  %8237 = vmatprep.subr.mxu0 %v6419_v10  ;;  %v6473_v1 = vld [vmem:[%s12365_s3 + $0x5f0] sm:$0xff] }
 0x1a5   : > { %8284 = vmatpush3.msra.mxu1 %v6434_v16  ;;  %8238 = vmatpush3.msra.mxu0 %v6419_v10  ;;  %v6458_v16 = vld [vmem:[%s12365_s3 + $0x578] sm:$0xff]  ;;  %v6472_v10 = vld [vmem:[%s12365_s3 + $0x5e8] sm:$0xff] }
 0x1a6   : > { %8285 = vmatprep.subr.mxu1 %v6433_v25  ;;  %8239 = vmatprep.subr.mxu0 %v6418_v59 }
 0x1a7   : > { %8286 = vmatpush3.msra.mxu1 %v6433_v25  ;;  %8240 = vmatpush3.msra.mxu0 %v6418_v59  ;;  %v6457_v25 = vld [vmem:[%s12365_s3 + $0x570] sm:$0xff]  ;;  %v6471_v59 = vld [vmem:[%s12365_s3 + $0x5e0] sm:$0xff] }
 0x1a8   : > { %8287 = vmatprep.subr.mxu1 %v6432_v40  ;;  %8241 = vmatprep.subr.mxu0 %v6417_v27 }
 0x1a9   : > { %8288 = vmatpush3.msra.mxu1 %v6432_v40  ;;  %8242 = vmatpush3.msra.mxu0 %v6417_v27  ;;  %v6456_v40 = vld [vmem:[%s12365_s3 + $0x568] sm:$0xff]  ;;  %v6470_v27 = vld [vmem:[%s12365_s3 + $0x5d8] sm:$0xff] }
 0x1aa   : > { %8289 = vmatprep.subr.mxu1 %v6431_v44  ;;  %8243 = vmatprep.subr.mxu0 %v6416_v15 }
 0x1ab   : > { %8290 = vmatpush3.msra.mxu1 %v6431_v44  ;;  %8244 = vmatpush3.msra.mxu0 %v6416_v15  ;;  %v6455_v44 = vld [vmem:[%s12365_s3 + $0x560] sm:$0xff]  ;;  %v6469_v15 = vld [vmem:[%s12365_s3 + $0x5d0] sm:$0xff] }
 0x1ac   : > { %8291 = vmatprep.subr.mxu1 %v6430_v14  ;;  %8245 = vmatprep.subr.mxu0 %v6415_v26 }
 0x1ad   : > { %8292 = vmatpush3.msra.mxu1 %v6430_v14  ;;  %8246 = vmatpush3.msra.mxu0 %v6415_v26  ;;  %v2905_v14 = vrot.slane %v10043_v53, 4  ;;  %v6454_v26 = vld [vmem:[%s12365_s3 + $0x558] sm:$0xff] }
 0x1ae   : > { %8293 = vmatprep.subr.mxu1 %v6429_v28  ;;  %8247 = vmatprep.subr.mxu0 %v6414_v19 }
 0x1af   : > { %8294 = vmatpush3.msra.mxu1 %v6429_v28  ;;  %8248 = vmatpush3.msra.mxu0 %v6414_v19  ;;  %v2906_v28 = vrot.slane %v10154_v38, 4  ;;  %v6468_v19 = vld [vmem:[%s12365_s3 + $0x5c8] sm:$0xff] }
 0x1b0   : > { %8295 = vmatprep.subr.mxu1 %v6428_v11  ;;  %8249 = vmatprep.subr.mxu0 %v6413_v63 }
 0x1b1   : > { %8296 = vmatpush3.msra.mxu1 %v6428_v11  ;;  %8250 = vmatpush3.msra.mxu0 %v6413_v63  ;;  %v10297_v11 = vsel %vm2208_vm2, %v2905_v14, %v2906_v28  ;;  %v6453_v63 = vld [vmem:[%s12365_s3 + $0x550] sm:$0xff]  ;;  %v6446_v14 = vld [vmem:[%s12365_s3 + $0x518] sm:$0xff]  ;;  %v6460_v28 = vld [vmem:[%s12365_s3 + $0x588] sm:$0xff] }
 0x1b2   : > { %8297 = vmatprep.subr.mxu1 %v6427_v5  ;;  %8251 = vmatprep.subr.mxu0 %v6412_v45 }
 0x1b3   : > { %8298 = vmatpush3.msra.mxu1 %v6427_v5  ;;  %8252 = vmatpush3.msra.mxu0 %v6412_v45  ;;  %v2771_v5 = vrot.slane %v10043_v53, 3  ;;  %v6467_v45 = vld [vmem:[%s12365_s3 + $0x5c0] sm:$0xff] }
 0x1b4   : > { %8300 = vmatmul.mubr.f32.vlgmr.msra.gmra.mxu1 %v9994_v42  ;;  %8355 = vmatprep.subr.mxu1 %v6474_v2 }
 0x1b5   : > { %8253 = vmatprep.subr.mxu0 %v6411_v30  ;;  %8302 = vmatprep.mubr.f32.mxu1 %v10013_v48 }
 0x1b6   : > { %8356 = vmatpush3.msra.mxu1 %v6474_v2  ;;  %8254 = vmatpush3.msra.mxu0 %v6411_v30  ;;  %v2772_v2 = vrot.slane %v10154_v38, 3  ;;  %v6452_v30 = vld [vmem:[%s12365_s3 + $0x548] sm:$0xff]  ;;  %v6451_v38 = vld [vmem:[%s12365_s3 + $0x540] sm:$0xff] }
 0x1b7   : > { %8357 = vmatprep.subr.mxu1 %v6473_v1  ;;  %8256 = vmatmul.mubr.f32.vlgmr.msra.gmra.mxu0 %v9804_v34 }
 0x1b8   : > { %8311 = vmatprep.subr.mxu0 %v6458_v16  ;;  %8358 = vmatpush3.msra.mxu1 %v6473_v1  ;;  %v10314_v1 = vsel %vm2045_vm3, %v2771_v5, %v2772_v2  ;;  %v10364_v5 = vpop.f32.mrf.mxu0  ;;  %v6459_v2 = vld [vmem:[%s12365_s3 + $0x580] sm:$0xff] }
 0x1b9   : > { %8258 = vmatprep.mubr.f32.mxu0 %v9830_v61  ;;  %8303 = vmatmul.mubr.f32.gmra.mxu1 %v10021_v57 }
 0x1ba   : > { %8312 = vmatpush3.msra.mxu0 %v6458_v16  ;;  %8359 = vmatprep.subr.mxu1 %v6472_v10  ;;  %v6466_v16 = vld [vmem:[%s12365_s3 + $0x5b8] sm:$0xff] }
 0x1bb   : > { %8305 = vmatprep.mubr.f32.mxu1 %v10040_v56  ;;  %8313 = vmatprep.subr.mxu0 %v6457_v25 }
 0x1bc   : > { %8360 = vmatpush3.msra.mxu1 %v6472_v10  ;;  %8314 = vmatpush3.msra.mxu0 %v6457_v25  ;;  %v6450_v10 = vld [vmem:[%s12365_s3 + $0x538] sm:$0xff]  ;;  %v6464_v25 = vld [vmem:[%s12365_s3 + $0x5a8] sm:$0xff] }
 0x1bd   : > { %8361 = vmatprep.subr.mxu1 %v6471_v59  ;;  %8259 = vmatmul.mubr.f32.gmra.mxu0 %v9840_v60 }
 0x1be   : > { %8315 = vmatprep.subr.mxu0 %v6456_v40  ;;  %8362 = vmatpush3.msra.mxu1 %v6471_v59  ;;  %v6463_v59 = vld [vmem:[%s12365_s3 + $0x5a0] sm:$0xff] }
 0x1bf   : > { %8261 = vmatprep.mubr.f32.mxu0 %v9866_v43  ;;  %8306 = vmatmul.mubr.f32.gmra.mxu1 %v10050_v12 }
 0x1c0   : > { %8316 = vmatpush3.msra.mxu0 %v6456_v40  ;;  %8363 = vmatprep.subr.mxu1 %v6470_v27  ;;  %v6448_v40 = vld [vmem:[%s12365_s3 + $0x528] sm:$0xff] }
 0x1c1   : > { %8308 = vmatprep.mubr.f32.mxu1 %v10067_v6  ;;  %8317 = vmatprep.subr.mxu0 %v6455_v44 }
 0x1c2   : > { %8364 = vmatpush3.msra.mxu1 %v6470_v27  ;;  %8318 = vmatpush3.msra.mxu0 %v6455_v44  ;;  %v6462_v27 = vld [vmem:[%s12365_s3 + $0x598] sm:$0xff]  ;;  %v6447_v44 = vld [vmem:[%s12365_s3 + $0x520] sm:$0xff] }
 0x1c3   : > { %8365 = vmatprep.subr.mxu1 %v6469_v15  ;;  %8262 = vmatmul.mubr.f32.gmra.mxu0 %v9876_v54 }
 0x1c4   : > { %8319 = vmatprep.subr.mxu0 %v6454_v26  ;;  %8366 = vmatpush3.msra.mxu1 %v6469_v15  ;;  %v6461_v15 = vld [vmem:[%s12365_s3 + $0x590] sm:$0xff] }
 0x1c5   : > { %8264 = vmatprep.mubr.f32.mxu0 %v9901_v18  ;;  %8309 = vmatmul.mubr.f32.gmra.mxu1 %v10297_v11 }
 0x1c6   : > { %8320 = vmatpush3.msra.mxu0 %v6454_v26  ;;  %8367 = vmatprep.subr.mxu1 %v6468_v19  ;;  %v10354_v26 = vpop.f32.mrf.mxu1 }
 0x1c7   : > { %8321 = vmatprep.subr.mxu0 %v6453_v63  ;;  %8368 = vmatpush3.msra.mxu1 %v6468_v19  ;;  %v6445_v19 = vld [vmem:[%s12365_s3 + $0x510] sm:$0xff] }
 0x1c8   : > { %8387 = vmatprep.mubr.f32.mxu1 %v9597_v58  ;;  %8322 = vmatpush3.msra.mxu0 %v6453_v63  ;;  %v6465_v58 = vld [vmem:[%s12365_s3 + $0x5b0] sm:$0xff]  ;;  %v917_v63 = vmax.f32 %v9489_v46, %v9491_v47  ;;  %v6506_v47 = vld [vmem:[%s12365_s3 + $0x6f8] sm:$0xff] }
 0x1c9   : > { %8369 = vmatprep.subr.mxu1 %v6467_v45  ;;  %8265 = vmatmul.mubr.f32.gmra.mxu0 %v10314_v1 }
 0x1ca   : > { %8323 = vmatprep.subr.mxu0 %v6452_v30  ;;  %8370 = vmatpush3.msra.mxu1 %v6467_v45 }
 0x1cb   : > { %8324 = vmatpush3.msra.mxu0 %v6452_v30  ;;  %8343 = vmatprep.mubr.f32.mxu0 %v9564_v0  ;;  %v6449_v0 = vld [vmem:[%s12365_s3 + $0x530] sm:$0xff]  ;;  %v6444_v30 = vld [vmem:[%s12365_s3 + $0x508] sm:$0xff] }
 0x1cc   : > { %8371 = vmatprep.subr.mxu1 %v6466_v16  ;;  %8325 = vmatprep.subr.mxu0 %v6451_v38 }
 0x1cd   : > { %8372 = vmatpush3.msra.mxu1 %v6466_v16  ;;  %8326 = vmatpush3.msra.mxu0 %v6451_v38  ;;  %v1223_v16 = vmax.f32 %v917_v63, %v9703_v20  ;;  %v6488_v63 = vld [vmem:[%s12365_s3 + $0x668] sm:$0xff] }
 0x1ce   : > { %8373 = vmatprep.subr.mxu1 %v6465_v58  ;;  %8327 = vmatprep.subr.mxu0 %v6450_v10 }
 0x1cf   : > { %8374 = vmatpush3.msra.mxu1 %v6465_v58  ;;  %8328 = vmatpush3.msra.mxu0 %v6450_v10  ;;  %v6443_v58 = vld [vmem:[%s12365_s3 + $0x500] sm:$0xff] }
 0x1d0   : > { %8375 = vmatprep.subr.mxu1 %v6464_v25  ;;  %8329 = vmatprep.subr.mxu0 %v6449_v0 }
 0x1d1   : > { %8376 = vmatpush3.msra.mxu1 %v6464_v25  ;;  %8330 = vmatpush3.msra.mxu0 %v6449_v0  ;;  %v1529_v0 = vmax.f32 %v1223_v16, %v9705_v21  ;;  %v6504_v21 = vld [vmem:[%s12365_s3 + $0x6e8] sm:$0xff] }
 0x1d2   : > { %8377 = vmatprep.subr.mxu1 %v6463_v59  ;;  %8331 = vmatprep.subr.mxu0 %v6448_v40 }
 0x1d3   : > { %8378 = vmatpush3.msra.mxu1 %v6463_v59  ;;  %8332 = vmatpush3.msra.mxu0 %v6448_v40  ;;  %v6505_v59 = vld [vmem:[%s12365_s3 + $0x6f0] sm:$0xff]  ;;  %v6490_v40 = vld [vmem:[%s12365_s3 + $0x678] sm:$0xff] }
 0x1d4   : > { %8379 = vmatprep.subr.mxu1 %v6462_v27  ;;  %8333 = vmatprep.subr.mxu0 %v6447_v44  ;;  %v7949_v45 = vpop.f32.mrf.mxu1 }
 0x1d5   : > { %8380 = vmatpush3.msra.mxu1 %v6462_v27  ;;  %8334 = vmatpush3.msra.mxu0 %v6447_v44  ;;  %v10399_v27 = vld [vmem:[%s12364_s2] ss:$0 sm:$0xff] }
 0x1d6   : > { %8381 = vmatprep.subr.mxu1 %v6461_v15  ;;  %8335 = vmatprep.subr.mxu0 %v6446_v14  ;;  %v1843_v10 = vpop.f32.mrf.mxu1  ;;  %v1560_v44 = vadd.f32 %v10399_v27, %v1529_v0 }
 0x1d7   : > { %8382 = vmatpush3.msra.mxu1 %v6461_v15  ;;  %8336 = vmatpush3.msra.mxu0 %v6446_v14  ;;  %v6489_v15 = vld [vmem:[%s12365_s3 + $0x670] sm:$0xff] }
 0x1d8   : > { %8383 = vmatprep.subr.mxu1 %v6460_v28  ;;  %8337 = vmatprep.subr.mxu0 %v6445_v19  ;;  %v7905_v46 = vpop.f32.mrf.mxu0 }
 0x1d9   : > { %8384 = vmatpush3.msra.mxu1 %v6460_v28  ;;  %8338 = vmatpush3.msra.mxu0 %v6445_v19  ;;  %v10376_v38 = vadd.f32 %v7949_v45, %v7905_v46  ;;  %v6503_v28 = vld [vmem:[%s12365_s3 + $0x6e0] sm:$0xff]  ;;  %v6502_v46 = vld [vmem:[%s12365_s3 + $0x6d8] sm:$0xff] }
 0x1da   : > { %8385 = vmatprep.subr.mxu1 %v6459_v2  ;;  %8339 = vmatprep.subr.mxu0 %v6444_v30  ;;  %v1738_v25 = vpop.f32.mrf.mxu0 }
 0x1db   : > { %8386 = vmatpush3.msra.mxu1 %v6459_v2  ;;  %8340 = vmatpush3.msra.mxu0 %v6444_v30  ;;  %v10381_v20 = vadd.f32 %v1843_v10, %v1738_v25  ;;  %v10416_v2 = vmax.f32 %v1560_v44, 0.0  ;;  %v6487_v10 = vld [vmem:[%s12365_s3 + $0x660] sm:$0xff]  ;;  %v6501_v25 = vld [vmem:[%s12365_s3 + $0x6d0] sm:$0xff] }
 0x1dc   : > { %8388 = vmatmul.mubr.f32.vlgmr.msra.gmra.mxu1 %v9626_v17  ;;  %8443 = vmatprep.subr.mxu1 %v6506_v47 }
 0x1dd   : > { %8341 = vmatprep.subr.mxu0 %v6443_v58  ;;  %8390 = vmatprep.mubr.f32.mxu1 %v9654_v22  ;;  %v3171_v0 = vrot.slane %v10416_v2, 1 }
 0x1de   : > { %8444 = vmatpush3.msra.mxu1 %v6506_v47  ;;  %8342 = vmatpush3.msra.mxu0 %v6443_v58  ;;  %v7952_v14 = vpop.f32.mrf.mxu1  ;;  %v10425_v58 = vmax.f32 %v9719_v31, 0.0  ;;  %v6486_v31 = vld [vmem:[%s12365_s3 + $0x658] sm:$0xff] }
 0x1df   : > { %8445 = vmatprep.subr.mxu1 %v6505_v59  ;;  %8344 = vmatmul.mubr.f32.vlgmr.msra.gmra.mxu0 %v9591_v9 }
 0x1e0   : > { %8399 = vmatprep.subr.mxu0 %v6490_v40  ;;  %8446 = vmatpush3.msra.mxu1 %v6505_v59  ;;  %v1853_v30 = vpop.f32.mrf.mxu1  ;;  %v3172_v59 = vrot.slane %v10425_v58, 1 }
 0x1e1   : > { %8346 = vmatprep.mubr.f32.mxu0 %v9616_v24  ;;  %8391 = vmatmul.mubr.f32.gmra.mxu1 %v9686_v4 }
 0x1e2   : > { %8400 = vmatpush3.msra.mxu0 %v6490_v40  ;;  %8447 = vmatprep.subr.mxu1 %v6504_v21  ;;  %v7908_v19 = vpop.f32.mrf.mxu0  ;;  %v10446_v44 = vsel %vm1608_vm1, %v3171_v0, %v3172_v59  ;;  %v6482_v0 = vld [vmem:[%s12365_s3 + $0x638] sm:$0xff]  ;;  %v6496_v59 = vld [vmem:[%s12365_s3 + $0x6a8] sm:$0xff] }
 0x1e3   : > { %8393 = vmatprep.mubr.f32.mxu1 %v9722_v23  ;;  %8401 = vmatprep.subr.mxu0 %v6489_v15  ;;  %v10414_v45 = vadd.f32 %v7952_v14, %v7908_v19  ;;  %v6499_v19 = vld [vmem:[%s12365_s3 + $0x6c0] sm:$0xff] }
 0x1e4   : > { %8448 = vmatpush3.msra.mxu1 %v6504_v21  ;;  %8402 = vmatpush3.msra.mxu0 %v6489_v15  ;;  %v1748_v16 = vpop.f32.mrf.mxu0  ;;  %v6500_v21 = vld [vmem:[%s12365_s3 + $0x6c8] sm:$0xff]  ;;  %v6485_v15 = vld [vmem:[%s12365_s3 + $0x650] sm:$0xff] }
 0x1e5   : > { %8449 = vmatprep.subr.mxu1 %v6503_v28  ;;  %8347 = vmatmul.mubr.f32.gmra.mxu0 %v9638_v8  ;;  %v10422_v47 = vadd.f32 %v1853_v30, %v1748_v16  ;;  %v6484_v16 = vld [vmem:[%s12365_s3 + $0x648] sm:$0xff] }
 0x1e6   : > { %8403 = vmatprep.subr.mxu0 %v6488_v63  ;;  %8450 = vmatpush3.msra.mxu1 %v6503_v28 }
 0x1e7   : > { %8349 = vmatprep.mubr.f32.mxu0 %v9660_v62  ;;  %8394 = vmatmul.mubr.f32.gmra.mxu1 %v9758_v37 }
 0x1e8   : > { %8404 = vmatpush3.msra.mxu0 %v6488_v63  ;;  %8451 = vmatprep.subr.mxu1 %v6502_v46  ;;  %v7955_v40 = vpop.f32.mrf.mxu1 }
 0x1e9   : > { %8396 = vmatprep.mubr.f32.mxu1 %v10192_v33  ;;  %8405 = vmatprep.subr.mxu0 %v6487_v10 }
 0x1ea   : > { %8452 = vmatpush3.msra.mxu1 %v6502_v46  ;;  %8406 = vmatpush3.msra.mxu0 %v6487_v10  ;;  %v1863_v63 = vpop.f32.mrf.mxu1  ;;  %v6498_v10 = vld [vmem:[%s12365_s3 + $0x6b8] sm:$0xff] }
 0x1eb   : > { %8453 = vmatprep.subr.mxu1 %v6501_v25  ;;  %8350 = vmatmul.mubr.f32.gmra.mxu0 %v9698_v36 }
 0x1ec   : > { %8407 = vmatprep.subr.mxu0 %v6486_v31  ;;  %8454 = vmatpush3.msra.mxu1 %v6501_v25  ;;  %v7911_v14 = vpop.f32.mrf.mxu0  ;;  %v6483_v25 = vld [vmem:[%s12365_s3 + $0x640] sm:$0xff] }
 0x1ed   : > { %8352 = vmatprep.mubr.f32.mxu0 %v10043_v53  ;;  %8397 = vmatmul.mubr.f32.gmra.mxu1 %v10446_v44  ;;  %v10453_v28 = vadd.f32 %v7955_v40, %v7911_v14 }
 0x1ee   : > { %8408 = vmatpush3.msra.mxu0 %v6486_v31  ;;  %8455 = vmatprep.subr.mxu1 %v6500_v21  ;;  %v1758_v30 = vpop.f32.mrf.mxu0 }
 0x1ef   : > { %8409 = vmatprep.subr.mxu0 %v6485_v15  ;;  %8456 = vmatpush3.msra.mxu1 %v6500_v21  ;;  %v10461_v46 = vadd.f32 %v1863_v63, %v1758_v30  ;;  %v6495_v21 = vld [vmem:[%s12365_s3 + $0x6a0] sm:$0xff]  ;;  %v6494_v30 = vld [vmem:[%s12365_s3 + $0x698] sm:$0xff] }
 0x1f0   : > { %8475 = vmatprep.mubr.f32.mxu1 %v9804_v34  ;;  %8410 = vmatpush3.msra.mxu0 %v6485_v15  ;;  %v6497_v34 = vld [vmem:[%s12365_s3 + $0x6b0] sm:$0xff]  ;;  %v6480_v15 = vld [vmem:[%s12365_s3 + $0x628] sm:$0xff] }
 0x1f1   : > { %8457 = vmatprep.subr.mxu1 %v6499_v19  ;;  %8353 = vmatmul.mubr.f32.gmra.mxu0 %v10416_v2 }
 0x1f2   : > { %8411 = vmatprep.subr.mxu0 %v6484_v16  ;;  %8458 = vmatpush3.msra.mxu1 %v6499_v19  ;;  %v7958_v31 = vpop.f32.mrf.mxu1 }
 0x1f3   : > { %8412 = vmatpush3.msra.mxu0 %v6484_v16  ;;  %8431 = vmatprep.mubr.f32.mxu0 %v9827_v13  ;;  %v6481_v13 = vld [vmem:[%s12365_s3 + $0x630] sm:$0xff]  ;;  %v6479_v16 = vld [vmem:[%s12365_s3 + $0x620] sm:$0xff] }
 0x1f4   : > { %8459 = vmatprep.subr.mxu1 %v6498_v10  ;;  %8413 = vmatprep.subr.mxu0 %v6483_v25  ;;  %v1873_v19 = vpop.f32.mrf.mxu1 }
 0x1f5   : > { %8460 = vmatpush3.msra.mxu1 %v6498_v10  ;;  %8414 = vmatpush3.msra.mxu0 %v6483_v25  ;;  %v6493_v25 = vld [vmem:[%s12365_s3 + $0x690] sm:$0xff] }
 0x1f6   : > { %8461 = vmatprep.subr.mxu1 %v6497_v34  ;;  %8415 = vmatprep.subr.mxu0 %v6482_v0  ;;  %v7914_v40 = vpop.f32.mrf.mxu0 }
 0x1f7   : > { %8462 = vmatpush3.msra.mxu1 %v6497_v34  ;;  %8416 = vmatpush3.msra.mxu0 %v6482_v0  ;;  %v10490_v14 = vadd.f32 %v7958_v31, %v7914_v40  ;;  %v6478_v34 = vld [vmem:[%s12365_s3 + $0x618] sm:$0xff]  ;;  %v6492_v31 = vld [vmem:[%s12365_s3 + $0x688] sm:$0xff]  ;;  %v6491_v40 = vld [vmem:[%s12365_s3 + $0x680] sm:$0xff] }
 0x1f8   : > { %8463 = vmatprep.subr.mxu1 %v6496_v59  ;;  %8417 = vmatprep.subr.mxu0 %v6481_v13  ;;  %v1768_v63 = vpop.f32.mrf.mxu0 }
 0x1f9   : > { %8464 = vmatpush3.msra.mxu1 %v6496_v59  ;;  %8418 = vmatpush3.msra.mxu0 %v6481_v13  ;;  %v10498_v10 = vadd.f32 %v1873_v19, %v1768_v63  ;;  %v6477_v59 = vld [vmem:[%s12365_s3 + $0x610] sm:$0xff]  ;;  %v6538_v63 = vld [vmem:[%s12365_s3 + $0x7f8] sm:$0xff] }
 0x1fa   : > { %8465 = vmatprep.subr.mxu1 %v6495_v21  ;;  %8419 = vmatprep.subr.mxu0 %v6480_v15 }
 0x1fb   : > { %8466 = vmatpush3.msra.mxu1 %v6495_v21  ;;  %8420 = vmatpush3.msra.mxu0 %v6480_v15  ;;  %v6476_v21 = vld [vmem:[%s12365_s3 + $0x608] sm:$0xff] }
 0x1fc   : > { %8467 = vmatprep.subr.mxu1 %v6494_v30  ;;  %8421 = vmatprep.subr.mxu0 %v6479_v16  ;;  %v8037_v0 = vpop.f32.mrf.mxu1 }
 0x1fd   : > { %8468 = vmatpush3.msra.mxu1 %v6494_v30  ;;  %8422 = vmatpush3.msra.mxu0 %v6479_v16 }
 0x1fe   : > { %8469 = vmatprep.subr.mxu1 %v6493_v25  ;;  %8423 = vmatprep.subr.mxu0 %v6478_v34  ;;  %v2161_v13 = vpop.f32.mrf.mxu1 }
 0x1ff   : > { %8470 = vmatpush3.msra.mxu1 %v6493_v25  ;;  %8424 = vmatpush3.msra.mxu0 %v6478_v34  ;;  %v7993_v15 = vpop.f32.mrf.mxu0  ;;  %v6475_v25 = vld [vmem:[%s12365_s3 + $0x600] sm:$0xff] }
 0x200   : > { %8471 = vmatprep.subr.mxu1 %v6492_v31  ;;  %8425 = vmatprep.subr.mxu0 %v6477_v59  ;;  %v2038_v19 = vadd.f32 %v7993_v15, %v10376_v38  ;;  %v6537_v38 = vld [vmem:[%s12365_s3 + $0x7f0] sm:$0xff] }
 0x201   : > { %8472 = vmatpush3.msra.mxu1 %v6492_v31  ;;  %8426 = vmatpush3.msra.mxu0 %v6477_v59  ;;  %v8040_v30 = vpop.f32.mrf.mxu1  ;;  %v1998_v16 = vpop.f32.mrf.mxu0  ;;  %v6521_v15 = vld [vmem:[%s12365_s3 + $0x770] sm:$0xff] }
 0x202   : > { %8473 = vmatprep.subr.mxu1 %v6491_v40  ;;  %8427 = vmatprep.subr.mxu0 %v6476_v21  ;;  %v2037_v34 = vadd.f32 %v1998_v16, %v10381_v20  ;;  %v10526_v50 = vadd.f32 %v8037_v0, %v2038_v19  ;;  %v6522_v20 = vld [vmem:[%s12365_s3 + $0x778] sm:$0xff]  ;;  %v6535_v16 = vld [vmem:[%s12365_s3 + $0x7e0] sm:$0xff] }
 0x203   : > { %8474 = vmatpush3.msra.mxu1 %v6491_v40  ;;  %8428 = vmatpush3.msra.mxu0 %v6476_v21  ;;  %v2171_v0 = vpop.f32.mrf.mxu1 }
 0x204   : > { %8476 = vmatmul.mubr.f32.vlgmr.msra.gmra.mxu1 %v9830_v61  ;;  %8531 = vmatprep.subr.mxu1 %v6538_v63  ;;  %v10532_v31 = vadd.f32 %v2161_v13, %v2037_v34  ;;  %v6536_v13 = vld [vmem:[%s12365_s3 + $0x7e8] sm:$0xff] }
 0x205   : > { %8429 = vmatprep.subr.mxu0 %v6475_v25  ;;  %8478 = vmatprep.mubr.f32.mxu1 %v9840_v60  ;;  %v7996_v59 = vpop.f32.mrf.mxu0 }
 0x206   : > { %8532 = vmatpush3.msra.mxu1 %v6538_v63  ;;  %8430 = vmatpush3.msra.mxu0 %v6475_v25  ;;  %v2040_v40 = vadd.f32 %v7996_v59, %v10414_v45  ;;  %v6519_v59 = vld [vmem:[%s12365_s3 + $0x760] sm:$0xff] }
 0x207   : > { %8533 = vmatprep.subr.mxu1 %v6537_v38  ;;  %8432 = vmatmul.mubr.f32.vlgmr.msra.gmra.mxu0 %v9853_v39  ;;  %v2008_v21 = vpop.f32.mrf.mxu0  ;;  %v8043_v45 = vpop.f32.mrf.mxu1 }
 0x208   : > { %8487 = vmatprep.subr.mxu0 %v6522_v20  ;;  %8534 = vmatpush3.msra.mxu1 %v6537_v38  ;;  %v2039_v19 = vadd.f32 %v2008_v21, %v10422_v47  ;;  %v10547_v63 = vadd.f32 %v8040_v30, %v2040_v40  ;;  %v6520_v47 = vld [vmem:[%s12365_s3 + $0x768] sm:$0xff]  ;;  %v6534_v38 = vld [vmem:[%s12365_s3 + $0x7d8] sm:$0xff]  ;;  %v3439_v21 = vrot.slane %v10416_v2, 3 }
 0x209   : > { %8434 = vmatprep.mubr.f32.mxu0 %v9863_v29  ;;  %8479 = vmatmul.mubr.f32.gmra.mxu1 %v9866_v43 }
 0x20a   : > { %8488 = vmatpush3.msra.mxu0 %v6522_v20  ;;  %8535 = vmatprep.subr.mxu1 %v6536_v13  ;;  %v10554_v25 = vadd.f32 %v2171_v0, %v2039_v19  ;;  %v2181_v20 = vpop.f32.mrf.mxu1 }
 0x20b   : > { %8481 = vmatprep.mubr.f32.mxu1 %v9876_v54  ;;  %8489 = vmatprep.subr.mxu0 %v6521_v15  ;;  %v7999_v30 = vpop.f32.mrf.mxu0 }
 0x20c   : > { %8536 = vmatpush3.msra.mxu1 %v6536_v13  ;;  %8490 = vmatpush3.msra.mxu0 %v6521_v15  ;;  %v2042_v34 = vadd.f32 %v7999_v30, %v10453_v28  ;;  %v6533_v28 = vld [vmem:[%s12365_s3 + $0x7d0] sm:$0xff]  ;;  %v6532_v30 = vld [vmem:[%s12365_s3 + $0x7c8] sm:$0xff] }
 0x20d   : > { %8537 = vmatprep.subr.mxu1 %v6535_v16  ;;  %8435 = vmatmul.mubr.f32.gmra.mxu0 %v9889_v49  ;;  %v2018_v0 = vpop.f32.mrf.mxu0  ;;  %v8046_v19 = vpop.f32.mrf.mxu1 }
 0x20e   : > { %8491 = vmatprep.subr.mxu0 %v6520_v47  ;;  %8538 = vmatpush3.msra.mxu1 %v6535_v16  ;;  %v2041_v40 = vadd.f32 %v2018_v0, %v10461_v46  ;;  %v10569_v13 = vadd.f32 %v8043_v45, %v2042_v34  ;;  %v6518_v46 = vld [vmem:[%s12365_s3 + $0x758] sm:$0xff]  ;;  %v3440_v16 = vrot.slane %v10425_v58, 3  ;;  %v3305_v0 = vrot.slane %v10416_v2, 2 }
 0x20f   : > { %8437 = vmatprep.mubr.f32.mxu0 %v9898_v35  ;;  %8482 = vmatmul.mubr.f32.gmra.mxu1 %v9901_v18 }
 0x210   : > { %8492 = vmatpush3.msra.mxu0 %v6520_v47  ;;  %8539 = vmatprep.subr.mxu1 %v6534_v38  ;;  %v10577_v15 = vadd.f32 %v2181_v20, %v2041_v40  ;;  %v10590_v20 = vsel %vm2045_vm3, %v3439_v21, %v3440_v16  ;;  %v2191_v40 = vpop.f32.mrf.mxu1  ;;  %v3306_v21 = vrot.slane %v10425_v58, 2  ;;  %v6515_v16 = vld [vmem:[%s12365_s3 + $0x740] sm:$0xff] }
 0x211   : > { %8484 = vmatprep.mubr.f32.mxu1 %v10314_v1  ;;  %8493 = vmatprep.subr.mxu0 %v6519_v59  ;;  %v8002_v45 = vpop.f32.mrf.mxu0 }
 0x212   : > { %8540 = vmatpush3.msra.mxu1 %v6534_v38  ;;  %8494 = vmatpush3.msra.mxu0 %v6519_v59  ;;  %v2044_v47 = vadd.f32 %v8002_v45, %v10490_v14  ;;  %v6517_v38 = vld [vmem:[%s12365_s3 + $0x750] sm:$0xff] }
 0x213   : > { %8541 = vmatprep.subr.mxu1 %v6533_v28  ;;  %8438 = vmatmul.mubr.f32.gmra.mxu0 %v9918_v55  ;;  %v2028_v34 = vpop.f32.mrf.mxu0 }
 0x214   : > { %8495 = vmatprep.subr.mxu0 %v6518_v46  ;;  %8542 = vmatpush3.msra.mxu1 %v6533_v28  ;;  %v2043_v14 = vadd.f32 %v2028_v34, %v10498_v10  ;;  %v10597_v59 = vadd.f32 %v8046_v19, %v2044_v47  ;;  %v6531_v28 = vld [vmem:[%s12365_s3 + $0x7c0] sm:$0xff]  ;;  %v6516_v10 = vld [vmem:[%s12365_s3 + $0x748] sm:$0xff]  ;;  %v6530_v19 = vld [vmem:[%s12365_s3 + $0x7b8] sm:$0xff] }
 0x215   : > { %8440 = vmatprep.mubr.f32.mxu0 %v10175_v41  ;;  %8485 = vmatmul.mubr.f32.gmra.mxu1 %v10590_v20  ;;  %v6514_v47 = vld [vmem:[%s12365_s3 + $0x738] sm:$0xff]  ;;  %v6527_v34 = vld [vmem:[%s12365_s3 + $0x7a0] sm:$0xff] }
 0x216   : > { %8496 = vmatpush3.msra.mxu0 %v6518_v46  ;;  %8543 = vmatprep.subr.mxu1 %v6532_v30  ;;  %v10605_v45 = vadd.f32 %v2191_v40, %v2043_v14  ;;  %v10612_v46 = vsel %vm1882_vm4, %v3305_v0, %v3306_v21  ;;  %v6526_v0 = vld [vmem:[%s12365_s3 + $0x798] sm:$0xff]  ;;  %v6511_v14 = vld [vmem:[%s12365_s3 + $0x720] sm:$0xff]  ;;  %v6525_v40 = vld [vmem:[%s12365_s3 + $0x790] sm:$0xff] }
 0x217   : > { %8497 = vmatprep.subr.mxu0 %v6517_v38  ;;  %8544 = vmatpush3.msra.mxu1 %v6532_v30  ;;  %v6528_v30 = vld [vmem:[%s12365_s3 + $0x7a8] sm:$0xff] }
 0x218   : > { %8563 = vmatprep.mubr.f32.mxu1 %v9591_v9  ;;  %8498 = vmatpush3.msra.mxu0 %v6517_v38  ;;  %v6529_v9 = vld [vmem:[%s12365_s3 + $0x7b0] sm:$0xff]  ;;  %v6512_v38 = vld [vmem:[%s12365_s3 + $0x728] sm:$0xff] }
 0x219   : > { %8545 = vmatprep.subr.mxu1 %v6531_v28  ;;  %8441 = vmatmul.mubr.f32.gmra.mxu0 %v10612_v46 }
 0x21a   : > { %8499 = vmatprep.subr.mxu0 %v6516_v10  ;;  %8546 = vmatpush3.msra.mxu1 %v6531_v28  ;;  %v6510_v28 = vld [vmem:[%s12365_s3 + $0x718] sm:$0xff] }
 0x21b   : > { %8500 = vmatpush3.msra.mxu0 %v6516_v10  ;;  %8519 = vmatprep.mubr.f32.mxu0 %v9994_v42  ;;  %v6513_v42 = vld [vmem:[%s12365_s3 + $0x730] sm:$0xff]  ;;  %v6524_v10 = vld [vmem:[%s12365_s3 + $0x788] sm:$0xff] }
 0x21c   : > { %8547 = vmatprep.subr.mxu1 %v6530_v19  ;;  %8501 = vmatprep.subr.mxu0 %v6515_v16 }
 0x21d   : > { %8548 = vmatpush3.msra.mxu1 %v6530_v19  ;;  %8502 = vmatpush3.msra.mxu0 %v6515_v16  ;;  %v6509_v19 = vld [vmem:[%s12365_s3 + $0x710] sm:$0xff] }
 0x21e   : > { %8549 = vmatprep.subr.mxu1 %v6529_v9  ;;  %8503 = vmatprep.subr.mxu0 %v6514_v47 }
 0x21f   : > { %8550 = vmatpush3.msra.mxu1 %v6529_v9  ;;  %8504 = vmatpush3.msra.mxu0 %v6514_v47  ;;  %v6523_v9 = vld [vmem:[%s12365_s3 + $0x780] sm:$0xff]  ;;  %v6508_v47 = vld [vmem:[%s12365_s3 + $0x708] sm:$0xff] }
 0x220   : > { %8551 = vmatprep.subr.mxu1 %v6528_v30  ;;  %8505 = vmatprep.subr.mxu0 %v6513_v42 }
 0x221   : > { %8552 = vmatpush3.msra.mxu1 %v6528_v30  ;;  %8506 = vmatpush3.msra.mxu0 %v6513_v42 }
 0x222   : > { %8553 = vmatprep.subr.mxu1 %v6527_v34  ;;  %8507 = vmatprep.subr.mxu0 %v6512_v38 }
 0x223   : > { %8554 = vmatpush3.msra.mxu1 %v6527_v34  ;;  %8508 = vmatpush3.msra.mxu0 %v6512_v38  ;;  %v6570_v34 = vld [vmem:[%s12365_s3 + $0x8f8] sm:$0xff] }
 0x224   : > { %8555 = vmatprep.subr.mxu1 %v6526_v0  ;;  %8509 = vmatprep.subr.mxu0 %v6511_v14  ;;  %v8125_v21 = vpop.f32.mrf.mxu1 }
 0x225   : > { %8556 = vmatpush3.msra.mxu1 %v6526_v0  ;;  %8510 = vmatpush3.msra.mxu0 %v6511_v14  ;;  %v6507_v14 = vld [vmem:[%s12365_s3 + $0x700] sm:$0xff] }
 0x226   : > { %8557 = vmatprep.subr.mxu1 %v6525_v40  ;;  %8511 = vmatprep.subr.mxu0 %v6510_v28  ;;  %v2454_v16 = vpop.f32.mrf.mxu1 }
 0x227   : > { %8558 = vmatpush3.msra.mxu1 %v6525_v40  ;;  %8512 = vmatpush3.msra.mxu0 %v6510_v28  ;;  %v8081_v30 = vpop.f32.mrf.mxu0 }
 0x228   : > { %8559 = vmatprep.subr.mxu1 %v6524_v10  ;;  %8513 = vmatprep.subr.mxu0 %v6509_v19  ;;  %v2364_v42 = vadd.f32 %v8081_v30, %v10526_v50  ;;  %v6569_v50 = vld [vmem:[%s12365_s3 + $0x8f0] sm:$0xff] }
 0x229   : > { %8560 = vmatpush3.msra.mxu1 %v6524_v10  ;;  %8514 = vmatpush3.msra.mxu0 %v6509_v19  ;;  %v8128_v38 = vpop.f32.mrf.mxu1  ;;  %v2324_v0 = vpop.f32.mrf.mxu0  ;;  %v919_v19 = vmax.f32 %v9499_v51, %v9501_v52  ;;  %v6568_v51 = vld [vmem:[%s12365_s3 + $0x8e8] sm:$0xff] }
 0x22a   : > { %8561 = vmatprep.subr.mxu1 %v6523_v9  ;;  %8515 = vmatprep.subr.mxu0 %v6508_v47  ;;  %v2363_v40 = vadd.f32 %v2324_v0, %v10532_v31  ;;  %v10672_v28 = vadd.f32 %v8125_v21, %v2364_v42  ;;  %v6554_v31 = vld [vmem:[%s12365_s3 + $0x878] sm:$0xff] }
 0x22b   : > { %8562 = vmatpush3.msra.mxu1 %v6523_v9  ;;  %8516 = vmatpush3.msra.mxu0 %v6508_v47  ;;  %v2464_v21 = vpop.f32.mrf.mxu1  ;;  %v1225_v30 = vmax.f32 %v919_v19, %v9730_v32 }
 0x22c   : > { %8564 = vmatmul.mubr.f32.vlgmr.msra.gmra.mxu1 %v9616_v24  ;;  %8619 = vmatprep.subr.mxu1 %v6570_v34  ;;  %v10678_v10 = vadd.f32 %v2454_v16, %v2363_v40  ;;  %v6553_v16 = vld [vmem:[%s12365_s3 + $0x870] sm:$0xff] }
 0x22d   : > { %8517 = vmatprep.subr.mxu0 %v6507_v14  ;;  %8566 = vmatprep.mubr.f32.mxu1 %v9638_v8  ;;  %v8084_v9 = vpop.f32.mrf.mxu0 }
 0x22e   : > { %8620 = vmatpush3.msra.mxu1 %v6570_v34  ;;  %8518 = vmatpush3.msra.mxu0 %v6507_v14  ;;  %v2366_v47 = vadd.f32 %v8084_v9, %v10547_v63  ;;  %v6567_v63 = vld [vmem:[%s12365_s3 + $0x8e0] sm:$0xff]  ;;  %v1531_v14 = vmax.f32 %v1225_v30, %v9733_v3 }
 0x22f   : > { %8621 = vmatprep.subr.mxu1 %v6569_v50  ;;  %8520 = vmatmul.mubr.f32.vlgmr.msra.gmra.mxu0 %v10013_v48  ;;  %v2334_v52 = vpop.f32.mrf.mxu0  ;;  %v8131_v32 = vpop.f32.mrf.mxu1 }
 0x230   : > { %8575 = vmatprep.subr.mxu0 %v6554_v31  ;;  %8622 = vmatpush3.msra.mxu1 %v6569_v50  ;;  %v2365_v42 = vadd.f32 %v2334_v52, %v10554_v25  ;;  %v10696_v34 = vadd.f32 %v8128_v38, %v2366_v47  ;;  %v6552_v25 = vld [vmem:[%s12365_s3 + $0x868] sm:$0xff]  ;;  %v6566_v50 = vld [vmem:[%s12365_s3 + $0x8d8] sm:$0xff]  ;;  %v6565_v47 = vld [vmem:[%s12365_s3 + $0x8d0] sm:$0xff] }
 0x231   : > { %8522 = vmatprep.mubr.f32.mxu0 %v10021_v57  ;;  %8567 = vmatmul.mubr.f32.gmra.mxu1 %v9660_v62  ;;  %v2474_v3 = vpop.f32.mrf.mxu1 }
 0x232   : > { %8576 = vmatpush3.msra.mxu0 %v6554_v31  ;;  %8623 = vmatprep.subr.mxu1 %v6568_v51  ;;  %v10703_v0 = vadd.f32 %v2464_v21, %v2365_v42  ;;  %v6551_v31 = vld [vmem:[%s12365_s3 + $0x860] sm:$0xff]  ;;  %v6564_v42 = vld [vmem:[%s12365_s3 + $0x8c8] sm:$0xff] }
 0x233   : > { %8569 = vmatprep.mubr.f32.mxu1 %v9698_v36  ;;  %8577 = vmatprep.subr.mxu0 %v6553_v16  ;;  %v8087_v38 = vpop.f32.mrf.mxu0 }
 0x234   : > { %8624 = vmatpush3.msra.mxu1 %v6568_v51  ;;  %8578 = vmatpush3.msra.mxu0 %v6553_v16  ;;  %v2368_v40 = vadd.f32 %v8087_v38, %v10569_v13  ;;  %v1562_v13 = vadd.f32 %v10399_v27, %v1531_v14  ;;  %v3573_v14 = vrot.slane %v10416_v2, 4 }
 0x235   : > { %8625 = vmatprep.subr.mxu1 %v6567_v63  ;;  %8523 = vmatmul.mubr.f32.gmra.mxu0 %v10040_v56  ;;  %v2344_v19 = vpop.f32.mrf.mxu0  ;;  %v8134_v27 = vpop.f32.mrf.mxu1 }
 0x236   : > { %8579 = vmatprep.subr.mxu0 %v6552_v25  ;;  %8626 = vmatpush3.msra.mxu1 %v6567_v63  ;;  %v2367_v21 = vadd.f32 %v2344_v19, %v10577_v15  ;;  %v10719_v9 = vadd.f32 %v8131_v32, %v2368_v40  ;;  %v6550_v15 = vld [vmem:[%s12365_s3 + $0x858] sm:$0xff]  ;;  %v10734_v16 = vmax.f32 %v1562_v13, 0.0  ;;  %v6549_v63 = vld [vmem:[%s12365_s3 + $0x850] sm:$0xff]  ;;  %v6563_v40 = vld [vmem:[%s12365_s3 + $0x8c0] sm:$0xff] }
 0x237   : > { %8525 = vmatprep.mubr.f32.mxu0 %v10050_v12  ;;  %8570 = vmatmul.mubr.f32.gmra.mxu1 %v10043_v53  ;;  %v2484_v38 = vpop.f32.mrf.mxu1  ;;  %v6560_v13 = vld [vmem:[%s12365_s3 + $0x8a8] sm:$0xff] }
 0x238   : > { %8580 = vmatpush3.msra.mxu0 %v6552_v25  ;;  %8627 = vmatprep.subr.mxu1 %v6566_v50  ;;  %v10727_v30 = vadd.f32 %v2474_v3, %v2367_v21  ;;  %v6546_v21 = vld [vmem:[%s12365_s3 + $0x838] sm:$0xff] }
 0x239   : > { %8572 = vmatprep.mubr.f32.mxu1 %v10416_v2  ;;  %8581 = vmatprep.subr.mxu0 %v6551_v31  ;;  %v8090_v51 = vpop.f32.mrf.mxu0 }
 0x23a   : > { %8628 = vmatpush3.msra.mxu1 %v6566_v50  ;;  %8582 = vmatpush3.msra.mxu0 %v6551_v31  ;;  %v2370_v52 = vadd.f32 %v8090_v51, %v10597_v59  ;;  %v3574_v50 = vrot.slane %v10425_v58, 4  ;;  %v6562_v58 = vld [vmem:[%s12365_s3 + $0x8b8] sm:$0xff]  ;;  %v6547_v31 = vld [vmem:[%s12365_s3 + $0x840] sm:$0xff] }
 0x23b   : > { %8629 = vmatprep.subr.mxu1 %v6565_v47  ;;  %8526 = vmatmul.mubr.f32.gmra.mxu0 %v10067_v6  ;;  %v2354_v32 = vpop.f32.mrf.mxu0  ;;  %v6543_v51 = vld [vmem:[%s12365_s3 + $0x820] sm:$0xff] }
 0x23c   : > { %8583 = vmatprep.subr.mxu0 %v6550_v15  ;;  %8630 = vmatpush3.msra.mxu1 %v6565_v47  ;;  %v2369_v59 = vadd.f32 %v2354_v32, %v10605_v45  ;;  %v10745_v25 = vadd.f32 %v8134_v27, %v2370_v52  ;;  %v6548_v45 = vld [vmem:[%s12365_s3 + $0x848] sm:$0xff]  ;;  %v10760_v19 = vsel %vm2208_vm2, %v3573_v14, %v3574_v50  ;;  %v6559_v47 = vld [vmem:[%s12365_s3 + $0x8a0] sm:$0xff]  ;;  %v6558_v27 = vld [vmem:[%s12365_s3 + $0x898] sm:$0xff] }
 0x23d   : > { %8528 = vmatprep.mubr.f32.mxu0 %v10297_v11  ;;  %8573 = vmatmul.mubr.f32.gmra.mxu1 %v10734_v16  ;;  %v6557_v52 = vld [vmem:[%s12365_s3 + $0x890] sm:$0xff] }
 0x23e   : > { %8584 = vmatpush3.msra.mxu0 %v6550_v15  ;;  %8631 = vmatprep.subr.mxu1 %v6564_v42  ;;  %v10753_v3 = vadd.f32 %v2484_v38, %v2369_v59  ;;  %v6544_v15 = vld [vmem:[%s12365_s3 + $0x828] sm:$0xff]  ;;  %v6541_v14 = vld [vmem:[%s12365_s3 + $0x810] sm:$0xff]  ;;  %v6555_v38 = vld [vmem:[%s12365_s3 + $0x880] sm:$0xff] }
 0x23f   : > { %8585 = vmatprep.subr.mxu0 %v6549_v63  ;;  %8632 = vmatpush3.msra.mxu1 %v6564_v42  ;;  %v6542_v42 = vld [vmem:[%s12365_s3 + $0x818] sm:$0xff] }
 0x240   : > { %8651 = vmatprep.mubr.f32.mxu1 %v9853_v39  ;;  %8586 = vmatpush3.msra.mxu0 %v6549_v63  ;;  %v6561_v39 = vld [vmem:[%s12365_s3 + $0x8b0] sm:$0xff]  ;;  %v6556_v63 = vld [vmem:[%s12365_s3 + $0x888] sm:$0xff] }
 0x241   : > { %8633 = vmatprep.subr.mxu1 %v6563_v40  ;;  %8529 = vmatmul.mubr.f32.gmra.mxu0 %v10760_v19 }
 0x242   : > { %8587 = vmatprep.subr.mxu0 %v6548_v45  ;;  %8634 = vmatpush3.msra.mxu1 %v6563_v40  ;;  %v6540_v40 = vld [vmem:[%s12365_s3 + $0x808] sm:$0xff] }
 0x243   : > { %8588 = vmatpush3.msra.mxu0 %v6548_v45  ;;  %8607 = vmatprep.mubr.f32.mxu0 %v9626_v17  ;;  %v6545_v17 = vld [vmem:[%s12365_s3 + $0x830] sm:$0xff] }
 0x244   : > { %8635 = vmatprep.subr.mxu1 %v6562_v58  ;;  %8589 = vmatprep.subr.mxu0 %v6547_v31 }
 0x245   : > { %8636 = vmatpush3.msra.mxu1 %v6562_v58  ;;  %8590 = vmatpush3.msra.mxu0 %v6547_v31  ;;  %v6602_v58 = vld [vmem:[%s12365_s3 + $0x9f8] sm:$0xff] }
 0x246   : > { %8637 = vmatprep.subr.mxu1 %v6561_v39  ;;  %8591 = vmatprep.subr.mxu0 %v6546_v21 }
 0x247   : > { %8638 = vmatpush3.msra.mxu1 %v6561_v39  ;;  %8592 = vmatpush3.msra.mxu0 %v6546_v21  ;;  %v6539_v21 = vld [vmem:[%s12365_s3 + $0x800] sm:$0xff] }
 0x248   : > { %8639 = vmatprep.subr.mxu1 %v6560_v13  ;;  %8593 = vmatprep.subr.mxu0 %v6545_v17 }
 0x249   : > { %8640 = vmatpush3.msra.mxu1 %v6560_v13  ;;  %8594 = vmatpush3.msra.mxu0 %v6545_v17 }
 0x24a   : > { %8641 = vmatprep.subr.mxu1 %v6559_v47  ;;  %8595 = vmatprep.subr.mxu0 %v6544_v15 }
 0x24b   : > { %8642 = vmatpush3.msra.mxu1 %v6559_v47  ;;  %8596 = vmatpush3.msra.mxu0 %v6544_v15 }
 0x24c   : > { %8643 = vmatprep.subr.mxu1 %v6558_v27  ;;  %8597 = vmatprep.subr.mxu0 %v6543_v51  ;;  %v8213_v32 = vpop.f32.mrf.mxu1 }
 0x24d   : > { %8644 = vmatpush3.msra.mxu1 %v6558_v27  ;;  %8598 = vmatpush3.msra.mxu0 %v6543_v51 }
 0x24e   : > { %8645 = vmatprep.subr.mxu1 %v6557_v52  ;;  %8599 = vmatprep.subr.mxu0 %v6542_v42  ;;  %v2724_v59 = vpop.f32.mrf.mxu1 }
 0x24f   : > { %8646 = vmatpush3.msra.mxu1 %v6557_v52  ;;  %8600 = vmatpush3.msra.mxu0 %v6542_v42  ;;  %v8169_v50 = vpop.f32.mrf.mxu0  ;;  %v6600_v52 = vld [vmem:[%s12365_s3 + $0x9e8] sm:$0xff] }
 0x250   : > { %8647 = vmatprep.subr.mxu1 %v6556_v63  ;;  %8601 = vmatprep.subr.mxu0 %v6541_v14  ;;  %v2630_v45 = vadd.f32 %v8169_v50, %v10672_v28  ;;  %v6601_v28 = vld [vmem:[%s12365_s3 + $0x9f0] sm:$0xff] }
 0x251   : > { %8648 = vmatpush3.msra.mxu1 %v6556_v63  ;;  %8602 = vmatpush3.msra.mxu0 %v6541_v14  ;;  %v8216_v31 = vpop.f32.mrf.mxu1  ;;  %v2590_v39 = vpop.f32.mrf.mxu0 }
 0x252   : > { %8649 = vmatprep.subr.mxu1 %v6555_v38  ;;  %8603 = vmatprep.subr.mxu0 %v6540_v40  ;;  %v2629_v13 = vadd.f32 %v2590_v39, %v10678_v10  ;;  %v10820_v17 = vadd.f32 %v8213_v32, %v2630_v45  ;;  %v6586_v10 = vld [vmem:[%s12365_s3 + $0x978] sm:$0xff]  ;;  %v6585_v32 = vld [vmem:[%s12365_s3 + $0x970] sm:$0xff]  ;;  %v10860_v39 = vmax.f32 %v9752_v7, 0.0 }
 0x253   : > { %8650 = vmatpush3.msra.mxu1 %v6555_v38  ;;  %8604 = vmatpush3.msra.mxu0 %v6540_v40  ;;  %v2734_v15 = vpop.f32.mrf.mxu1  ;;  %v6598_v45 = vld [vmem:[%s12365_s3 + $0x9d8] sm:$0xff]  ;;  %v6597_v7 = vld [vmem:[%s12365_s3 + $0x9d0] sm:$0xff] }
 0x254   : > { %8652 = vmatmul.mubr.f32.vlgmr.msra.gmra.mxu1 %v9863_v29  ;;  %8707 = vmatprep.subr.mxu1 %v6602_v58  ;;  %v10826_v47 = vadd.f32 %v2724_v59, %v2629_v13  ;;  %v6599_v59 = vld [vmem:[%s12365_s3 + $0x9e0] sm:$0xff] }
 0x255   : > { %8605 = vmatprep.subr.mxu0 %v6539_v21  ;;  %8654 = vmatprep.mubr.f32.mxu1 %v9889_v49  ;;  %v8172_v27 = vpop.f32.mrf.mxu0 }
 0x256   : > { %8708 = vmatpush3.msra.mxu1 %v6602_v58  ;;  %8606 = vmatpush3.msra.mxu0 %v6539_v21  ;;  %v2632_v51 = vadd.f32 %v8172_v27, %v10696_v34  ;;  %v6583_v21 = vld [vmem:[%s12365_s3 + $0x960] sm:$0xff] }
 0x257   : > { %8709 = vmatprep.subr.mxu1 %v6601_v28  ;;  %8608 = vmatmul.mubr.f32.vlgmr.msra.gmra.mxu0 %v9654_v22  ;;  %v2600_v42 = vpop.f32.mrf.mxu0  ;;  %v8219_v34 = vpop.f32.mrf.mxu1 }
 0x258   : > { %8663 = vmatprep.subr.mxu0 %v6586_v10  ;;  %8710 = vmatpush3.msra.mxu1 %v6601_v28  ;;  %v2631_v63 = vadd.f32 %v2600_v42, %v10703_v0  ;;  %v10841_v14 = vadd.f32 %v8216_v31, %v2632_v51  ;;  %v6584_v0 = vld [vmem:[%s12365_s3 + $0x968] sm:$0xff]  ;;  %v3973_v28 = vrot.slane %v10734_v16, 2  ;;  %v3974_v51 = vrot.slane %v10860_v39, 2 }
 0x259   : > { %8610 = vmatprep.mubr.f32.mxu0 %v9686_v4  ;;  %8655 = vmatmul.mubr.f32.gmra.mxu1 %v9898_v35  ;;  %v2744_v58 = vpop.f32.mrf.mxu1  ;;  %v6596_v42 = vld [vmem:[%s12365_s3 + $0x9c8] sm:$0xff] }
 0x25a   : > { %8664 = vmatpush3.msra.mxu0 %v6586_v10  ;;  %8711 = vmatprep.subr.mxu1 %v6600_v52  ;;  %v10848_v38 = vadd.f32 %v2734_v15, %v2631_v63  ;;  %v10887_v63 = vsel %vm1882_vm4, %v3973_v28, %v3974_v51  ;;  %v6592_v28 = vld [vmem:[%s12365_s3 + $0x9a8] sm:$0xff]  ;;  %v6575_v51 = vld [vmem:[%s12365_s3 + $0x920] sm:$0xff] }
 0x25b   : > { %8657 = vmatprep.mubr.f32.mxu1 %v9918_v55  ;;  %8665 = vmatprep.subr.mxu0 %v6585_v32  ;;  %v8175_v40 = vpop.f32.mrf.mxu0 }
 0x25c   : > { %8712 = vmatpush3.msra.mxu1 %v6600_v52  ;;  %8666 = vmatpush3.msra.mxu0 %v6585_v32  ;;  %v2634_v50 = vadd.f32 %v8175_v40, %v10719_v9 }
 0x25d   : > { %8713 = vmatprep.subr.mxu1 %v6599_v59  ;;  %8611 = vmatmul.mubr.f32.gmra.mxu0 %v9722_v23  ;;  %v2610_v31 = vpop.f32.mrf.mxu0  ;;  %v8222_v15 = vpop.f32.mrf.mxu1 }
 0x25e   : > { %8667 = vmatprep.subr.mxu0 %v6584_v0  ;;  %8714 = vmatpush3.msra.mxu1 %v6599_v59  ;;  %v2633_v9 = vadd.f32 %v2610_v31, %v10727_v30  ;;  %v10866_v13 = vadd.f32 %v8219_v34, %v2634_v50  ;;  %v6582_v30 = vld [vmem:[%s12365_s3 + $0x958] sm:$0xff]  ;;  %v6581_v34 = vld [vmem:[%s12365_s3 + $0x950] sm:$0xff]  ;;  %v3839_v59 = vrot.slane %v10734_v16, 1  ;;  %v6595_v50 = vld [vmem:[%s12365_s3 + $0x9c0] sm:$0xff] }
 0x25f   : > { %8613 = vmatprep.mubr.f32.mxu0 %v9758_v37  ;;  %8658 = vmatmul.mubr.f32.gmra.mxu1 %v10175_v41  ;;  %v2754_v40 = vpop.f32.mrf.mxu1 }
 0x260   : > { %8668 = vmatpush3.msra.mxu0 %v6584_v0  ;;  %8715 = vmatprep.subr.mxu1 %v6598_v45  ;;  %v10874_v10 = vadd.f32 %v2744_v58, %v2633_v9  ;;  %v6579_v9 = vld [vmem:[%s12365_s3 + $0x940] sm:$0xff] }
 0x261   : > { %8660 = vmatprep.mubr.f32.mxu1 %v10612_v46  ;;  %8669 = vmatprep.subr.mxu0 %v6583_v21  ;;  %v8178_v27 = vpop.f32.mrf.mxu0 }
 0x262   : > { %8716 = vmatpush3.msra.mxu1 %v6598_v45  ;;  %8670 = vmatpush3.msra.mxu0 %v6583_v21  ;;  %v2636_v52 = vadd.f32 %v8178_v27, %v10745_v25  ;;  %v3840_v45 = vrot.slane %v10860_v39, 1  ;;  %v6594_v21 = vld [vmem:[%s12365_s3 + $0x9b8] sm:$0xff] }
 0x263   : > { %8717 = vmatprep.subr.mxu1 %v6597_v7  ;;  %8614 = vmatmul.mubr.f32.gmra.mxu0 %v10192_v33  ;;  %v2620_v32 = vpop.f32.mrf.mxu0  ;;  %v6590_v27 = vld [vmem:[%s12365_s3 + $0x998] sm:$0xff] }
 0x264   : > { %8671 = vmatprep.subr.mxu0 %v6582_v30  ;;  %8718 = vmatpush3.msra.mxu1 %v6597_v7  ;;  %v2635_v25 = vadd.f32 %v2620_v32, %v10753_v3  ;;  %v10894_v0 = vadd.f32 %v8222_v15, %v2636_v52  ;;  %v6580_v3 = vld [vmem:[%s12365_s3 + $0x948] sm:$0xff]  ;;  %v10909_v31 = vsel %vm1608_vm1, %v3839_v59, %v3840_v45  ;;  %v6578_v7 = vld [vmem:[%s12365_s3 + $0x938] sm:$0xff]  ;;  %v6589_v52 = vld [vmem:[%s12365_s3 + $0x990] sm:$0xff] }
 0x265   : > { %8616 = vmatprep.mubr.f32.mxu0 %v10446_v44  ;;  %8661 = vmatmul.mubr.f32.gmra.mxu1 %v10887_v63  ;;  %v6576_v15 = vld [vmem:[%s12365_s3 + $0x928] sm:$0xff]  ;;  %v6573_v59 = vld [vmem:[%s12365_s3 + $0x910] sm:$0xff] }
 0x266   : > { %8672 = vmatpush3.msra.mxu0 %v6582_v30  ;;  %8719 = vmatprep.subr.mxu1 %v6596_v42  ;;  %v10902_v58 = vadd.f32 %v2754_v40, %v2635_v25  ;;  %v6591_v30 = vld [vmem:[%s12365_s3 + $0x9a0] sm:$0xff] }
 0x267   : > { %8673 = vmatprep.subr.mxu0 %v6581_v34  ;;  %8720 = vmatpush3.msra.mxu1 %v6596_v42  ;;  %v6574_v42 = vld [vmem:[%s12365_s3 + $0x918] sm:$0xff]  ;;  %v6587_v40 = vld [vmem:[%s12365_s3 + $0x980] sm:$0xff] }
 0x268   : > { %8739 = vmatprep.mubr.f32.mxu1 %v10013_v48  ;;  %8674 = vmatpush3.msra.mxu0 %v6581_v34  ;;  %v6593_v48 = vld [vmem:[%s12365_s3 + $0x9b0] sm:$0xff]  ;;  %v6588_v34 = vld [vmem:[%s12365_s3 + $0x988] sm:$0xff] }
 0x269   : > { %8721 = vmatprep.subr.mxu1 %v6595_v50  ;;  %8617 = vmatmul.mubr.f32.gmra.mxu0 %v10909_v31 }
 0x26a   : > { %8675 = vmatprep.subr.mxu0 %v6580_v3  ;;  %8722 = vmatpush3.msra.mxu1 %v6595_v50  ;;  %v6572_v50 = vld [vmem:[%s12365_s3 + $0x908] sm:$0xff] }
 0x26b   : > { %8676 = vmatpush3.msra.mxu0 %v6580_v3  ;;  %8695 = vmatprep.mubr.f32.mxu0 %v9830_v61  ;;  %v6577_v61 = vld [vmem:[%s12365_s3 + $0x930] sm:$0xff] }
 0x26c   : > { %8723 = vmatprep.subr.mxu1 %v6594_v21  ;;  %8677 = vmatprep.subr.mxu0 %v6579_v9 }
 0x26d   : > { %8724 = vmatpush3.msra.mxu1 %v6594_v21  ;;  %8678 = vmatpush3.msra.mxu0 %v6579_v9  ;;  %v6634_v21 = vld [vmem:[%s12365_s3 + $0xaf8] sm:$0xff] }
 0x26e   : > { %8725 = vmatprep.subr.mxu1 %v6593_v48  ;;  %8679 = vmatprep.subr.mxu0 %v6578_v7 }
 0x26f   : > { %8726 = vmatpush3.msra.mxu1 %v6593_v48  ;;  %8680 = vmatpush3.msra.mxu0 %v6578_v7  ;;  %v6571_v7 = vld [vmem:[%s12365_s3 + $0x900] sm:$0xff] }
 0x270   : > { %8727 = vmatprep.subr.mxu1 %v6592_v28  ;;  %8681 = vmatprep.subr.mxu0 %v6577_v61 }
 0x271   : > { %8728 = vmatpush3.msra.mxu1 %v6592_v28  ;;  %8682 = vmatpush3.msra.mxu0 %v6577_v61 }
 0x272   : > { %8729 = vmatprep.subr.mxu1 %v6591_v30  ;;  %8683 = vmatprep.subr.mxu0 %v6576_v15 }
 0x273   : > { %8730 = vmatpush3.msra.mxu1 %v6591_v30  ;;  %8684 = vmatpush3.msra.mxu0 %v6576_v15 }
 0x274   : > { %8731 = vmatprep.subr.mxu1 %v6590_v27  ;;  %8685 = vmatprep.subr.mxu0 %v6575_v51  ;;  %v8301_v32 = vpop.f32.mrf.mxu1 }
 0x275   : > { %8732 = vmatpush3.msra.mxu1 %v6590_v27  ;;  %8686 = vmatpush3.msra.mxu0 %v6575_v51 }
 0x276   : > { %8733 = vmatprep.subr.mxu1 %v6589_v52  ;;  %8687 = vmatprep.subr.mxu0 %v6574_v42  ;;  %v2992_v25 = vpop.f32.mrf.mxu1 }
 0x277   : > { %8734 = vmatpush3.msra.mxu1 %v6589_v52  ;;  %8688 = vmatpush3.msra.mxu0 %v6574_v42  ;;  %v8257_v45 = vpop.f32.mrf.mxu0  ;;  %v6632_v52 = vld [vmem:[%s12365_s3 + $0xae8] sm:$0xff] }
 0x278   : > { %8735 = vmatprep.subr.mxu1 %v6588_v34  ;;  %8689 = vmatprep.subr.mxu0 %v6573_v59  ;;  %v2898_v3 = vadd.f32 %v8257_v45, %v10820_v17  ;;  %v6633_v17 = vld [vmem:[%s12365_s3 + $0xaf0] sm:$0xff] }
 0x279   : > { %8736 = vmatpush3.msra.mxu1 %v6588_v34  ;;  %8690 = vmatpush3.msra.mxu0 %v6573_v59  ;;  %v8304_v9 = vpop.f32.mrf.mxu1  ;;  %v2858_v48 = vpop.f32.mrf.mxu0 }
 0x27a   : > { %8737 = vmatprep.subr.mxu1 %v6587_v40  ;;  %8691 = vmatprep.subr.mxu0 %v6572_v50  ;;  %v2897_v28 = vadd.f32 %v2858_v48, %v10826_v47  ;;  %v10969_v61 = vadd.f32 %v8301_v32, %v2898_v3  ;;  %v6618_v47 = vld [vmem:[%s12365_s3 + $0xa78] sm:$0xff]  ;;  %v6617_v32 = vld [vmem:[%s12365_s3 + $0xa70] sm:$0xff]  ;;  %v6615_v48 = vld [vmem:[%s12365_s3 + $0xa60] sm:$0xff] }
 0x27b   : > { %8738 = vmatpush3.msra.mxu1 %v6587_v40  ;;  %8692 = vmatpush3.msra.mxu0 %v6572_v50  ;;  %v3002_v15 = vpop.f32.mrf.mxu1  ;;  %v6630_v3 = vld [vmem:[%s12365_s3 + $0xad8] sm:$0xff] }
 0x27c   : > { %8740 = vmatmul.mubr.f32.vlgmr.msra.gmra.mxu1 %v10021_v57  ;;  %8795 = vmatprep.subr.mxu1 %v6634_v21  ;;  %v10975_v30 = vadd.f32 %v2992_v25, %v2897_v28  ;;  %v6631_v25 = vld [vmem:[%s12365_s3 + $0xae0] sm:$0xff] }
 0x27d   : > { %8693 = vmatprep.subr.mxu0 %v6571_v7  ;;  %8742 = vmatprep.mubr.f32.mxu1 %v10040_v56  ;;  %v8260_v27 = vpop.f32.mrf.mxu0 }
 0x27e   : > { %8796 = vmatpush3.msra.mxu1 %v6634_v21  ;;  %8694 = vmatpush3.msra.mxu0 %v6571_v7  ;;  %v2900_v51 = vadd.f32 %v8260_v27, %v10841_v14 }
 0x27f   : > { %8797 = vmatprep.subr.mxu1 %v6633_v17  ;;  %8696 = vmatmul.mubr.f32.vlgmr.msra.gmra.mxu0 %v9840_v60  ;;  %v2868_v42 = vpop.f32.mrf.mxu0  ;;  %v8307_v14 = vpop.f32.mrf.mxu1 }
 0x280   : > { %8751 = vmatprep.subr.mxu0 %v6618_v47  ;;  %8798 = vmatpush3.msra.mxu1 %v6633_v17  ;;  %v2899_v34 = vadd.f32 %v2868_v42, %v10848_v38  ;;  %v10990_v59 = vadd.f32 %v8304_v9, %v2900_v51  ;;  %v6616_v38 = vld [vmem:[%s12365_s3 + $0xa68] sm:$0xff]  ;;  %v4241_v17 = vrot.slane %v10734_v16, 4  ;;  %v4242_v51 = vrot.slane %v10860_v39, 4 }
 0x281   : > { %8698 = vmatprep.mubr.f32.mxu0 %v9866_v43  ;;  %8743 = vmatmul.mubr.f32.gmra.mxu1 %v10050_v12  ;;  %v3012_v21 = vpop.f32.mrf.mxu1  ;;  %v6628_v42 = vld [vmem:[%s12365_s3 + $0xac8] sm:$0xff] }
 0x282   : > { %8752 = vmatpush3.msra.mxu0 %v6618_v47  ;;  %8799 = vmatprep.subr.mxu1 %v6632_v52  ;;  %v10997_v40 = vadd.f32 %v3002_v15, %v2899_v34  ;;  %v11033_v34 = vsel %vm2208_vm2, %v4241_v17, %v4242_v51  ;;  %v6623_v17 = vld [vmem:[%s12365_s3 + $0xaa0] sm:$0xff]  ;;  %v6621_v51 = vld [vmem:[%s12365_s3 + $0xa90] sm:$0xff] }
 0x283   : > { %8745 = vmatprep.mubr.f32.mxu1 %v10067_v6  ;;  %8753 = vmatprep.subr.mxu0 %v6617_v32  ;;  %v8263_v50 = vpop.f32.mrf.mxu0 }
 0x284   : > { %8800 = vmatpush3.msra.mxu1 %v6632_v52  ;;  %8754 = vmatpush3.msra.mxu0 %v6617_v32  ;;  %v2902_v45 = vadd.f32 %v8263_v50, %v10866_v13  ;;  %v6629_v13 = vld [vmem:[%s12365_s3 + $0xad0] sm:$0xff] }
 0x285   : > { %8801 = vmatprep.subr.mxu1 %v6631_v25  ;;  %8699 = vmatmul.mubr.f32.gmra.mxu0 %v9876_v54  ;;  %v2878_v9 = vpop.f32.mrf.mxu0  ;;  %v8310_v15 = vpop.f32.mrf.mxu1 }
 0x286   : > { %8755 = vmatprep.subr.mxu0 %v6616_v38  ;;  %8802 = vmatpush3.msra.mxu1 %v6631_v25  ;;  %v2901_v7 = vadd.f32 %v2878_v9, %v10874_v10  ;;  %v11012_v28 = vadd.f32 %v8307_v14, %v2902_v45  ;;  %v6614_v10 = vld [vmem:[%s12365_s3 + $0xa58] sm:$0xff]  ;;  %v6613_v14 = vld [vmem:[%s12365_s3 + $0xa50] sm:$0xff]  ;;  %v4107_v25 = vrot.slane %v10734_v16, 3  ;;  %v6627_v45 = vld [vmem:[%s12365_s3 + $0xac0] sm:$0xff] }
 0x287   : > { %8701 = vmatprep.mubr.f32.mxu0 %v9901_v18  ;;  %8746 = vmatmul.mubr.f32.gmra.mxu1 %v10297_v11  ;;  %v3022_v50 = vpop.f32.mrf.mxu1 }
 0x288   : > { %8756 = vmatpush3.msra.mxu0 %v6616_v38  ;;  %8803 = vmatprep.subr.mxu1 %v6630_v3  ;;  %v11020_v47 = vadd.f32 %v3012_v21, %v2901_v7  ;;  %v6610_v7 = vld [vmem:[%s12365_s3 + $0xa38] sm:$0xff] }
 0x289   : > { %8748 = vmatprep.mubr.f32.mxu1 %v10760_v19  ;;  %8757 = vmatprep.subr.mxu0 %v6615_v48  ;;  %v8266_v27 = vpop.f32.mrf.mxu0 }
 0x28a   : > { %8804 = vmatpush3.msra.mxu1 %v6630_v3  ;;  %8758 = vmatpush3.msra.mxu0 %v6615_v48  ;;  %v2904_v52 = vadd.f32 %v8266_v27, %v10894_v0  ;;  %v4108_v3 = vrot.slane %v10860_v39, 3  ;;  %v6626_v39 = vld [vmem:[%s12365_s3 + $0xab8] sm:$0xff]  ;;  %v6611_v48 = vld [vmem:[%s12365_s3 + $0xa40] sm:$0xff] }
 0x28b   : > { %8805 = vmatprep.subr.mxu1 %v6629_v13  ;;  %8702 = vmatmul.mubr.f32.gmra.mxu0 %v10314_v1  ;;  %v2888_v32 = vpop.f32.mrf.mxu0  ;;  %v6607_v27 = vld [vmem:[%s12365_s3 + $0xa20] sm:$0xff] }
 0x28c   : > { %8759 = vmatprep.subr.mxu0 %v6614_v10  ;;  %8806 = vmatpush3.msra.mxu1 %v6629_v13  ;;  %v2903_v0 = vadd.f32 %v2888_v32, %v10902_v58  ;;  %v11040_v38 = vadd.f32 %v8310_v15, %v2904_v52  ;;  %v6612_v58 = vld [vmem:[%s12365_s3 + $0xa48] sm:$0xff]  ;;  %v11055_v9 = vsel %vm2045_vm3, %v4107_v25, %v4108_v3  ;;  %v6622_v15 = vld [vmem:[%s12365_s3 + $0xa98] sm:$0xff]  ;;  %v6619_v3 = vld [vmem:[%s12365_s3 + $0xa80] sm:$0xff] }
 0x28d   : > { %8704 = vmatprep.mubr.f32.mxu0 %v10590_v20  ;;  %8749 = vmatmul.mubr.f32.gmra.mxu1 %v11033_v34  ;;  %v6624_v13 = vld [vmem:[%s12365_s3 + $0xaa8] sm:$0xff]  ;;  %v6606_v52 = vld [vmem:[%s12365_s3 + $0xa18] sm:$0xff] }
 0x28e   : > { %8760 = vmatpush3.msra.mxu0 %v6614_v10  ;;  %8807 = vmatprep.subr.mxu1 %v6628_v42  ;;  %v11048_v21 = vadd.f32 %v3022_v50, %v2903_v0  ;;  %v6608_v10 = vld [vmem:[%s12365_s3 + $0xa28] sm:$0xff]  ;;  %v12380_v0 = vld [vmem:[#allocation2_spill] sm:$0xff] }
 0x28f   : > { %8761 = vmatprep.subr.mxu0 %v6613_v14  ;;  %8808 = vmatpush3.msra.mxu1 %v6628_v42  ;;  %v6620_v32 = vld [vmem:[%s12365_s3 + $0xa88] sm:$0xff] }
 0x290   : > { %8827 = vmatprep.mubr.f32.mxu1 %v9654_v22  ;;  %8762 = vmatpush3.msra.mxu0 %v6613_v14  ;;  %v6625_v22 = vld [vmem:[%s12365_s3 + $0xab0] sm:$0xff]  ;;  %v12379_v25 = vld [vmem:[#allocation3_spill] sm:$0xff] }
 0x291   : > { %8809 = vmatprep.subr.mxu1 %v6627_v45  ;;  %8705 = vmatmul.mubr.f32.gmra.mxu0 %v11055_v9  ;;  %v6605_v14 = vld [vmem:[%s12365_s3 + $0xa10] sm:$0xff]  ;;  %v921_v50 = vmax.f32 %v12380_v0, %v12379_v25  ;;  %v6663_v0 = vld [vmem:[%s12365_s3 + $0xbe0] sm:$0xff] }
 0x292   : > { %8763 = vmatprep.subr.mxu0 %v6612_v58  ;;  %8810 = vmatpush3.msra.mxu1 %v6627_v45 }
 0x293   : > { %8764 = vmatpush3.msra.mxu0 %v6612_v58  ;;  %8783 = vmatprep.mubr.f32.mxu0 %v9616_v24  ;;  %v6609_v24 = vld [vmem:[%s12365_s3 + $0xa30] sm:$0xff]  ;;  %v6604_v58 = vld [vmem:[%s12365_s3 + $0xa08] sm:$0xff] }
 0x294   : > { %8811 = vmatprep.subr.mxu1 %v6626_v39  ;;  %8765 = vmatprep.subr.mxu0 %v6611_v48 }
 0x295   : > { %8812 = vmatpush3.msra.mxu1 %v6626_v39  ;;  %8766 = vmatpush3.msra.mxu0 %v6611_v48  ;;  %v1227_v48 = vmax.f32 %v921_v50, %v10364_v5 }
 0x296   : > { %8813 = vmatprep.subr.mxu1 %v6625_v22  ;;  %8767 = vmatprep.subr.mxu0 %v6610_v7 }
 0x297   : > { %8814 = vmatpush3.msra.mxu1 %v6625_v22  ;;  %8768 = vmatpush3.msra.mxu0 %v6610_v7  ;;  %v6666_v7 = vld [vmem:[%s12365_s3 + $0xbf8] sm:$0xff] }
 0x298   : > { %8815 = vmatprep.subr.mxu1 %v6624_v13  ;;  %8769 = vmatprep.subr.mxu0 %v6609_v24 }
 0x299   : > { %8816 = vmatpush3.msra.mxu1 %v6624_v13  ;;  %8770 = vmatpush3.msra.mxu0 %v6609_v24 }
 0x29a   : > { %8817 = vmatprep.subr.mxu1 %v6623_v17  ;;  %8771 = vmatprep.subr.mxu0 %v6608_v10 }
 0x29b   : > { %8818 = vmatpush3.msra.mxu1 %v6623_v17  ;;  %8772 = vmatpush3.msra.mxu0 %v6608_v10  ;;  %v6603_v17 = vld [vmem:[%s12365_s3 + $0xa00] sm:$0xff] }
 0x29c   : > { %8819 = vmatprep.subr.mxu1 %v6622_v15  ;;  %8773 = vmatprep.subr.mxu0 %v6607_v27  ;;  %v8389_v42 = vpop.f32.mrf.mxu1 }
 0x29d   : > { %8820 = vmatpush3.msra.mxu1 %v6622_v15  ;;  %8774 = vmatpush3.msra.mxu0 %v6607_v27  ;;  %v6665_v15 = vld [vmem:[%s12365_s3 + $0xbf0] sm:$0xff] }
 0x29e   : > { %8821 = vmatprep.subr.mxu1 %v6621_v51  ;;  %8775 = vmatprep.subr.mxu0 %v6606_v52  ;;  %v3258_v45 = vpop.f32.mrf.mxu1 }
 0x29f   : > { %8822 = vmatpush3.msra.mxu1 %v6621_v51  ;;  %8776 = vmatpush3.msra.mxu0 %v6606_v52  ;;  %v8345_v39 = vpop.f32.mrf.mxu0 }
 0x2a0   : > { %8823 = vmatprep.subr.mxu1 %v6620_v32  ;;  %8777 = vmatprep.subr.mxu0 %v6605_v14  ;;  %v3162_v22 = vadd.f32 %v8345_v39, %v10969_v61  ;;  %v1533_v61 = vmax.f32 %v1227_v48, %v10354_v26  ;;  %v6664_v26 = vld [vmem:[%s12365_s3 + $0xbe8] sm:$0xff]  ;;  %v12381_v39 = vld [vmem:[#allocation4_spill] sm:$0xff] }
 0x2a1   : > { %8824 = vmatpush3.msra.mxu1 %v6620_v32  ;;  %8778 = vmatpush3.msra.mxu0 %v6605_v14  ;;  %v8392_v13 = vpop.f32.mrf.mxu1  ;;  %v3122_v24 = vpop.f32.mrf.mxu0  ;;  %v6649_v14 = vld [vmem:[%s12365_s3 + $0xb70] sm:$0xff]  ;;  %v11164_v48 = vmax.f32 %v12381_v39, 0.0  ;;  %v6636_v39 = vld [vmem:[%s12365_s3 + $0xb08] sm:$0xff] }
 0x2a2   : > { %8825 = vmatprep.subr.mxu1 %v6619_v3  ;;  %8779 = vmatprep.subr.mxu0 %v6604_v58  ;;  %v3161_v5 = vadd.f32 %v3122_v24, %v10975_v30  ;;  %v11118_v10 = vadd.f32 %v8389_v42, %v3162_v22  ;;  %v6650_v30 = vld [vmem:[%s12365_s3 + $0xb78] sm:$0xff]  ;;  %v6647_v22 = vld [vmem:[%s12365_s3 + $0xb60] sm:$0xff] }
 0x2a3   : > { %8826 = vmatpush3.msra.mxu1 %v6619_v3  ;;  %8780 = vmatpush3.msra.mxu0 %v6604_v58  ;;  %v3268_v51 = vpop.f32.mrf.mxu1  ;;  %v6662_v3 = vld [vmem:[%s12365_s3 + $0xbd8] sm:$0xff] }
 0x2a4   : > { %8828 = vmatmul.mubr.f32.vlgmr.msra.gmra.mxu1 %v9686_v4  ;;  %8883 = vmatprep.subr.mxu1 %v6666_v7  ;;  %v11125_v27 = vadd.f32 %v3258_v45, %v3161_v5 }
 0x2a5   : > { %8781 = vmatprep.subr.mxu0 %v6603_v17  ;;  %8830 = vmatprep.mubr.f32.mxu1 %v9722_v23  ;;  %v8348_v52 = vpop.f32.mrf.mxu0  ;;  %v9018_v23 = vld [vmem:[%s12364_s2] ss:$0 sm:$0xff] }
 0x2a6   : > { %8884 = vmatpush3.msra.mxu1 %v6666_v7  ;;  %8782 = vmatpush3.msra.mxu0 %v6603_v17  ;;  %v3164_v4 = vadd.f32 %v8348_v52, %v10990_v59  ;;  %v1564_v32 = vadd.f32 %v9018_v23, %v1533_v61  ;;  %v6656_v23 = vld [vmem:[%s12365_s3 + $0xba8] sm:$0xff] }
 0x2a7   : > { %8885 = vmatprep.subr.mxu1 %v6665_v15  ;;  %8784 = vmatmul.mubr.f32.vlgmr.msra.gmra.mxu0 %v9638_v8  ;;  %v3132_v42 = vpop.f32.mrf.mxu0  ;;  %v8395_v8 = vpop.f32.mrf.mxu1 }
 0x2a8   : > { %8839 = vmatprep.subr.mxu0 %v6650_v30  ;;  %8886 = vmatpush3.msra.mxu1 %v6665_v15  ;;  %v3163_v59 = vadd.f32 %v3132_v42, %v10997_v40  ;;  %v11143_v25 = vadd.f32 %v8392_v13, %v3164_v4  ;;  %v6648_v40 = vld [vmem:[%s12365_s3 + $0xb68] sm:$0xff]  ;;  %v6642_v42 = vld [vmem:[%s12365_s3 + $0xb38] sm:$0xff] }
 0x2a9   : > { %8786 = vmatprep.mubr.f32.mxu0 %v9660_v62  ;;  %8831 = vmatmul.mubr.f32.gmra.mxu1 %v9758_v37  ;;  %v11156_v62 = vmax.f32 %v1564_v32, 0.0  ;;  %v6655_v32 = vld [vmem:[%s12365_s3 + $0xba0] sm:$0xff] }
 0x2aa   : > { %8840 = vmatpush3.msra.mxu0 %v6650_v30  ;;  %8887 = vmatprep.subr.mxu1 %v6664_v26  ;;  %v11150_v50 = vadd.f32 %v3268_v51, %v3163_v59  ;;  %v6645_v30 = vld [vmem:[%s12365_s3 + $0xb50] sm:$0xff]  ;;  %v6654_v59 = vld [vmem:[%s12365_s3 + $0xb98] sm:$0xff] }
 0x2ab   : > { %8833 = vmatprep.mubr.f32.mxu1 %v10192_v33  ;;  %8841 = vmatprep.subr.mxu0 %v6649_v14  ;;  %v8351_v45 = vpop.f32.mrf.mxu0  ;;  %v3278_v33 = vpop.f32.mrf.mxu1  ;;  %v4507_v13 = vrot.slane %v11156_v62, 1 }
 0x2ac   : > { %8888 = vmatpush3.msra.mxu1 %v6664_v26  ;;  %8842 = vmatpush3.msra.mxu0 %v6649_v14  ;;  %v3166_v37 = vadd.f32 %v8351_v45, %v11012_v28  ;;  %v6643_v26 = vld [vmem:[%s12365_s3 + $0xb40] sm:$0xff]  ;;  %v6640_v14 = vld [vmem:[%s12365_s3 + $0xb28] sm:$0xff] }
 0x2ad   : > { %8889 = vmatprep.subr.mxu1 %v6663_v0  ;;  %8787 = vmatmul.mubr.f32.gmra.mxu0 %v9698_v36  ;;  %v3142_v58 = vpop.f32.mrf.mxu0  ;;  %v6661_v36 = vld [vmem:[%s12365_s3 + $0xbd0] sm:$0xff] }
 0x2ae   : > { %8843 = vmatprep.subr.mxu0 %v6648_v40  ;;  %8890 = vmatpush3.msra.mxu1 %v6663_v0  ;;  %v3165_v28 = vadd.f32 %v3142_v58, %v11020_v47  ;;  %v11170_v7 = vadd.f32 %v8395_v8, %v3166_v37  ;;  %v6646_v47 = vld [vmem:[%s12365_s3 + $0xb58] sm:$0xff]  ;;  %v6639_v8 = vld [vmem:[%s12365_s3 + $0xb20] sm:$0xff]  ;;  %v6653_v0 = vld [vmem:[%s12365_s3 + $0xb90] sm:$0xff] }
 0x2af   : > { %8789 = vmatprep.mubr.f32.mxu0 %v10043_v53  ;;  %8834 = vmatmul.mubr.f32.gmra.mxu1 %v10446_v44  ;;  %v8398_v53 = vpop.f32.mrf.mxu1  ;;  %v4508_v44 = vrot.slane %v11164_v48, 1  ;;  %v6652_v37 = vld [vmem:[%s12365_s3 + $0xb88] sm:$0xff]  ;;  %v6651_v58 = vld [vmem:[%s12365_s3 + $0xb80] sm:$0xff] }
 0x2b0   : > { %8844 = vmatpush3.msra.mxu0 %v6648_v40  ;;  %8891 = vmatprep.subr.mxu1 %v6662_v3  ;;  %v11178_v24 = vadd.f32 %v3278_v33, %v3165_v28  ;;  %v6638_v40 = vld [vmem:[%s12365_s3 + $0xb18] sm:$0xff] }
 0x2b1   : > { %8836 = vmatprep.mubr.f32.mxu1 %v10909_v31  ;;  %8845 = vmatprep.subr.mxu0 %v6647_v22  ;;  %v8354_v17 = vpop.f32.mrf.mxu0  ;;  %v6660_v31 = vld [vmem:[%s12365_s3 + $0xbc8] sm:$0xff]  ;;  %v4509_v15 = vsel %vm1608_vm1, %v4507_v13, %v4508_v44 }
 0x2b2   : > { %8892 = vmatpush3.msra.mxu1 %v6662_v3  ;;  %8846 = vmatpush3.msra.mxu0 %v6647_v22  ;;  %v3168_v5 = vadd.f32 %v8354_v17, %v11040_v38  ;;  %v6659_v38 = vld [vmem:[%s12365_s3 + $0xbc0] sm:$0xff]  ;;  %v6637_v3 = vld [vmem:[%s12365_s3 + $0xb10] sm:$0xff] }
 0x2b3   : > { %8893 = vmatprep.subr.mxu1 %v6661_v36  ;;  %8790 = vmatmul.mubr.f32.gmra.mxu0 %v10416_v2  ;;  %v3152_v61 = vpop.f32.mrf.mxu0  ;;  %v3288_v2 = vpop.f32.mrf.mxu1 }
 0x2b4   : > { %8847 = vmatprep.subr.mxu0 %v6646_v47  ;;  %8894 = vmatpush3.msra.mxu1 %v6661_v36  ;;  %v3167_v51 = vadd.f32 %v3152_v61, %v11048_v21  ;;  %v11195_v52 = vadd.f32 %v8398_v53, %v3168_v5  ;;  %v6644_v21 = vld [vmem:[%s12365_s3 + $0xb48] sm:$0xff]  ;;  %v6635_v36 = vld [vmem:[%s12365_s3 + $0xb00] sm:$0xff] }
 0x2b5   : > { %8792 = vmatprep.mubr.f32.mxu0 %v10734_v16  ;;  %8837 = vmatmul.mubr.f32.gmra.mxu1 %v4509_v15  ;;  %v6658_v16 = vld [vmem:[%s12365_s3 + $0xbb8] sm:$0xff] }
 0x2b6   : > { %8848 = vmatpush3.msra.mxu0 %v6646_v47  ;;  %8895 = vmatprep.subr.mxu1 %v6660_v31  ;;  %v11201_v4 = vadd.f32 %v3288_v2, %v3167_v51  ;;  %v4641_v51 = vrot.slane %v11156_v62, 2 }
 0x2b7   : > { %8849 = vmatprep.subr.mxu0 %v6645_v30  ;;  %8896 = vmatpush3.msra.mxu1 %v6660_v31 }
 0x2b8   : > { %8915 = vmatprep.mubr.f32.mxu1 %v9840_v60  ;;  %8850 = vmatpush3.msra.mxu0 %v6645_v30  ;;  %v6657_v60 = vld [vmem:[%s12365_s3 + $0xbb0] sm:$0xff] }
 0x2b9   : > { %8897 = vmatprep.subr.mxu1 %v6659_v38  ;;  %8793 = vmatmul.mubr.f32.gmra.mxu0 %v11156_v62 }
 0x2ba   : > { %8851 = vmatprep.subr.mxu0 %v6644_v21  ;;  %8898 = vmatpush3.msra.mxu1 %v6659_v38 }
 0x2bb   : > { %8852 = vmatpush3.msra.mxu0 %v6644_v21  ;;  %8871 = vmatprep.mubr.f32.mxu0 %v9863_v29  ;;  %v6641_v29 = vld [vmem:[%s12365_s3 + $0xb30] sm:$0xff]  ;;  %v4642_v21 = vrot.slane %v11164_v48, 2 }
 0x2bc   : > { %8899 = vmatprep.subr.mxu1 %v6658_v16  ;;  %8853 = vmatprep.subr.mxu0 %v6643_v26 }
 0x2bd   : > { %8900 = vmatpush3.msra.mxu1 %v6658_v16  ;;  %8854 = vmatpush3.msra.mxu0 %v6643_v26  ;;  %v6676_v16 = vld [vmem:[%s12365_s3 + $0xc48] sm:$0xff] }
 0x2be   : > { %8901 = vmatprep.subr.mxu1 %v6657_v60  ;;  %8855 = vmatprep.subr.mxu0 %v6642_v42 }
 0x2bf   : > { %8902 = vmatpush3.msra.mxu1 %v6657_v60  ;;  %8856 = vmatpush3.msra.mxu0 %v6642_v42  ;;  %v6674_v42 = vld [vmem:[%s12365_s3 + $0xc38] sm:$0xff] }
 0x2c0   : > { %8903 = vmatprep.subr.mxu1 %v6656_v23  ;;  %8857 = vmatprep.subr.mxu0 %v6641_v29 }
 0x2c1   : > { %8904 = vmatpush3.msra.mxu1 %v6656_v23  ;;  %8858 = vmatpush3.msra.mxu0 %v6641_v29 }
 0x2c2   : > { %8905 = vmatprep.subr.mxu1 %v6655_v32  ;;  %8859 = vmatprep.subr.mxu0 %v6640_v14 }
 0x2c3   : > { %8906 = vmatpush3.msra.mxu1 %v6655_v32  ;;  %8860 = vmatpush3.msra.mxu0 %v6640_v14  ;;  %v6673_v14 = vld [vmem:[%s12365_s3 + $0xc30] sm:$0xff] }
 0x2c4   : > { %8907 = vmatprep.subr.mxu1 %v6654_v59  ;;  %8861 = vmatprep.subr.mxu0 %v6639_v8  ;;  %v8477_v45 = vpop.f32.mrf.mxu1 }
 0x2c5   : > { %8908 = vmatpush3.msra.mxu1 %v6654_v59  ;;  %8862 = vmatpush3.msra.mxu0 %v6639_v8  ;;  %v6670_v8 = vld [vmem:[%s12365_s3 + $0xc18] sm:$0xff] }
 0x2c6   : > { %8909 = vmatprep.subr.mxu1 %v6653_v0  ;;  %8863 = vmatprep.subr.mxu0 %v6638_v40  ;;  %v3526_v33 = vpop.f32.mrf.mxu1 }
 0x2c7   : > { %8910 = vmatpush3.msra.mxu1 %v6653_v0  ;;  %8864 = vmatpush3.msra.mxu0 %v6638_v40  ;;  %v8433_v22 = vpop.f32.mrf.mxu0  ;;  %v6669_v0 = vld [vmem:[%s12365_s3 + $0xc10] sm:$0xff]  ;;  %v6668_v40 = vld [vmem:[%s12365_s3 + $0xc08] sm:$0xff] }
 0x2c8   : > { %8911 = vmatprep.subr.mxu1 %v6652_v37  ;;  %8865 = vmatprep.subr.mxu0 %v6637_v3  ;;  %v3432_v28 = vadd.f32 %v8433_v22, %v11118_v10  ;;  %v6682_v10 = vld [vmem:[%s12365_s3 + $0xc78] sm:$0xff] }
 0x2c9   : > { %8912 = vmatpush3.msra.mxu1 %v6652_v37  ;;  %8866 = vmatpush3.msra.mxu0 %v6637_v3  ;;  %v8480_v13 = vpop.f32.mrf.mxu1  ;;  %v3392_v47 = vpop.f32.mrf.mxu0 }
 0x2ca   : > { %8913 = vmatprep.subr.mxu1 %v6651_v58  ;;  %8867 = vmatprep.subr.mxu0 %v6636_v39  ;;  %v3431_v53 = vadd.f32 %v3392_v47, %v11125_v27  ;;  %v11262_v17 = vadd.f32 %v8477_v45, %v3432_v28  ;;  %v6681_v27 = vld [vmem:[%s12365_s3 + $0xc70] sm:$0xff]  ;;  %v6667_v45 = vld [vmem:[%s12365_s3 + $0xc00] sm:$0xff]  ;;  %v4910_v47 = vrot.slane %v11164_v48, 4 }
 0x2cb   : > { %8914 = vmatpush3.msra.mxu1 %v6651_v58  ;;  %8868 = vmatpush3.msra.mxu0 %v6636_v39  ;;  %v11274_v5 = vpop.f32.mrf.mxu1 }
 0x2cc   : > { %8916 = vmatmul.mubr.f32.vlgmr.msra.gmra.mxu1 %v9866_v43  ;;  %8869 = vmatprep.subr.mxu0 %v6635_v36  ;;  %v11268_v44 = vadd.f32 %v3526_v33, %v3431_v53  ;;  %v6680_v43 = vld [vmem:[%s12365_s3 + $0xc68] sm:$0xff] }
 0x2cd   : > { %8918 = vmatprep.mubr.f32.mxu1 %v9876_v54  ;;  %8870 = vmatpush3.msra.mxu0 %v6635_v36  ;;  %v8436_v31 = vpop.f32.mrf.mxu0 }
 0x2ce   : > { %8872 = vmatmul.mubr.f32.vlgmr.msra.gmra.mxu0 %v9889_v49  ;;  %8927 = vmatprep.subr.mxu0 %v6682_v10  ;;  %v3434_v61 = vadd.f32 %v8436_v31, %v11143_v25  ;;  %v6679_v49 = vld [vmem:[%s12365_s3 + $0xc60] sm:$0xff]  ;;  %v4775_v25 = vrot.slane %v11156_v62, 3 }
 0x2cf   : > { %8874 = vmatprep.mubr.f32.mxu0 %v9898_v35  ;;  %8928 = vmatpush3.msra.mxu0 %v6682_v10  ;;  %v3402_v54 = vpop.f32.mrf.mxu0  ;;  %v8483_v35 = vpop.f32.mrf.mxu1 }
 0x2d0   : > { %8919 = vmatmul.mubr.f32.gmra.mxu1 %v9901_v18  ;;  %8929 = vmatprep.subr.mxu0 %v6681_v27  ;;  %v11284_v15 = vadd.f32 %v3402_v54, %v11150_v50  ;;  %v11286_v30 = vadd.f32 %v8480_v13, %v3434_v61  ;;  %v6678_v18 = vld [vmem:[%s12365_s3 + $0xc58] sm:$0xff] }
 0x2d1   : > { %8921 = vmatprep.mubr.f32.mxu1 %v10314_v1  ;;  %8930 = vmatpush3.msra.mxu0 %v6681_v27  ;;  %v11306_v2 = vpop.f32.mrf.mxu1 }
 0x2d2   : > { %8875 = vmatmul.mubr.f32.gmra.mxu0 %v9918_v55  ;;  %8931 = vmatprep.subr.mxu0 %v6680_v43  ;;  %v4776_v55 = vrot.slane %v11164_v48, 3 }
 0x2d3   : > { %8877 = vmatprep.mubr.f32.mxu0 %v10175_v41  ;;  %8932 = vmatpush3.msra.mxu0 %v6680_v43  ;;  %v8439_v50 = vpop.f32.mrf.mxu0  ;;  %v6677_v41 = vld [vmem:[%s12365_s3 + $0xc50] sm:$0xff] }
 0x2d4   : > { %8922 = vmatmul.mubr.f32.gmra.mxu1 %v10590_v20  ;;  %8933 = vmatprep.subr.mxu0 %v6679_v49  ;;  %v3436_v1 = vadd.f32 %v8439_v50, %v11170_v7 }
 0x2d5   : > { %8924 = vmatprep.mubr.f32.mxu1 %v11055_v9  ;;  %8934 = vmatpush3.msra.mxu0 %v6679_v49  ;;  %v3412_v38 = vpop.f32.mrf.mxu0  ;;  %v4777_v9 = vsel %vm2045_vm3, %v4775_v25, %v4776_v55  ;;  %v8486_v26 = vpop.f32.mrf.mxu1 }
 0x2d6   : > { %8878 = vmatmul.mubr.f32.gmra.mxu0 %v10612_v46  ;;  %8935 = vmatprep.subr.mxu0 %v6678_v18  ;;  %v11310_v20 = vadd.f32 %v3412_v38, %v11178_v24  ;;  %v11312_v7 = vadd.f32 %v8483_v35, %v3436_v1  ;;  %v4643_v46 = vsel %vm1882_vm4, %v4641_v51, %v4642_v21  ;;  %v6675_v24 = vld [vmem:[%s12365_s3 + $0xc40] sm:$0xff]  ;;  %v5202_v51 = vld [vmem:[%s12367_s5 + $0x1f8] sm:$0xff]  ;;  %v5201_v21 = vld [vmem:[%s12367_s5 + $0x1f0] sm:$0xff] }
 0x2d7   : > { %8880 = vmatprep.mubr.f32.mxu0 %v10887_v63  ;;  %8936 = vmatpush3.msra.mxu0 %v6678_v18  ;;  %v3556_v59 = vpop.f32.mrf.mxu1  ;;  %v5154_v38 = vld [vmem:[%s12367_s5 + $0x78] sm:$0xff] }
 0x2d8   : > { %8925 = vmatmul.mubr.f32.gmra.mxu1 %v4777_v9  ;;  %8937 = vmatprep.subr.mxu0 %v6677_v41  ;;  %v5169_v9 = vld [vmem:[%s12367_s5 + $0xf0] sm:$0xff] }
 0x2d9   : > { %8938 = vmatpush3.msra.mxu0 %v6677_v41  ;;  %v8442_v63 = vpop.f32.mrf.mxu0  ;;  %v5170_v41 = vld [vmem:[%s12367_s5 + $0xf8] sm:$0xff] }
 0x2da   : > { %8881 = vmatmul.mubr.f32.gmra.mxu0 %v4643_v46  ;;  %8939 = vmatprep.subr.mxu0 %v6676_v16  ;;  %v3438_v60 = vadd.f32 %v8442_v63, %v11195_v52  ;;  %v5153_v46 = vld [vmem:[%s12367_s5 + $0x70] sm:$0xff]  ;;  %v5200_v63 = vld [vmem:[%s12367_s5 + $0x1e8] sm:$0xff] }
 0x2db   : > { %8940 = vmatpush3.msra.mxu0 %v6676_v16  ;;  %8959 = vmatprep.mubr.f32.mxu0 %v10021_v57  ;;  %v3422_v23 = vpop.f32.mrf.mxu0  ;;  %v6672_v57 = vld [vmem:[%s12365_s3 + $0xc28] sm:$0xff] }
 0x2dc   : > { %8941 = vmatprep.subr.mxu0 %v6675_v24  ;;  %v3437_v29 = vadd.f32 %v3422_v23, %v11201_v4  ;;  %v3572_v32 = vadd.f32 %v8486_v26, %v3438_v60  ;;  %v6671_v4 = vld [vmem:[%s12365_s3 + $0xc20] sm:$0xff]  ;;  %7398 = vmatprep.subr.mxu1 %v5170_v41  ;;  %v5168_v26 = vld [vmem:[%s12367_s5 + $0xe8] sm:$0xff] }
 0x2dd   : > { %8942 = vmatpush3.msra.mxu0 %v6675_v24  ;;  %7399 = vmatpush3.msra.mxu1 %v5154_v38  ;;  %v5185_v24 = vld [vmem:[%s12367_s5 + $0x170] sm:$0xff]  ;;  %v5152_v60 = vld [vmem:[%s12367_s5 + $0x68] sm:$0xff]  ;;  %v5163_v41 = vld [vmem:[%s12367_s5 + $0xc0] sm:$0xff] }
 0x2de   : > { %8943 = vmatprep.subr.mxu0 %v6674_v42  ;;  %v3571_v52 = vadd.f32 %v3556_v59, %v3437_v29  ;;  %7400 = vmatprep.subr.mxu1 %v5169_v9  ;;  %v5167_v29 = vld [vmem:[%s12367_s5 + $0xe0] sm:$0xff]  ;;  %v5162_v9 = vld [vmem:[%s12367_s5 + $0xb8] sm:$0xff] }
 0x2df   : > { %8944 = vmatpush3.msra.mxu0 %v6674_v42  ;;  %v5184_v42 = vld [vmem:[%s12367_s5 + $0x168] sm:$0xff]  ;;  %7401 = vmatpush3.msra.mxu1 %v5153_v46  ;;  %v5183_v59 = vld [vmem:[%s12367_s5 + $0x160] sm:$0xff]  ;;  %v5146_v46 = vld [vmem:[%s12367_s5 + $0x38] sm:$0xff] }
 0x2e0   : > { %8945 = vmatprep.subr.mxu0 %v6673_v14  ;;  %7402 = vmatprep.subr.mxu1 %v5168_v26  ;;  %v5147_v38 = vld [vmem:[%s12367_s5 + $0x40] sm:$0xff]  ;;  %v5161_v26 = vld [vmem:[%s12367_s5 + $0xb0] sm:$0xff] }
 0x2e1   : > { %8946 = vmatpush3.msra.mxu0 %v6673_v14  ;;  %v5151_v14 = vld [vmem:[%s12367_s5 + $0x60] sm:$0xff]  ;;  %7403 = vmatpush3.msra.mxu1 %v5152_v60  ;;  %v5145_v60 = vld [vmem:[%s12367_s5 + $0x30] sm:$0xff] }
 0x2e2   : > { %8947 = vmatprep.subr.mxu0 %v6672_v57  ;;  %7404 = vmatprep.subr.mxu1 %v5167_v29  ;;  %v5192_v29 = vld [vmem:[%s12367_s5 + $0x1a8] sm:$0xff] }
 0x2e3   : > { %8948 = vmatpush3.msra.mxu0 %v6672_v57  ;;  %v5166_v57 = vld [vmem:[%s12367_s5 + $0xd8] sm:$0xff]  ;;  %7405 = vmatpush3.msra.mxu1 %v5151_v14  ;;  %v5176_v14 = vld [vmem:[%s12367_s5 + $0x128] sm:$0xff] }
 0x2e4   : > { %8949 = vmatprep.subr.mxu0 %v6671_v4  ;;  %7406 = vmatprep.subr.mxu1 %v5166_v57  ;;  %v5143_v57 = vld [vmem:[%s12367_s5 + $0x20] sm:$0xff] }
 0x2e5   : > { %8950 = vmatpush3.msra.mxu0 %v6671_v4  ;;  %v5198_v4 = vld [vmem:[%s12367_s5 + $0x1d8] sm:$0xff] }
 0x2e6   : > { %8951 = vmatprep.subr.mxu0 %v6670_v8 }
 0x2e7   : > { %8952 = vmatpush3.msra.mxu0 %v6670_v8 }
 0x2e8   : > { %8953 = vmatprep.subr.mxu0 %v6669_v0 }
 0x2e9   : > { %8954 = vmatpush3.msra.mxu0 %v6669_v0  ;;  %v5150_v0 = vld [vmem:[%s12367_s5 + $0x58] sm:$0xff] }
 0x2ea   : > { %8955 = vmatprep.subr.mxu0 %v6668_v40  ;;  %7407 = vmatpush3.msra.mxu1 %v5150_v0  ;;  %v5158_v0 = vld [vmem:[%s12367_s5 + $0x98] sm:$0xff] }
 0x2eb   : > { %8956 = vmatpush3.msra.mxu0 %v6668_v40  ;;  %v5182_v40 = vld [vmem:[%s12367_s5 + $0x158] sm:$0xff] }
 0x2ec   : > { %8957 = vmatprep.subr.mxu0 %v6667_v45  ;;  %v11351_v37 = vpop.f32.mrf.mxu1 }
 0x2ed   : > { %8958 = vmatpush3.msra.mxu0 %v6667_v45 }
 0x2ee   : > { %8960 = vmatmul.mubr.f32.vlgmr.msra.gmra.mxu0 %v10040_v56  ;;  %v11354_v3 = vpop.f32.mrf.mxu1  ;;  %v4909_v56 = vrot.slane %v11156_v62, 4  ;;  %7433 = vmatprep.subr.mxu0 %v5202_v51  ;;  %v5195_v51 = vld [vmem:[%s12367_s5 + $0x1c0] sm:$0xff] }
 0x2ef   : > { %8962 = vmatprep.mubr.f32.mxu0 %v10050_v12  ;;  %v8521_v33 = vpop.f32.mrf.mxu0 }
 0x2f0   : > { %v11358_v58 = vadd.f32 %v8521_v33, %v11262_v17  ;;  %v4911_v53 = vsel %vm2208_vm2, %v4909_v56, %v4910_v47 }
 0x2f1   : > { %v11360_v39 = vpop.f32.mrf.mxu1  ;;  %v3660_v22 = vpop.f32.mrf.mxu0 }
 0x2f2   : > { %8963 = vmatmul.mubr.f32.gmra.mxu0 %v10067_v6  ;;  %v11364_v28 = vadd.f32 %v3660_v22, %v11268_v44 }
 0x2f3   : > { %8965 = vmatprep.mubr.f32.mxu0 %v10297_v11  ;;  %v11368_v36 = vpop.f32.mrf.mxu1 }
 0x2f5   : > { %v8524_v13 = vpop.f32.mrf.mxu0 }
 0x2f6   : > { %8966 = vmatmul.mubr.f32.gmra.mxu0 %v10760_v19  ;;  %v11372_v12 = vadd.f32 %v8524_v13, %v11286_v30 }
 0x2f7   : > { %8968 = vmatprep.mubr.f32.mxu0 %v11033_v34  ;;  %v11376_v6 = vpop.f32.mrf.mxu0  ;;  %v8571_v17 = vpop.f32.mrf.mxu1 }
 0x2f9   : > { %v11380_v10 = vpop.f32.mrf.mxu1 }
 0x2fa   : > { %8969 = vmatmul.mubr.f32.gmra.mxu0 %v4911_v53 }
 0x2fb   : > { %v8527_v11 = vpop.f32.mrf.mxu0 }
 0x2fc   : > { %v3704_v62 = vadd.f32 %v8527_v11, %v11312_v7  ;;  %v5186_v7 = vld [vmem:[%s12367_s5 + $0x178] sm:$0xff] }
 0x2fd   : > { %v11382_v44 = vpop.f32.mrf.mxu0  ;;  %v8574_v27 = vpop.f32.mrf.mxu1  ;;  %7434 = vmatpush3.msra.mxu0 %v5186_v7  ;;  %v5179_v7 = vld [vmem:[%s12367_s5 + $0x140] sm:$0xff] }
 0x2fe   : > { %v3834_v19 = vadd.f32 %v8571_v17, %v3704_v62  ;;  %7435 = vmatprep.subr.mxu0 %v5201_v21  ;;  %v5194_v21 = vld [vmem:[%s12367_s5 + $0x1b8] sm:$0xff] }
 0x2ff   : > { %v3820_v54 = vpop.f32.mrf.mxu1  ;;  %7436 = vmatpush3.msra.mxu0 %v5185_v24  ;;  %v5178_v24 = vld [vmem:[%s12367_s5 + $0x138] sm:$0xff] }
 0x300   : > { %7437 = vmatprep.subr.mxu0 %v5200_v63  ;;  %v5193_v63 = vld [vmem:[%s12367_s5 + $0x1b0] sm:$0xff] }
 0x301   : > { %v8530_v31 = vpop.f32.mrf.mxu0  ;;  %7438 = vmatpush3.msra.mxu0 %v5184_v42  ;;  %v5177_v42 = vld [vmem:[%s12367_s5 + $0x130] sm:$0xff] }
 0x302   : > { %v3706_v61 = vadd.f32 %v8530_v31, %v3572_v32  ;;  %v5199_v32 = vld [vmem:[%s12367_s5 + $0x1e0] sm:$0xff]  ;;  %v5197_v31 = vld [vmem:[%s12367_s5 + $0x1d0] sm:$0xff] }
 0x303   : > { %v3690_v34 = vpop.f32.mrf.mxu0  ;;  %7439 = vmatprep.subr.mxu0 %v5199_v32  ;;  %v5144_v32 = vld [vmem:[%s12367_s5 + $0x28] sm:$0xff] }
 0x304   : > { %v3705_v43 = vadd.f32 %v3690_v34, %v3571_v52  ;;  %v3836_v48 = vadd.f32 %v8574_v27, %v3706_v61  ;;  %7440 = vmatpush3.msra.mxu0 %v5183_v59  ;;  %v5165_v27 = vld [vmem:[%s12367_s5 + $0xd0] sm:$0xff]  ;;  %v5159_v59 = vld [vmem:[%s12367_s5 + $0xa0] sm:$0xff] }
 0x305   : > { %7441 = vmatprep.subr.mxu0 %v5198_v4  ;;  %7408 = vmatprep.subr.mxu1 %v5165_v27  ;;  %v5149_v61 = vld [vmem:[%s12367_s5 + $0x50] sm:$0xff]  ;;  %v5175_v4 = vld [vmem:[%s12367_s5 + $0x120] sm:$0xff] }
 0x306   : > { %v3835_v30 = vadd.f32 %v3820_v54, %v3705_v43  ;;  %7442 = vmatpush3.msra.mxu0 %v5182_v40  ;;  %v5181_v34 = vld [vmem:[%s12367_s5 + $0x150] sm:$0xff]  ;;  %7409 = vmatpush3.msra.mxu1 %v5149_v61  ;;  %v5164_v43 = vld [vmem:[%s12367_s5 + $0xc8] sm:$0xff]  ;;  %v5190_v40 = vld [vmem:[%s12367_s5 + $0x198] sm:$0xff] }
 0x307   : > { %7443 = vmatprep.subr.mxu0 %v5197_v31  ;;  %7410 = vmatprep.subr.mxu1 %v5164_v43  ;;  %v5148_v54 = vld [vmem:[%s12367_s5 + $0x48] sm:$0xff]  ;;  %v5141_v27 = vld [vmem:[%s12367_s5 + $0x10] sm:$0xff] }
 0x308   : > { %7444 = vmatpush3.msra.mxu0 %v5181_v34  ;;  %7411 = vmatpush3.msra.mxu1 %v5148_v54  ;;  %v5173_v31 = vld [vmem:[%s12367_s5 + $0x110] sm:$0xff]  ;;  %v5156_v61 = vld [vmem:[%s12367_s5 + $0x88] sm:$0xff] }
 0x309   : > { %7412 = vmatprep.subr.mxu1 %v5163_v41  ;;  %v5188_v34 = vld [vmem:[%s12367_s5 + $0x188] sm:$0xff]  ;;  %v5187_v41 = vld [vmem:[%s12367_s5 + $0x180] sm:$0xff] }
 0x30a   : > { %7413 = vmatpush3.msra.mxu1 %v5147_v38  ;;  %v5172_v54 = vld [vmem:[%s12367_s5 + $0x108] sm:$0xff]  ;;  %v5139_v38 = vld [vmem:[%s12367_s5] sm:$0xff] }
 0x30b   : > { %7414 = vmatprep.subr.mxu1 %v5162_v9  ;;  %v5234_v9 = vld [vmem:[%s12367_s5 + $0x2f8] sm:$0xff] }
 0x30c   : > { %7415 = vmatpush3.msra.mxu1 %v5146_v46 }
 0x30d   : > { %7416 = vmatprep.subr.mxu1 %v5161_v26 }
 0x30e   : > { %7417 = vmatpush3.msra.mxu1 %v5145_v60 }
 0x314   : > { %v11384_v49 = vpop.f32.mrf.mxu1 }
 0x316   : > { %v11386_v35 = vpop.f32.mrf.mxu1 }
 0x317   : > { %v11388_v18 = vpop.f32.mrf.mxu0 }
 0x319   : > { %v11390_v25 = vpop.f32.mrf.mxu1  ;;  %v11392_v50 = vpop.f32.mrf.mxu0 }
 0x31b   : > { %v11394_v1 = vpop.f32.mrf.mxu1 }
 0x31d   : > { %v11396_v55 = vpop.f32.mrf.mxu0 }
 0x31f   : > { %v11416_v16 = vpop.f32.mrf.mxu0  ;;  %v8659_v23 = vpop.f32.mrf.mxu1 }
 0x321   : > { %v11460_v45 = vpop.f32.mrf.mxu1 }
 0x323   : > { %v8615_v52 = vpop.f32.mrf.mxu0 }
 0x324   : > { %v3970_v8 = vadd.f32 %v8615_v52, %v3834_v19  ;;  %v5191_v52 = vld [vmem:[%s12367_s5 + $0x1a0] sm:$0xff] }
 0x325   : > { %v11462_v33 = vpop.f32.mrf.mxu0  ;;  %v8662_v56 = vpop.f32.mrf.mxu1 }
 0x326   : > { %v11464_v22 = vadd.f32 %v8659_v23, %v3970_v8  ;;  %v5160_v23 = vld [vmem:[%s12367_s5 + $0xa8] sm:$0xff] }
 0x327   : > { %v4090_v62 = vpop.f32.mrf.mxu1  ;;  %7418 = vmatprep.subr.mxu1 %v5160_v23 }
 0x328   : > { %7419 = vmatpush3.msra.mxu1 %v5144_v32 }
 0x329   : > { %v8618_v13 = vpop.f32.mrf.mxu0  ;;  %7420 = vmatprep.subr.mxu1 %v5159_v59 }
 0x32a   : > { %v3972_v47 = vadd.f32 %v8618_v13, %v3836_v48  ;;  %v5196_v48 = vld [vmem:[%s12367_s5 + $0x1c8] sm:$0xff]  ;;  %7421 = vmatpush3.msra.mxu1 %v5143_v57  ;;  %v5174_v13 = vld [vmem:[%s12367_s5 + $0x118] sm:$0xff] }
 0x32b   : > { %v3956_v53 = vpop.f32.mrf.mxu0  ;;  %7445 = vmatprep.subr.mxu0 %v5196_v48  ;;  %7422 = vmatprep.subr.mxu1 %v5158_v0  ;;  %v5140_v48 = vld [vmem:[%s12367_s5 + $0x8] sm:$0xff] }
 0x32c   : > { %v3971_v17 = vadd.f32 %v3956_v53, %v3835_v30  ;;  %v11466_v11 = vadd.f32 %v8662_v56, %v3972_v47  ;;  %v5180_v30 = vld [vmem:[%s12367_s5 + $0x148] sm:$0xff]  ;;  %v5142_v56 = vld [vmem:[%s12367_s5 + $0x18] sm:$0xff]  ;;  %v5157_v47 = vld [vmem:[%s12367_s5 + $0x90] sm:$0xff] }
 0x32d   : > { %7446 = vmatpush3.msra.mxu0 %v5180_v30  ;;  %7423 = vmatpush3.msra.mxu1 %v5142_v56  ;;  %v5189_v53 = vld [vmem:[%s12367_s5 + $0x190] sm:$0xff]  ;;  %v5155_v30 = vld [vmem:[%s12367_s5 + $0x80] sm:$0xff] }
 0x32e   : > { %v11468_v19 = vadd.f32 %v4090_v62, %v3971_v17  ;;  %7447 = vmatprep.subr.mxu0 %v5195_v51  ;;  %7424 = vmatprep.subr.mxu1 %v5157_v47 }
 0x32f   : > { %7448 = vmatpush3.msra.mxu0 %v5179_v7  ;;  %7425 = vmatpush3.msra.mxu1 %v5141_v27  ;;  %v5171_v7 = vld [vmem:[%s12367_s5 + $0x100] sm:$0xff] }
 0x330   : > { %7449 = vmatprep.subr.mxu0 %v5194_v21  ;;  %7426 = vmatprep.subr.mxu1 %v5156_v61  ;;  %v5266_v21 = vld [vmem:[%s12367_s5 + $0x3f8] sm:$0xff] }
 0x331   : > { %7450 = vmatpush3.msra.mxu0 %v5178_v24  ;;  %7427 = vmatpush3.msra.mxu1 %v5140_v48 }
 0x332   : > { %7451 = vmatprep.subr.mxu0 %v5193_v63  ;;  %7428 = vmatprep.subr.mxu1 %v5155_v30 }
 0x333   : > { %7452 = vmatpush3.msra.mxu0 %v5177_v42  ;;  %7429 = vmatpush3.msra.mxu1 %v5139_v38 }
 0x334   : > { %7453 = vmatprep.subr.mxu0 %v5192_v29  ;;  %7468 = vmatprep.subr.mxu1 %v5234_v9 }
 0x335   : > { %7454 = vmatpush3.msra.mxu0 %v5176_v14 }
 0x336   : > { %7455 = vmatprep.subr.mxu0 %v5191_v52 }
 0x337   : > { %7456 = vmatpush3.msra.mxu0 %v5175_v4 }
 0x338   : > { %7457 = vmatprep.subr.mxu0 %v5190_v40 }
 0x339   : > { %7458 = vmatpush3.msra.mxu0 %v5174_v13 }
 0x33a   : > { %7459 = vmatprep.subr.mxu0 %v5189_v53 }
 0x33b   : > { %7460 = vmatpush3.msra.mxu0 %v5173_v31 }
 0x33c   : > { %v11554_v8 = vpop.f32.mrf.mxu1  ;;  %7461 = vmatprep.subr.mxu0 %v5188_v34 }
 0x33d   : > { %7462 = vmatpush3.msra.mxu0 %v5172_v54 }
 0x33e   : > { %v11574_v17 = vpop.f32.mrf.mxu1  ;;  %7463 = vmatprep.subr.mxu0 %v5187_v41 }
 0x33f   : > { %v11576_v62 = vpop.f32.mrf.mxu0  ;;  %7464 = vmatpush3.msra.mxu0 %v5171_v7 }
 0x340   : > { %7503 = vmatprep.subr.mxu0 %v5266_v21 }
 0x341   : > { %v11590_v43 = vpop.f32.mrf.mxu0  ;;  %v11604_v51 = vpop.f32.mrf.mxu1 }
 0x343   : > { %v11618_v24 = vpop.f32.mrf.mxu1 }
 0x345   : > { %v8700_v46 = vpop.f32.mrf.mxu0 }
 0x347   : > { %v4204_v26 = vpop.f32.mrf.mxu0  ;;  %v11620_v63 = vpop.f32.mrf.mxu1 }
 0x349   : > { %v11627_v29 = vpop.f32.mrf.mxu1 }
 0x34b   : > { %v8703_v60 = vpop.f32.mrf.mxu0 }
 0x34c   : > { %v11623_v42 = vadd.f32 %v8703_v60, %v11464_v22 }
 0x34d   : > { %v11625_v23 = vpop.f32.mrf.mxu0  ;;  %v8750_v59 = vpop.f32.mrf.mxu1 }
 0x34f   : > { %v11633_v0 = vpop.f32.mrf.mxu1 }
 0x351   : > { %v8706_v32 = vpop.f32.mrf.mxu0 }
 0x352   : > { %v4240_v14 = vadd.f32 %v8706_v32, %v11466_v11  ;;  %v3567_v32 = vadd.f32 %v11274_v5, %v11284_v15  ;;  %v3569_v5 = vadd.f32 %v11306_v2, %v11310_v20 }
 0x353   : > { %v4224_v52 = vpop.f32.mrf.mxu0 }
 0x354   : > { %v11631_v57 = vadd.f32 %v4224_v52, %v11468_v19  ;;  %v4374_v4 = vadd.f32 %v8750_v59, %v4240_v14  ;;  %v3830_v14 = vadd.f32 %v11351_v37, %v11358_v58  ;;  %v3701_v52 = vadd.f32 %v11376_v6, %v3567_v32 }
 0x356   : > { %v3831_v58 = vadd.f32 %v11368_v36, %v3701_v52 }
 0x364   : > { %v8829_v40 = vpop.f32.mrf.mxu1 }
 0x366   : > { %v11635_v56 = vpop.f32.mrf.mxu1 }
 0x367   : > { %v8785_v22 = vpop.f32.mrf.mxu0 }
 0x369   : > { %v4458_v13 = vpop.f32.mrf.mxu0  ;;  %v11637_v47 = vpop.f32.mrf.mxu1 }
 0x36b   : > { %v11639_v27 = vpop.f32.mrf.mxu1 }
 0x36d   : > { %v8788_v53 = vpop.f32.mrf.mxu0 }
 0x36f   : > { %v4468_v31 = vpop.f32.mrf.mxu0  ;;  %v11641_v11 = vpop.f32.mrf.mxu1 }
 0x371   : > { %v11645_v19 = vpop.f32.mrf.mxu1 }
 0x372   : > { %12382 = vst [vmem:[#allocation3_spill] sm:$0xff] %v11645_v19  ;;  %v3966_v19 = vadd.f32 %v11388_v18, %v3830_v14 }
 0x373   : > { %v8791_v61 = vpop.f32.mrf.mxu0 }
 0x374   : > { %v4100_v6 = vadd.f32 %v11384_v49, %v3966_v19 }
 0x375   : > { %v11643_v34 = vpop.f32.mrf.mxu0  ;;  %v8838_v30 = vpop.f32.mrf.mxu1 }
 0x379   : > { %v8794_v48 = vpop.f32.mrf.mxu0 }
 0x37a   : > { %v4504_v54 = vadd.f32 %v8794_v48, %v4374_v4  ;;  %v3829_v4 = vadd.f32 %v11354_v3, %v11364_v28  ;;  %v3703_v3 = vadd.f32 %v11382_v44, %v3569_v5  ;;  %v3967_v28 = vadd.f32 %v11416_v16, %v3831_v58 }
 0x37b   : > { %v11647_v38 = vpop.f32.mrf.mxu0 }
 0x37c   : > { %v4640_v41 = vadd.f32 %v8838_v30, %v4504_v54  ;;  %v3965_v54 = vadd.f32 %v11392_v50, %v3829_v4  ;;  %v3832_v30 = vadd.f32 %v11360_v39, %v11372_v12  ;;  %v4234_v50 = vadd.f32 %v11576_v62, %v4100_v6  ;;  %v4624_v12 = vpop.f32.mrf.mxu1 }
 0x37d   : > { %v3833_v36 = vadd.f32 %v11380_v10, %v3703_v3  ;;  %v4101_v49 = vadd.f32 %v11394_v1, %v3967_v28 }
 0x37e   : > { %v3968_v37 = vadd.f32 %v11396_v55, %v3832_v30  ;;  %v4099_v39 = vadd.f32 %v11386_v35, %v3965_v54  ;;  %v4368_v19 = vadd.f32 %v11554_v8, %v4234_v50 }
 0x37f   : > { %v3969_v44 = vadd.f32 %v11462_v33, %v3833_v36  ;;  %v4235_v16 = vadd.f32 %v4204_v26, %v4101_v49  ;;  %v4372_v33 = vadd.f32 %v11620_v63, %v11623_v42  ;;  %v6683_v63 = vld [vmem:[%s12366_s4] ss:$0 sm:$0xff] }
 0x380   : > { %v4233_v2 = vadd.f32 %v11590_v43, %v4099_v39  ;;  %v4102_v20 = vadd.f32 %v11390_v25, %v3968_v37  ;;  %v12383_v37 = vld [vmem:[#allocation3_spill] sm:$0xff] }
 0x381   : > { %v4103_v25 = vadd.f32 %v11460_v45, %v3969_v44  ;;  %v4369_v10 = vadd.f32 %v11618_v24, %v4235_v16 }
 0x382   : > { %v4236_v32 = vadd.f32 %v8700_v46, %v4102_v20  ;;  %v4367_v62 = vadd.f32 %v11574_v17, %v4233_v2 }
 0x383   : > { %v4237_v1 = vadd.f32 %v11625_v23, %v4103_v25  ;;  %v4499_v8 = vadd.f32 %v4468_v31, %v4369_v10 }
 0x384   : > { %v4497_v14 = vadd.f32 %v4458_v13, %v4367_v62  ;;  %v4370_v43 = vadd.f32 %v11604_v51, %v4236_v32 }
 0x385   : > { %v4371_v45 = vadd.f32 %v11627_v29, %v4237_v1  ;;  %v4373_v29 = vadd.f32 %v11633_v0, %v11631_v57 }
 0x386   : > { %v4500_v52 = vadd.f32 %v8788_v53, %v4370_v43  ;;  %v4633_v17 = vadd.f32 %v11635_v56, %v4497_v14 }
 0x387   : > { %v4501_v23 = vadd.f32 %v11643_v34, %v4371_v45  ;;  %v4503_v34 = vadd.f32 %v11647_v38, %v4373_v29 }
 0x388   : > { %v4636_v51 = vadd.f32 %v11637_v47, %v4500_v52 }
 0x389   : > { %v4637_v58 = vadd.f32 %v12383_v37, %v4501_v23 }
 0x38c   : > { %v8917_v55 = vpop.f32.mrf.mxu1 }
 0x38e   : > { %v8873_v7 = vpop.f32.mrf.mxu0  ;;  %v4862_v35 = vpop.f32.mrf.mxu1 }
 0x390   : > { %v4728_v9 = vpop.f32.mrf.mxu0  ;;  %v8920_v4 = vpop.f32.mrf.mxu1 }
 0x391   : > { %v4767_v13 = vadd.f32 %v4728_v9, %v4633_v17 }
 0x392   : > { %v8876_v21 = vpop.f32.mrf.mxu0  ;;  %v4872_v54 = vpop.f32.mrf.mxu1 }
 0x393   : > { %v4770_v24 = vadd.f32 %v8876_v21, %v4636_v51  ;;  %v4901_v47 = vadd.f32 %v4862_v35, %v4767_v13 }
 0x394   : > { %v4738_v60 = vpop.f32.mrf.mxu0  ;;  %v8923_v42 = vpop.f32.mrf.mxu1 }
 0x396   : > { %v8879_v59 = vpop.f32.mrf.mxu0  ;;  %v4882_v3 = vpop.f32.mrf.mxu1 }
 0x398   : > { %v11657_v48 = vpop.f32.mrf.mxu0  ;;  %v8926_v49 = vpop.f32.mrf.mxu1 }
 0x399   : > { %v4771_v39 = vadd.f32 %v11657_v48, %v4637_v58  ;;  %v5250_v58 = vld [vmem:[%s12367_s5 + $0x378] sm:$0xff] }
 0x39a   : > { %v8882_v15 = vpop.f32.mrf.mxu0 }
 0x39b   : > { %v11667_v18 = vadd.f32 %v8882_v15, %v4640_v41  ;;  %v4498_v41 = vadd.f32 %v8785_v22, %v4368_v19  ;;  %v4502_v22 = vadd.f32 %v8791_v61, %v4372_v33  ;;  %v4904_v15 = vadd.f32 %v8920_v4, %v4770_v24 }
 0x39c   : > { %v4758_v53 = vpop.f32.mrf.mxu0  ;;  %v4905_v62 = vadd.f32 %v4882_v3, %v4771_v39  ;;  %v5265_v3 = vld [vmem:[%s12367_s5 + $0x3f0] sm:$0xff] }
 0x39d   : > { %v4634_v46 = vadd.f32 %v8829_v40, %v4498_v41  ;;  %v4635_v40 = vadd.f32 %v11639_v27, %v4499_v8  ;;  %v4638_v61 = vadd.f32 %v11641_v11, %v4502_v22  ;;  %v4908_v25 = vadd.f32 %v8926_v49, %v11667_v18  ;;  %v5249_v39 = vld [vmem:[%s12367_s5 + $0x370] sm:$0xff]  ;;  %v5248_v49 = vld [vmem:[%s12367_s5 + $0x368] sm:$0xff] }
 0x39f   : > { %v4768_v26 = vadd.f32 %v8873_v7, %v4634_v46  ;;  %v4769_v56 = vadd.f32 %v4738_v60, %v4635_v40  ;;  %v4772_v21 = vadd.f32 %v8879_v59, %v4638_v61 }
 0x3a1   : > { %v4902_v30 = vadd.f32 %v8917_v55, %v4768_v26  ;;  %v4903_v11 = vadd.f32 %v4872_v54, %v4769_v56  ;;  %v4906_v59 = vadd.f32 %v8923_v42, %v4772_v21  ;;  %v4639_v55 = vadd.f32 %v4624_v12, %v4503_v34  ;;  %v4892_v12 = vpop.f32.mrf.mxu1 }
 0x3a3   : > { %v4773_v41 = vadd.f32 %v4758_v53, %v4639_v55 }
 0x3a5   : > { %v4907_v17 = vadd.f32 %v4892_v12, %v4773_v41  ;;  %v5247_v41 = vld [vmem:[%s12367_s5 + $0x360] sm:$0xff]  ;;  %v5260_v12 = vld [vmem:[%s12367_s5 + $0x3c8] sm:$0xff] }
 0x3ae   : > { %v8961_v31 = vpop.f32.mrf.mxu0 }
 0x3af   : > { %v5036_v7 = vadd.f32 %v8961_v31, %v4902_v30 }
 0x3b0   : > { %v4996_v9 = vpop.f32.mrf.mxu0 }
 0x3b1   : > { %v5051_v27 = vadd.f32 %v6683_v63, %v5036_v7  ;;  %v5035_v5 = vadd.f32 %v4996_v9, %v4901_v47 }
 0x3b2   : > { %v8964_v6 = vpop.f32.mrf.mxu0 }
 0x3b3   : > { %v5059_v28 = vmax.f32 %v5051_v27, 0.0  ;;  %v5050_v60 = vadd.f32 %v6683_v63, %v5035_v5  ;;  %v5038_v50 = vadd.f32 %v8964_v6, %v4904_v15  ;;  %v5218_v15 = vld [vmem:[%s12367_s5 + $0x278] sm:$0xff]  ;;  %v5233_v6 = vld [vmem:[%s12367_s5 + $0x2f0] sm:$0xff] }
 0x3b4   : > { %v5006_v2 = vpop.f32.mrf.mxu0 }
 0x3b5   : > { %v5058_v20 = vmax.f32 %v5050_v60, 0.0  ;;  %v5053_v57 = vadd.f32 %v6683_v63, %v5038_v50  ;;  %v5037_v0 = vadd.f32 %v5006_v2, %v4903_v11  ;;  %v5075_v36 = vrot.slane %v5059_v28, 1  ;;  %v5232_v2 = vld [vmem:[%s12367_s5 + $0x2e8] sm:$0xff] }
 0x3b6   : > { %v8967_v32 = vpop.f32.mrf.mxu0 }
 0x3b7   : > { %v5074_v38 = vrot.slane %v5058_v20, 1  ;;  %v5061_v19 = vmax.f32 %v5053_v57, 0.0  ;;  %v5052_v44 = vadd.f32 %v6683_v63, %v5037_v0  ;;  %v5040_v16 = vadd.f32 %v8967_v32, %v4906_v59  ;;  %v5264_v59 = vld [vmem:[%s12367_s5 + $0x3e8] sm:$0xff] }
 0x3b8   : > { %v5016_v35 = vpop.f32.mrf.mxu0 }
 0x3b9   : > { %v5076_v14 = vsel %vm1608_vm1, %v5074_v38, %v5075_v36  ;;  %v5060_v43 = vmax.f32 %v5052_v44, 0.0  ;;  %v5055_v48 = vadd.f32 %v6683_v63, %v5040_v16  ;;  %v5039_v10 = vadd.f32 %v5016_v35, %v4905_v62  ;;  %v5263_v44 = vld [vmem:[%s12367_s5 + $0x3e0] sm:$0xff]  ;;  %v5230_v62 = vld [vmem:[%s12367_s5 + $0x2d8] sm:$0xff] }
 0x3ba   : > { %v5099_v52 = vmax.f32 %v5058_v20, %v5076_v14  ;;  %v8970_v46 = vpop.f32.mrf.mxu0  ;;  %v5079_v4 = vrot.slane %v5061_v19, 1  ;;  %v5215_v16 = vld [vmem:[%s12367_s5 + $0x260] sm:$0xff]  ;;  %v5262_v35 = vld [vmem:[%s12367_s5 + $0x3d8] sm:$0xff] }
 0x3bb   : > { %v5077_v1 = vrot.slane %v5060_v43, 1  ;;  %v5042_v8 = vadd.f32 %v8970_v46, %v4908_v25  ;;  %v5063_v33 = vmax.f32 %v5055_v48, 0.0  ;;  %v5054_v26 = vadd.f32 %v6683_v63, %v5039_v10  ;;  %v5214_v14 = vld [vmem:[%s12367_s5 + $0x258] sm:$0xff]  ;;  %v5229_v48 = vld [vmem:[%s12367_s5 + $0x2d0] sm:$0xff]  ;;  %v5228_v46 = vld [vmem:[%s12367_s5 + $0x2c8] sm:$0xff] }
 0x3bc   : > { %v5026_v22 = vpop.f32.mrf.mxu0  ;;  %v5261_v25 = vld [vmem:[%s12367_s5 + $0x3d0] sm:$0xff] }
 0x3bd   : > { %v5078_v13 = vsel %vm1608_vm1, %v5075_v36, %v5077_v1  ;;  %v5080_v54 = vsel %vm1608_vm1, %v5077_v1, %v5079_v4  ;;  %v5057_v51 = vadd.f32 %v6683_v63, %v5042_v8  ;;  %v5062_v24 = vmax.f32 %v5054_v26, 0.0  ;;  %v5216_v36 = vld [vmem:[%s12367_s5 + $0x268] sm:$0xff]  ;;  %v5245_v10 = vld [vmem:[%s12367_s5 + $0x350] sm:$0xff]  ;;  %v5227_v8 = vld [vmem:[%s12367_s5 + $0x2c0] sm:$0xff] }
 0x3be   : > { %v5100_v45 = vmax.f32 %v5059_v28, %v5078_v13  ;;  %v5101_v53 = vmax.f32 %v5060_v43, %v5080_v54  ;;  %v5041_v18 = vadd.f32 %v5026_v22, %v4907_v17  ;;  %v5083_v30 = vrot.slane %v5063_v33, 1  ;;  %v5217_v28 = vld [vmem:[%s12367_s5 + $0x270] sm:$0xff]  ;;  %v5246_v43 = vld [vmem:[%s12367_s5 + $0x358] sm:$0xff]  ;;  %v5244_v1 = vld [vmem:[%s12367_s5 + $0x348] sm:$0xff] }
 0x3bf   : > { %v5065_v40 = vmax.f32 %v5057_v51, 0.0  ;;  %v5081_v23 = vrot.slane %v5062_v24, 1  ;;  %v5211_v26 = vld [vmem:[%s12367_s5 + $0x240] sm:$0xff]  ;;  %v5226_v22 = vld [vmem:[%s12367_s5 + $0x2b8] sm:$0xff] }
 0x3c0   : > { %v5056_v31 = vadd.f32 %v6683_v63, %v5041_v18  ;;  %v5107_v42 = vmax.f32 %v5099_v52, %v5100_v45  ;;  %v5213_v52 = vld [vmem:[%s12367_s5 + $0x250] sm:$0xff]  ;;  %v5243_v17 = vld [vmem:[%s12367_s5 + $0x340] sm:$0xff]  ;;  %v5258_v13 = vld [vmem:[%s12367_s5 + $0x3b8] sm:$0xff] }
 0x3c1   : > { %v5087_v56 = vrot.slane %v5065_v40, 1  ;;  %v5082_v61 = vsel %vm1608_vm1, %v5079_v4, %v5081_v23  ;;  %v5084_v7 = vsel %vm1608_vm1, %v5081_v23, %v5083_v30  ;;  %v5212_v4 = vld [vmem:[%s12367_s5 + $0x248] sm:$0xff]  ;;  %v5210_v54 = vld [vmem:[%s12367_s5 + $0x238] sm:$0xff]  ;;  %v5225_v45 = vld [vmem:[%s12367_s5 + $0x2b0] sm:$0xff] }
 0x3c2   : > { %v5064_v47 = vmax.f32 %v5056_v31, 0.0  ;;  %v5112_v29 = vrot.slane %v5107_v42, 2  ;;  %v5102_v9 = vmax.f32 %v5061_v19, %v5082_v61  ;;  %v5103_v21 = vmax.f32 %v5062_v24, %v5084_v7  ;;  %v5242_v51 = vld [vmem:[%s12367_s5 + $0x338] sm:$0xff]  ;;  %v5209_v24 = vld [vmem:[%s12367_s5 + $0x230] sm:$0xff]  ;;  %v5208_v23 = vld [vmem:[%s12367_s5 + $0x228] sm:$0xff] }
 0x3c3   : > { %v5098_v27 = vsel %vm1608_vm1, %v5087_v56, %v5074_v38  ;;  %v5116_v5 = vrot.slane %v5107_v42, 6  ;;  %v5114_v63 = vrot.slane %v5107_v42, 4  ;;  %v5231_v38 = vld [vmem:[%s12367_s5 + $0x2e0] sm:$0xff]  ;;  %v5241_v18 = vld [vmem:[%s12367_s5 + $0x330] sm:$0xff]  ;;  %v5240_v31 = vld [vmem:[%s12367_s5 + $0x328] sm:$0xff] }
 0x3c4   : > { %v5106_v34 = vmax.f32 %v5065_v40, %v5098_v27  ;;  %v5085_v37 = vrot.slane %v5064_v47, 1  ;;  %5460 = vmatprep.mubr.f32.mxu1 %v5112_v29  ;;  %v11722_v60 = vmax.f32 %v5101_v53, %v5102_v9  ;;  %v5257_v53 = vld [vmem:[%s12367_s5 + $0x3b0] sm:$0xff]  ;;  %v5224_v40 = vld [vmem:[%s12367_s5 + $0x2a8] sm:$0xff]  ;;  %v5207_v61 = vld [vmem:[%s12367_s5 + $0x220] sm:$0xff] }
 0x3c5   : > { %5530 = vmatprep.mubr.f32.mxu0 %v5116_v5  ;;  %5461 = vmatmul.mubr.f32.vlgmr.msra.gmra.mxu1 %v5107_v42  ;;  %v5223_v42 = vld [vmem:[%s12367_s5 + $0x2a0] sm:$0xff]  ;;  %v5254_v29 = vld [vmem:[%s12367_s5 + $0x398] sm:$0xff]  ;;  %v5221_v27 = vld [vmem:[%s12367_s5 + $0x290] sm:$0xff] }
 0x3c6   : > { %v5086_v50 = vsel %vm1608_vm1, %v5083_v30, %v5085_v37  ;;  %v5088_v11 = vsel %vm1608_vm1, %v5085_v37, %v5087_v56  ;;  %5531 = vmatmul.mubr.f32.vlgmr.msra.gmra.mxu0 %v5114_v63  ;;  %7469 = vmatpush3.msra.mxu1 %v5218_v15  ;;  %v5119_v0 = vrot.slane %v11722_v60, 2  ;;  %v5123_v55 = vrot.slane %v11722_v60, 6  ;;  %v5256_v30 = vld [vmem:[%s12367_s5 + $0x3a8] sm:$0xff]  ;;  %v5255_v56 = vld [vmem:[%s12367_s5 + $0x3a0] sm:$0xff]  ;;  %v5206_v9 = vld [vmem:[%s12367_s5 + $0x218] sm:$0xff] }
 0x3c7   : > { %v5104_v20 = vmax.f32 %v5063_v33, %v5086_v50  ;;  %v5105_v57 = vmax.f32 %v5064_v47, %v5088_v11  ;;  %7504 = vmatpush3.msra.mxu0 %v5250_v58  ;;  %7470 = vmatprep.subr.mxu1 %v5233_v6  ;;  %v5259_v33 = vld [vmem:[%s12367_s5 + $0x3c0] sm:$0xff]  ;;  %v5222_v47 = vld [vmem:[%s12367_s5 + $0x298] sm:$0xff]  ;;  %v5253_v5 = vld [vmem:[%s12367_s5 + $0x390] sm:$0xff] }
 0x3c8   : > { %7505 = vmatprep.subr.mxu0 %v5265_v3  ;;  %7471 = vmatpush3.msra.mxu1 %v5217_v28  ;;  %v5239_v7 = vld [vmem:[%s12367_s5 + $0x320] sm:$0xff]  ;;  %v5205_v15 = vld [vmem:[%s12367_s5 + $0x210] sm:$0xff]  ;;  %v5220_v37 = vld [vmem:[%s12367_s5 + $0x288] sm:$0xff] }
 0x3c9   : > { %v11740_v32 = vmax.f32 %v5105_v57, %v5106_v34  ;;  %7506 = vmatpush3.msra.mxu0 %v5249_v39  ;;  %7472 = vmatprep.subr.mxu1 %v5232_v2  ;;  %v11748_v19 = vmax.f32 %v5103_v21, %v5104_v20  ;;  %v5238_v21 = vld [vmem:[%s12367_s5 + $0x318] sm:$0xff]  ;;  %v5237_v34 = vld [vmem:[%s12367_s5 + $0x310] sm:$0xff]  ;;  %v5252_v63 = vld [vmem:[%s12367_s5 + $0x388] sm:$0xff]  ;;  %v5121_v2 = vrot.slane %v11722_v60, 4 }
 0x3ca   : > { %5600 = vmatprep.mubr.f32.mxu1 %v5119_v0  ;;  %7507 = vmatprep.subr.mxu0 %v5264_v59  ;;  %v5204_v58 = vld [vmem:[%s12367_s5 + $0x208] sm:$0xff]  ;;  %v5219_v3 = vld [vmem:[%s12367_s5 + $0x280] sm:$0xff]  ;;  %v5298_v39 = vld [vmem:[%s12367_s5 + $0x4f8] sm:$0xff] }
 0x3cb   : > { %5670 = vmatprep.mubr.f32.mxu0 %v5123_v55  ;;  %7473 = vmatpush3.msra.mxu1 %v5216_v36  ;;  %v5236_v6 = vld [vmem:[%s12367_s5 + $0x308] sm:$0xff]  ;;  %v5251_v28 = vld [vmem:[%s12367_s5 + $0x380] sm:$0xff]  ;;  %v5330_v20 = vld [vmem:[%s12367_s5 + $0x5f8] sm:$0xff]  ;;  %v5126_v59 = vrot.slane %v11748_v19, 2  ;;  %v5130_v36 = vrot.slane %v11748_v19, 6 }
 0x3cc   : > { %7508 = vmatpush3.msra.mxu0 %v5248_v49  ;;  %7474 = vmatprep.subr.mxu1 %v5231_v38  ;;  %v5203_v50 = vld [vmem:[%s12367_s5 + $0x200] sm:$0xff]  ;;  %v5282_v57 = vld [vmem:[%s12367_s5 + $0x478] sm:$0xff]  ;;  %v5297_v55 = vld [vmem:[%s12367_s5 + $0x4f0] sm:$0xff] }
 0x3cd   : > { %7509 = vmatprep.subr.mxu0 %v5263_v44  ;;  %7475 = vmatpush3.msra.mxu1 %v5215_v16  ;;  %v5235_v11 = vld [vmem:[%s12367_s5 + $0x300] sm:$0xff]  ;;  %v5314_v0 = vld [vmem:[%s12367_s5 + $0x578] sm:$0xff]  ;;  %v5281_v49 = vld [vmem:[%s12367_s5 + $0x470] sm:$0xff] }
 0x3ce   : > { %7510 = vmatpush3.msra.mxu0 %v5247_v41  ;;  %7476 = vmatprep.subr.mxu1 %v5230_v62  ;;  %v5313_v38 = vld [vmem:[%s12367_s5 + $0x570] sm:$0xff]  ;;  %v5296_v44 = vld [vmem:[%s12367_s5 + $0x4e8] sm:$0xff] }
 0x3cf   : > { %7511 = vmatprep.subr.mxu0 %v5262_v35  ;;  %7477 = vmatpush3.msra.mxu1 %v5214_v14  ;;  %v5328_v16 = vld [vmem:[%s12367_s5 + $0x5e8] sm:$0xff]  ;;  %v5295_v35 = vld [vmem:[%s12367_s5 + $0x4e0] sm:$0xff] }
 0x3d0   : > { %7512 = vmatpush3.msra.mxu0 %v5246_v43  ;;  %7478 = vmatprep.subr.mxu1 %v5229_v48  ;;  %v5280_v41 = vld [vmem:[%s12367_s5 + $0x468] sm:$0xff]  ;;  %v5327_v14 = vld [vmem:[%s12367_s5 + $0x5e0] sm:$0xff] }
 0x3d1   : > { %7513 = vmatprep.subr.mxu0 %v5261_v25  ;;  %7479 = vmatpush3.msra.mxu1 %v5213_v52  ;;  %v5312_v62 = vld [vmem:[%s12367_s5 + $0x568] sm:$0xff]  ;;  %v5279_v43 = vld [vmem:[%s12367_s5 + $0x460] sm:$0xff]  ;;  %v5294_v25 = vld [vmem:[%s12367_s5 + $0x4d8] sm:$0xff] }
 0x3d2   : > { %7514 = vmatpush3.msra.mxu0 %v5245_v10  ;;  %7480 = vmatprep.subr.mxu1 %v5228_v46  ;;  %v5311_v48 = vld [vmem:[%s12367_s5 + $0x560] sm:$0xff]  ;;  %v5326_v52 = vld [vmem:[%s12367_s5 + $0x5d8] sm:$0xff] }
 0x3d3   : > { %7515 = vmatprep.subr.mxu0 %v5260_v12  ;;  %7481 = vmatpush3.msra.mxu1 %v5212_v4  ;;  %v5278_v10 = vld [vmem:[%s12367_s5 + $0x458] sm:$0xff]  ;;  %v5293_v12 = vld [vmem:[%s12367_s5 + $0x4d0] sm:$0xff] }
 0x3d4   : > { %7516 = vmatpush3.msra.mxu0 %v5244_v1  ;;  %7482 = vmatprep.subr.mxu1 %v5227_v8  ;;  %v5310_v46 = vld [vmem:[%s12367_s5 + $0x558] sm:$0xff]  ;;  %v5325_v4 = vld [vmem:[%s12367_s5 + $0x5d0] sm:$0xff] }
 0x3d5   : > { %7517 = vmatprep.subr.mxu0 %v5259_v33  ;;  %7483 = vmatpush3.msra.mxu1 %v5211_v26  ;;  %v5277_v1 = vld [vmem:[%s12367_s5 + $0x450] sm:$0xff]  ;;  %v5292_v33 = vld [vmem:[%s12367_s5 + $0x4c8] sm:$0xff] }
 0x3d6   : > { %7518 = vmatpush3.msra.mxu0 %v5243_v17  ;;  %7484 = vmatprep.subr.mxu1 %v5226_v22  ;;  %v5309_v8 = vld [vmem:[%s12367_s5 + $0x550] sm:$0xff]  ;;  %v5324_v26 = vld [vmem:[%s12367_s5 + $0x5c8] sm:$0xff] }
 0x3d7   : > { %7519 = vmatprep.subr.mxu0 %v5258_v13  ;;  %7485 = vmatpush3.msra.mxu1 %v5210_v54  ;;  %v5276_v17 = vld [vmem:[%s12367_s5 + $0x448] sm:$0xff]  ;;  %v5291_v13 = vld [vmem:[%s12367_s5 + $0x4c0] sm:$0xff] }
 0x3d8   : > { %7520 = vmatpush3.msra.mxu0 %v5242_v51  ;;  %7486 = vmatprep.subr.mxu1 %v5225_v45  ;;  %v5308_v22 = vld [vmem:[%s12367_s5 + $0x548] sm:$0xff]  ;;  %v5323_v54 = vld [vmem:[%s12367_s5 + $0x5c0] sm:$0xff] }
 0x3d9   : > { %7521 = vmatprep.subr.mxu0 %v5257_v53  ;;  %7487 = vmatpush3.msra.mxu1 %v5209_v24  ;;  %v5275_v51 = vld [vmem:[%s12367_s5 + $0x440] sm:$0xff]  ;;  %v5290_v53 = vld [vmem:[%s12367_s5 + $0x4b8] sm:$0xff] }
 0x3da   : > { %7522 = vmatpush3.msra.mxu0 %v5241_v18  ;;  %7488 = vmatprep.subr.mxu1 %v5224_v40  ;;  %v5307_v45 = vld [vmem:[%s12367_s5 + $0x540] sm:$0xff]  ;;  %v5322_v24 = vld [vmem:[%s12367_s5 + $0x5b8] sm:$0xff] }
 0x3db   : > { %7523 = vmatprep.subr.mxu0 %v5256_v30  ;;  %7489 = vmatpush3.msra.mxu1 %v5208_v23  ;;  %v5274_v18 = vld [vmem:[%s12367_s5 + $0x438] sm:$0xff]  ;;  %v5289_v30 = vld [vmem:[%s12367_s5 + $0x4b0] sm:$0xff] }
 0x3dc   : > { %7524 = vmatpush3.msra.mxu0 %v5240_v31  ;;  %7490 = vmatprep.subr.mxu1 %v5223_v42  ;;  %v5306_v40 = vld [vmem:[%s12367_s5 + $0x538] sm:$0xff]  ;;  %v5321_v23 = vld [vmem:[%s12367_s5 + $0x5b0] sm:$0xff] }
 0x3dd   : > { %7525 = vmatprep.subr.mxu0 %v5255_v56  ;;  %7491 = vmatpush3.msra.mxu1 %v5207_v61  ;;  %v5273_v31 = vld [vmem:[%s12367_s5 + $0x430] sm:$0xff]  ;;  %v5288_v56 = vld [vmem:[%s12367_s5 + $0x4a8] sm:$0xff] }
 0x3de   : > { %7526 = vmatpush3.msra.mxu0 %v5239_v7  ;;  %7492 = vmatprep.subr.mxu1 %v5222_v47  ;;  %v5305_v42 = vld [vmem:[%s12367_s5 + $0x530] sm:$0xff]  ;;  %v5320_v61 = vld [vmem:[%s12367_s5 + $0x5a8] sm:$0xff] }
 0x3df   : > { %7527 = vmatprep.subr.mxu0 %v5254_v29  ;;  %7493 = vmatpush3.msra.mxu1 %v5206_v9  ;;  %v5272_v7 = vld [vmem:[%s12367_s5 + $0x428] sm:$0xff]  ;;  %v5287_v29 = vld [vmem:[%s12367_s5 + $0x4a0] sm:$0xff] }
 0x3e0   : > { %7528 = vmatpush3.msra.mxu0 %v5238_v21  ;;  %7494 = vmatprep.subr.mxu1 %v5221_v27  ;;  %v5304_v47 = vld [vmem:[%s12367_s5 + $0x528] sm:$0xff]  ;;  %v5319_v9 = vld [vmem:[%s12367_s5 + $0x5a0] sm:$0xff] }
 0x3e1   : > { %7529 = vmatprep.subr.mxu0 %v5253_v5  ;;  %7495 = vmatpush3.msra.mxu1 %v5205_v15  ;;  %v5271_v21 = vld [vmem:[%s12367_s5 + $0x420] sm:$0xff]  ;;  %v5286_v5 = vld [vmem:[%s12367_s5 + $0x498] sm:$0xff] }
 0x3e2   : > { %7530 = vmatpush3.msra.mxu0 %v5237_v34  ;;  %7496 = vmatprep.subr.mxu1 %v5220_v37  ;;  %v5303_v27 = vld [vmem:[%s12367_s5 + $0x520] sm:$0xff]  ;;  %v5318_v15 = vld [vmem:[%s12367_s5 + $0x598] sm:$0xff] }
 0x3e3   : > { %7531 = vmatprep.subr.mxu0 %v5252_v63  ;;  %7497 = vmatpush3.msra.mxu1 %v5204_v58  ;;  %v5270_v34 = vld [vmem:[%s12367_s5 + $0x418] sm:$0xff]  ;;  %v5285_v63 = vld [vmem:[%s12367_s5 + $0x490] sm:$0xff] }
 0x3e4   : > { %7532 = vmatpush3.msra.mxu0 %v5236_v6  ;;  %7498 = vmatprep.subr.mxu1 %v5219_v3  ;;  %v5302_v37 = vld [vmem:[%s12367_s5 + $0x518] sm:$0xff]  ;;  %v5317_v58 = vld [vmem:[%s12367_s5 + $0x590] sm:$0xff] }
 0x3e5   : > { %7533 = vmatprep.subr.mxu0 %v5251_v28  ;;  %7499 = vmatpush3.msra.mxu1 %v5203_v50  ;;  %v5269_v6 = vld [vmem:[%s12367_s5 + $0x410] sm:$0xff]  ;;  %v5284_v28 = vld [vmem:[%s12367_s5 + $0x488] sm:$0xff] }
 0x3e6   : > { %7534 = vmatpush3.msra.mxu0 %v5235_v11  ;;  %5601 = vmatmul.mubr.f32.vlgmr.msra.gmra.mxu1 %v11722_v60  ;;  %v5329_v60 = vld [vmem:[%s12367_s5 + $0x5f0] sm:$0xff]  ;;  %v5316_v50 = vld [vmem:[%s12367_s5 + $0x588] sm:$0xff] }
 0x3e7   : > { %5671 = vmatmul.mubr.f32.vlgmr.msra.gmra.mxu0 %v5121_v2  ;;  %7538 = vmatprep.subr.mxu1 %v5298_v39  ;;  %v5301_v3 = vld [vmem:[%s12367_s5 + $0x510] sm:$0xff]  ;;  %v5268_v11 = vld [vmem:[%s12367_s5 + $0x408] sm:$0xff]  ;;  %v5283_v2 = vld [vmem:[%s12367_s5 + $0x480] sm:$0xff] }
 0x3e8   : > { %7573 = vmatprep.subr.mxu0 %v5330_v20  ;;  %7539 = vmatpush3.msra.mxu1 %v5282_v57  ;;  %v5300_v39 = vld [vmem:[%s12367_s5 + $0x508] sm:$0xff]  ;;  %v5315_v20 = vld [vmem:[%s12367_s5 + $0x580] sm:$0xff] }
 0x3e9   : > { %5740 = vmatprep.mubr.f32.mxu1 %v5126_v59  ;;  %7574 = vmatpush3.msra.mxu0 %v5314_v0  ;;  %v5267_v57 = vld [vmem:[%s12367_s5 + $0x400] sm:$0xff]  ;;  %v5362_v59 = vld [vmem:[%s12367_s5 + $0x6f8] sm:$0xff] }
 0x3ea   : > { %5810 = vmatprep.mubr.f32.mxu0 %v5130_v36  ;;  %7540 = vmatprep.subr.mxu1 %v5297_v55  ;;  %v5299_v0 = vld [vmem:[%s12367_s5 + $0x500] sm:$0xff]  ;;  %v5128_v55 = vrot.slane %v11748_v19, 4  ;;  %v5394_v36 = vld [vmem:[%s12367_s5 + $0x7f8] sm:$0xff] }
 0x3eb   : > { %7575 = vmatprep.subr.mxu0 %v5329_v60  ;;  %7541 = vmatpush3.msra.mxu1 %v5281_v49  ;;  %v5346_v60 = vld [vmem:[%s12367_s5 + $0x678] sm:$0xff] }
 0x3ec   : > { %7576 = vmatpush3.msra.mxu0 %v5313_v38  ;;  %7542 = vmatprep.subr.mxu1 %v5296_v44  ;;  %v5378_v49 = vld [vmem:[%s12367_s5 + $0x778] sm:$0xff]  ;;  %v5133_v38 = vrot.slane %v11740_v32, 2  ;;  %v5361_v44 = vld [vmem:[%s12367_s5 + $0x6f0] sm:$0xff] }
 0x3ed   : > { %7577 = vmatprep.subr.mxu0 %v5328_v16  ;;  %7543 = vmatpush3.msra.mxu1 %v5280_v41  ;;  %v5137_v16 = vrot.slane %v11740_v32, 6  ;;  %v5345_v41 = vld [vmem:[%s12367_s5 + $0x670] sm:$0xff] }
 0x3ee   : > { %7578 = vmatpush3.msra.mxu0 %v5312_v62  ;;  %7544 = vmatprep.subr.mxu1 %v5295_v35  ;;  %v5377_v62 = vld [vmem:[%s12367_s5 + $0x770] sm:$0xff]  ;;  %v5360_v35 = vld [vmem:[%s12367_s5 + $0x6e8] sm:$0xff] }
 0x3ef   : > { %7579 = vmatprep.subr.mxu0 %v5327_v14  ;;  %7545 = vmatpush3.msra.mxu1 %v5279_v43  ;;  %v5392_v14 = vld [vmem:[%s12367_s5 + $0x7e8] sm:$0xff] }
 0x3f0   : > { %7580 = vmatpush3.msra.mxu0 %v5311_v48  ;;  %7546 = vmatprep.subr.mxu1 %v5294_v25  ;;  %v5344_v43 = vld [vmem:[%s12367_s5 + $0x668] sm:$0xff]  ;;  %v5359_v25 = vld [vmem:[%s12367_s5 + $0x6e0] sm:$0xff] }
 0x3f1   : > { %7581 = vmatprep.subr.mxu0 %v5326_v52  ;;  %7547 = vmatpush3.msra.mxu1 %v5278_v10  ;;  %v5376_v48 = vld [vmem:[%s12367_s5 + $0x768] sm:$0xff]  ;;  %v5391_v52 = vld [vmem:[%s12367_s5 + $0x7e0] sm:$0xff] }
 0x3f2   : > { %7582 = vmatpush3.msra.mxu0 %v5310_v46  ;;  %7548 = vmatprep.subr.mxu1 %v5293_v12  ;;  %v5343_v10 = vld [vmem:[%s12367_s5 + $0x660] sm:$0xff]  ;;  %v5358_v12 = vld [vmem:[%s12367_s5 + $0x6d8] sm:$0xff] }
 0x3f3   : > { %7583 = vmatprep.subr.mxu0 %v5325_v4  ;;  %7549 = vmatpush3.msra.mxu1 %v5277_v1  ;;  %v5375_v46 = vld [vmem:[%s12367_s5 + $0x760] sm:$0xff]  ;;  %v5390_v4 = vld [vmem:[%s12367_s5 + $0x7d8] sm:$0xff] }
 0x3f4   : > { %7584 = vmatpush3.msra.mxu0 %v5309_v8  ;;  %7550 = vmatprep.subr.mxu1 %v5292_v33  ;;  %v5342_v1 = vld [vmem:[%s12367_s5 + $0x658] sm:$0xff]  ;;  %v5357_v33 = vld [vmem:[%s12367_s5 + $0x6d0] sm:$0xff] }
 0x3f5   : > { %7585 = vmatprep.subr.mxu0 %v5324_v26  ;;  %7551 = vmatpush3.msra.mxu1 %v5276_v17  ;;  %v5374_v8 = vld [vmem:[%s12367_s5 + $0x758] sm:$0xff]  ;;  %v5389_v26 = vld [vmem:[%s12367_s5 + $0x7d0] sm:$0xff] }
 0x3f6   : > { %7586 = vmatpush3.msra.mxu0 %v5308_v22  ;;  %7552 = vmatprep.subr.mxu1 %v5291_v13  ;;  %v5341_v17 = vld [vmem:[%s12367_s5 + $0x650] sm:$0xff]  ;;  %v5356_v13 = vld [vmem:[%s12367_s5 + $0x6c8] sm:$0xff] }
 0x3f7   : > { %7587 = vmatprep.subr.mxu0 %v5323_v54  ;;  %7553 = vmatpush3.msra.mxu1 %v5275_v51  ;;  %v5373_v22 = vld [vmem:[%s12367_s5 + $0x750] sm:$0xff]  ;;  %v5388_v54 = vld [vmem:[%s12367_s5 + $0x7c8] sm:$0xff] }
 0x3f8   : > { %7588 = vmatpush3.msra.mxu0 %v5307_v45  ;;  %7554 = vmatprep.subr.mxu1 %v5290_v53  ;;  %v5340_v51 = vld [vmem:[%s12367_s5 + $0x648] sm:$0xff]  ;;  %v5355_v53 = vld [vmem:[%s12367_s5 + $0x6c0] sm:$0xff] }
 0x3f9   : > { %7589 = vmatprep.subr.mxu0 %v5322_v24  ;;  %7555 = vmatpush3.msra.mxu1 %v5274_v18  ;;  %v5372_v45 = vld [vmem:[%s12367_s5 + $0x748] sm:$0xff]  ;;  %v5387_v24 = vld [vmem:[%s12367_s5 + $0x7c0] sm:$0xff] }
 0x3fa   : > { %7590 = vmatpush3.msra.mxu0 %v5306_v40  ;;  %7556 = vmatprep.subr.mxu1 %v5289_v30  ;;  %v5339_v18 = vld [vmem:[%s12367_s5 + $0x640] sm:$0xff]  ;;  %v5354_v30 = vld [vmem:[%s12367_s5 + $0x6b8] sm:$0xff] }
 0x3fb   : > { %7591 = vmatprep.subr.mxu0 %v5321_v23  ;;  %7557 = vmatpush3.msra.mxu1 %v5273_v31  ;;  %v5371_v40 = vld [vmem:[%s12367_s5 + $0x740] sm:$0xff]  ;;  %v5386_v23 = vld [vmem:[%s12367_s5 + $0x7b8] sm:$0xff] }
 0x3fc   : > { %7592 = vmatpush3.msra.mxu0 %v5305_v42  ;;  %7558 = vmatprep.subr.mxu1 %v5288_v56  ;;  %v5338_v31 = vld [vmem:[%s12367_s5 + $0x638] sm:$0xff]  ;;  %v5353_v56 = vld [vmem:[%s12367_s5 + $0x6b0] sm:$0xff] }
 0x3fd   : > { %7593 = vmatprep.subr.mxu0 %v5320_v61  ;;  %7559 = vmatpush3.msra.mxu1 %v5272_v7  ;;  %v5370_v42 = vld [vmem:[%s12367_s5 + $0x738] sm:$0xff]  ;;  %v5385_v61 = vld [vmem:[%s12367_s5 + $0x7b0] sm:$0xff] }
 0x3fe   : > { %7594 = vmatpush3.msra.mxu0 %v5304_v47  ;;  %7560 = vmatprep.subr.mxu1 %v5287_v29  ;;  %v5337_v7 = vld [vmem:[%s12367_s5 + $0x630] sm:$0xff]  ;;  %v5352_v29 = vld [vmem:[%s12367_s5 + $0x6a8] sm:$0xff] }
 0x3ff   : > { %7595 = vmatprep.subr.mxu0 %v5319_v9  ;;  %7561 = vmatpush3.msra.mxu1 %v5271_v21  ;;  %v5369_v47 = vld [vmem:[%s12367_s5 + $0x730] sm:$0xff]  ;;  %v5384_v9 = vld [vmem:[%s12367_s5 + $0x7a8] sm:$0xff] }
 0x400   : > { %7596 = vmatpush3.msra.mxu0 %v5303_v27  ;;  %7562 = vmatprep.subr.mxu1 %v5286_v5  ;;  %v5336_v21 = vld [vmem:[%s12367_s5 + $0x628] sm:$0xff]  ;;  %v5351_v5 = vld [vmem:[%s12367_s5 + $0x6a0] sm:$0xff] }
 0x401   : > { %7597 = vmatprep.subr.mxu0 %v5318_v15  ;;  %7563 = vmatpush3.msra.mxu1 %v5270_v34  ;;  %v5368_v27 = vld [vmem:[%s12367_s5 + $0x728] sm:$0xff]  ;;  %v5383_v15 = vld [vmem:[%s12367_s5 + $0x7a0] sm:$0xff] }
 0x402   : > { %7598 = vmatpush3.msra.mxu0 %v5302_v37  ;;  %7564 = vmatprep.subr.mxu1 %v5285_v63  ;;  %v5335_v34 = vld [vmem:[%s12367_s5 + $0x620] sm:$0xff]  ;;  %v5350_v63 = vld [vmem:[%s12367_s5 + $0x698] sm:$0xff] }
 0x403   : > { %7599 = vmatprep.subr.mxu0 %v5317_v58  ;;  %7565 = vmatpush3.msra.mxu1 %v5269_v6  ;;  %v5367_v37 = vld [vmem:[%s12367_s5 + $0x720] sm:$0xff]  ;;  %v5382_v58 = vld [vmem:[%s12367_s5 + $0x798] sm:$0xff] }
 0x404   : > { %7600 = vmatpush3.msra.mxu0 %v5301_v3  ;;  %7566 = vmatprep.subr.mxu1 %v5284_v28  ;;  %v5334_v6 = vld [vmem:[%s12367_s5 + $0x618] sm:$0xff]  ;;  %v5349_v28 = vld [vmem:[%s12367_s5 + $0x690] sm:$0xff] }
 0x405   : > { %7601 = vmatprep.subr.mxu0 %v5316_v50  ;;  %7567 = vmatpush3.msra.mxu1 %v5268_v11  ;;  %v5366_v3 = vld [vmem:[%s12367_s5 + $0x718] sm:$0xff]  ;;  %v5381_v50 = vld [vmem:[%s12367_s5 + $0x790] sm:$0xff] }
 0x406   : > { %7602 = vmatpush3.msra.mxu0 %v5300_v39  ;;  %7568 = vmatprep.subr.mxu1 %v5283_v2  ;;  %v5333_v11 = vld [vmem:[%s12367_s5 + $0x610] sm:$0xff]  ;;  %v5348_v2 = vld [vmem:[%s12367_s5 + $0x688] sm:$0xff] }
 0x407   : > { %7603 = vmatprep.subr.mxu0 %v5315_v20  ;;  %7569 = vmatpush3.msra.mxu1 %v5267_v57  ;;  %v5365_v39 = vld [vmem:[%s12367_s5 + $0x710] sm:$0xff]  ;;  %v5380_v20 = vld [vmem:[%s12367_s5 + $0x788] sm:$0xff] }
 0x408   : > { %7604 = vmatpush3.msra.mxu0 %v5299_v0  ;;  %5741 = vmatmul.mubr.f32.vlgmr.msra.gmra.mxu1 %v11748_v19  ;;  %v5393_v19 = vld [vmem:[%s12367_s5 + $0x7f0] sm:$0xff]  ;;  %v5332_v57 = vld [vmem:[%s12367_s5 + $0x608] sm:$0xff] }
 0x409   : > { %5811 = vmatmul.mubr.f32.vlgmr.msra.gmra.mxu0 %v5128_v55  ;;  %7608 = vmatprep.subr.mxu1 %v5362_v59  ;;  %v5364_v0 = vld [vmem:[%s12367_s5 + $0x708] sm:$0xff]  ;;  %v5347_v59 = vld [vmem:[%s12367_s5 + $0x680] sm:$0xff] }
 0x40a   : > { %7643 = vmatprep.subr.mxu0 %v5394_v36  ;;  %7609 = vmatpush3.msra.mxu1 %v5346_v60  ;;  %v5379_v55 = vld [vmem:[%s12367_s5 + $0x780] sm:$0xff] }
 0x40b   : > { %5880 = vmatprep.mubr.f32.mxu1 %v5133_v38  ;;  %7644 = vmatpush3.msra.mxu0 %v5378_v49  ;;  %v5331_v36 = vld [vmem:[%s12367_s5 + $0x600] sm:$0xff]  ;;  %v5135_v49 = vrot.slane %v11740_v32, 4  ;;  %v5972_v38 = vld [vmem:[%s12369_s7 + $0x78] sm:$0xff] }
 0x40c   : > { %5950 = vmatprep.mubr.f32.mxu0 %v5137_v16  ;;  %7610 = vmatprep.subr.mxu1 %v5361_v44  ;;  %v5363_v60 = vld [vmem:[%s12367_s5 + $0x700] sm:$0xff]  ;;  %v9027_v44 = vmov 0.0   ;;  %v5971_v16 = vld [vmem:[%s12369_s7 + $0x70] sm:$0xff] }
 0x40d   : > { %7645 = vmatprep.subr.mxu0 %v5393_v19  ;;  %7611 = vmatpush3.msra.mxu1 %v5345_v41  ;;  %v5970_v19 = vld [vmem:[%s12369_s7 + $0x68] sm:$0xff]  ;;  %v5968_v41 = vld [vmem:[%s12369_s7 + $0x58] sm:$0xff] }
 0x40e   : > { %7646 = vmatpush3.msra.mxu0 %v5377_v62  ;;  %7612 = vmatprep.subr.mxu1 %v5360_v35  ;;  %v5967_v62 = vld [vmem:[%s12369_s7 + $0x50] sm:$0xff]  ;;  %v5966_v35 = vld [vmem:[%s12369_s7 + $0x48] sm:$0xff] }
 0x40f   : > { %7647 = vmatprep.subr.mxu0 %v5392_v14  ;;  %7613 = vmatpush3.msra.mxu1 %v5344_v43  ;;  %v5965_v14 = vld [vmem:[%s12369_s7 + $0x40] sm:$0xff]  ;;  %v5964_v43 = vld [vmem:[%s12369_s7 + $0x38] sm:$0xff] }
 0x410   : > { %7648 = vmatpush3.msra.mxu0 %v5376_v48  ;;  %7614 = vmatprep.subr.mxu1 %v5359_v25  ;;  %v5963_v48 = vld [vmem:[%s12369_s7 + $0x30] sm:$0xff]  ;;  %v5962_v25 = vld [vmem:[%s12369_s7 + $0x28] sm:$0xff] }
 0x411   : > { %7649 = vmatprep.subr.mxu0 %v5391_v52  ;;  %7615 = vmatpush3.msra.mxu1 %v5343_v10  ;;  %v5961_v52 = vld [vmem:[%s12369_s7 + $0x20] sm:$0xff]  ;;  %v5960_v10 = vld [vmem:[%s12369_s7 + $0x18] sm:$0xff] }
 0x412   : > { %7650 = vmatpush3.msra.mxu0 %v5375_v46  ;;  %7616 = vmatprep.subr.mxu1 %v5358_v12  ;;  %v5959_v46 = vld [vmem:[%s12369_s7 + $0x10] sm:$0xff]  ;;  %v5958_v12 = vld [vmem:[%s12369_s7 + $0x8] sm:$0xff] }
 0x413   : > { %7651 = vmatprep.subr.mxu0 %v5390_v4  ;;  %7617 = vmatpush3.msra.mxu1 %v5342_v1  ;;  %v5957_v4 = vld [vmem:[%s12369_s7] sm:$0xff] }
 0x414   : > { %7652 = vmatpush3.msra.mxu0 %v5374_v8  ;;  %7618 = vmatprep.subr.mxu1 %v5357_v33 }
 0x415   : > { %7653 = vmatprep.subr.mxu0 %v5389_v26  ;;  %7619 = vmatpush3.msra.mxu1 %v5341_v17 }
 0x416   : > { %7654 = vmatpush3.msra.mxu0 %v5373_v22  ;;  %7620 = vmatprep.subr.mxu1 %v5356_v13  ;;  %v5395_v22 = vld [vmem:[%s12368_s6] sm:$0x1] }
 0x417   : > { %7655 = vmatprep.subr.mxu0 %v5388_v54  ;;  %7621 = vmatpush3.msra.mxu1 %v5340_v51 }
 0x418   : > { %7656 = vmatpush3.msra.mxu0 %v5372_v45  ;;  %7622 = vmatprep.subr.mxu1 %v5355_v53 }
 0x419   : > { %7657 = vmatprep.subr.mxu0 %v5387_v24  ;;  %7623 = vmatpush3.msra.mxu1 %v5339_v18 }
 0x41a   : > { %7658 = vmatpush3.msra.mxu0 %v5371_v40  ;;  %7624 = vmatprep.subr.mxu1 %v5354_v30 }
 0x41b   : > { %7659 = vmatprep.subr.mxu0 %v5386_v23  ;;  %7625 = vmatpush3.msra.mxu1 %v5338_v31 }
 0x41c   : > { %7660 = vmatpush3.msra.mxu0 %v5370_v42  ;;  %7626 = vmatprep.subr.mxu1 %v5353_v56 }
 0x41d   : > { %7661 = vmatprep.subr.mxu0 %v5385_v61  ;;  %7627 = vmatpush3.msra.mxu1 %v5337_v7 }
 0x41e   : > { %7662 = vmatpush3.msra.mxu0 %v5369_v47  ;;  %7628 = vmatprep.subr.mxu1 %v5352_v29 }
 0x41f   : > { %7663 = vmatprep.subr.mxu0 %v5384_v9  ;;  %7629 = vmatpush3.msra.mxu1 %v5336_v21 }
 0x420   : > { %7664 = vmatpush3.msra.mxu0 %v5368_v27  ;;  %7630 = vmatprep.subr.mxu1 %v5351_v5 }
 0x421   : > { %7665 = vmatprep.subr.mxu0 %v5383_v15  ;;  %7631 = vmatpush3.msra.mxu1 %v5335_v34 }
 0x422   : > { %7666 = vmatpush3.msra.mxu0 %v5367_v37  ;;  %7632 = vmatprep.subr.mxu1 %v5350_v63 }
 0x423   : > { %7667 = vmatprep.subr.mxu0 %v5382_v58  ;;  %7633 = vmatpush3.msra.mxu1 %v5334_v6 }
 0x424   : > { %7668 = vmatpush3.msra.mxu0 %v5366_v3  ;;  %7634 = vmatprep.subr.mxu1 %v5349_v28  ;;  %v5973_v28 = vld [vmem:[%s12370_s8] sm:$0x1] }
 0x425   : > { %7669 = vmatprep.subr.mxu0 %v5381_v50  ;;  %7635 = vmatpush3.msra.mxu1 %v5333_v11 }
 0x426   : > { %7670 = vmatpush3.msra.mxu0 %v5365_v39  ;;  %7636 = vmatprep.subr.mxu1 %v5348_v2 }
 0x427   : > { %7671 = vmatprep.subr.mxu0 %v5380_v20  ;;  %7637 = vmatpush3.msra.mxu1 %v5332_v57 }
 0x428   : > { %7672 = vmatpush3.msra.mxu0 %v5364_v0  ;;  %7638 = vmatprep.subr.mxu1 %v5347_v59 }
 0x429   : > { %7673 = vmatprep.subr.mxu0 %v5379_v55  ;;  %7639 = vmatpush3.msra.mxu1 %v5331_v36 }
 0x42a   : > { %7674 = vmatpush3.msra.mxu0 %v5363_v60  ;;  %5881 = vmatmul.mubr.f32.vlgmr.msra.gmra.mxu1 %v11740_v32  ;;  %v5969_v32 = vld [vmem:[%s12369_s7 + $0x60] sm:$0xff] }
 0x42b   : > { %5951 = vmatmul.mubr.f32.vlgmr.msra.gmra.mxu0 %v5135_v49  ;;  %8971 = vmatprep.subr.mxu1 %v9027_v44 }
 0x42c   : > { %8972 = vmatpush3.msra.mxu1 %v5972_v38  ;;  %9003 = vmatprep.mubr.msk.f32.mxu1 %vm9028_vm5, %v9027_v44 }
 0x42d   : > { %8973 = vmatprep.subr.mxu1 %v9027_v44 }
 0x42e   : > { %8974 = vmatpush3.msra.mxu1 %v5971_v16 }
 0x42f   : > { %8975 = vmatprep.subr.mxu1 %v9027_v44 }
 0x430   : > { %8976 = vmatpush3.msra.mxu1 %v5970_v19 }
 0x431   : > { %8977 = vmatprep.subr.mxu1 %v9027_v44 }
 0x432   : > { %8978 = vmatpush3.msra.mxu1 %v5969_v32 }
 0x433   : > { %8979 = vmatprep.subr.mxu1 %v9027_v44 }
 0x434   : > { %8980 = vmatpush3.msra.mxu1 %v5968_v41 }
 0x435   : > { %8981 = vmatprep.subr.mxu1 %v9027_v44 }
 0x436   : > { %8982 = vmatpush3.msra.mxu1 %v5967_v62 }
 0x437   : > { %8983 = vmatprep.subr.mxu1 %v9027_v44 }
 0x438   : > { %8984 = vmatpush3.msra.mxu1 %v5966_v35 }
 0x439   : > { %8985 = vmatprep.subr.mxu1 %v9027_v44 }
 0x43a   : > { %8986 = vmatpush3.msra.mxu1 %v5965_v14 }
 0x43b   : > { %8987 = vmatprep.subr.mxu1 %v9027_v44 }
 0x43c   : > { %8988 = vmatpush3.msra.mxu1 %v5964_v43 }
 0x43d   : > { %8989 = vmatprep.subr.mxu1 %v9027_v44 }
 0x43e   : > { %8990 = vmatpush3.msra.mxu1 %v5963_v48 }
 0x43f   : > { %8991 = vmatprep.subr.mxu1 %v9027_v44 }
 0x440   : > { %8992 = vmatpush3.msra.mxu1 %v5962_v25 }
 0x441   : > { %8993 = vmatprep.subr.mxu1 %v9027_v44 }
 0x442   : > { %8994 = vmatpush3.msra.mxu1 %v5961_v52 }
 0x443   : > { %8995 = vmatprep.subr.mxu1 %v9027_v44 }
 0x444   : > { %8996 = vmatpush3.msra.mxu1 %v5960_v10 }
 0x445   : > { %8997 = vmatprep.subr.mxu1 %v9027_v44 }
 0x446   : > { %8998 = vmatpush3.msra.mxu1 %v5959_v46 }
 0x447   : > { %8999 = vmatprep.subr.mxu1 %v9027_v44 }
 0x448   : > { %9000 = vmatpush3.msra.mxu1 %v5958_v12 }
 0x449   : > { %9001 = vmatprep.subr.mxu1 %v9027_v44 }
 0x44a   : > { %9002 = vmatpush3.msra.mxu1 %v5957_v4 }
 0x485   : > { %v7430_v1 = vpop.f32.mrf.mxu1 }
 0x486   : > { %v7465_v33 = vpop.f32.mrf.mxu0 }
 0x487   : > { %v7431_v8 = vpop.f32.mrf.mxu1 }
 0x488   : > { %v7432_v17 = vadd.f32 %v7431_v8, %v7430_v1  ;;  %v7466_v13 = vpop.f32.mrf.mxu0 }
 0x489   : > { %v7467_v24 = vadd.f32 %v7466_v13, %v7465_v33 }
 0x48a   : > { %v5463_v51 = vadd.f32 %v7432_v17, %v5395_v22 }
 0x48c   : > { %v5533_v40 = vadd.f32 %v7467_v24, %v5463_v51 }
 0x4a6   : > { %v7500_v26 = vpop.f32.mrf.mxu1 }
 0x4a7   : > { %v7535_v45 = vpop.f32.mrf.mxu0 }
 0x4a8   : > { %v7501_v54 = vpop.f32.mrf.mxu1 }
 0x4a9   : > { %v7502_v18 = vadd.f32 %v7501_v54, %v7500_v26  ;;  %v7536_v30 = vpop.f32.mrf.mxu0 }
 0x4aa   : > { %v7537_v56 = vadd.f32 %v7536_v30, %v7535_v45 }
 0x4ab   : > { %v5603_v31 = vadd.f32 %v7502_v18, %v5533_v40 }
 0x4ad   : > { %v5673_v7 = vadd.f32 %v7537_v56, %v5603_v31 }
 0x4c8   : > { %v7570_v53 = vpop.f32.mrf.mxu1 }
 0x4c9   : > { %v7605_v42 = vpop.f32.mrf.mxu0 }
 0x4ca   : > { %v7571_v23 = vpop.f32.mrf.mxu1 }
 0x4cb   : > { %v7572_v61 = vadd.f32 %v7571_v23, %v7570_v53  ;;  %v7606_v47 = vpop.f32.mrf.mxu0 }
 0x4cc   : > { %v7607_v21 = vadd.f32 %v7606_v47, %v7605_v42 }
 0x4cd   : > { %v5743_v29 = vadd.f32 %v7572_v61, %v5673_v7 }
 0x4cf   : > { %v5813_v15 = vadd.f32 %v7607_v21, %v5743_v29 }
 0x4ea   : > { %v7640_v9 = vpop.f32.mrf.mxu1 }
 0x4eb   : > { %v7675_v27 = vpop.f32.mrf.mxu0 }
 0x4ec   : > { %v7641_v5 = vpop.f32.mrf.mxu1 }
 0x4ed   : > { %v7642_v34 = vadd.f32 %v7641_v5, %v7640_v9  ;;  %v7676_v37 = vpop.f32.mrf.mxu0 }
 0x4ee   : > { %v7677_v58 = vadd.f32 %v7676_v37, %v7675_v27 }
 0x4ef   : > { %v5883_v63 = vadd.f32 %v7642_v34, %v5813_v15 }
 0x4f1   : > { %v5953_v6 = vadd.f32 %v7677_v58, %v5883_v63 }
 0x4f3   : > { %v5956_v3 = vmax.f32 %v5953_v6, 0.0 }
 0x4f5   : > { %9004 = vmatmul.mubr.f32.vlgmr.msra.gmra.mxu1 %v5956_v3 }
 0x5b5   : > { %v6040_v50 = vpop.f32.mrf.mxu1 }
 0x5b6   : > { %v6041_v11 = vadd.f32 %v6040_v50, %v5973_v28 }
 0x5b7   : > { %v9005_v39 = vpop.f32.mrf.mxu1 }
 0x5b8   : > { %v6045_v2 = vrot.slane %v6041_v11, 7  ;;  %v6047_v20 = vrot.slane %v6041_v11, 6  ;;  %v6049_v57 = vrot.slane %v6041_v11, 5  ;;  %v6051_v59 = vrot.slane %v6041_v11, 4 }
 0x5b9   : > { %v6053_v36 = vrot.slane %v6041_v11, 3  ;;  %v6055_v49 = vrot.slane %v6041_v11, 2  ;;  %v6057_v44 = vrot.slane %v6041_v11, 1 }
 0x5ba   : > { %v6060_v0 = vsel %vm6059_vm6, %v6041_v11, %v6045_v2 }
 0x5bb   : > { %v6062_v55 = vsel %vm6061_vm7, %v6060_v0, %v6047_v20 }
 0x5bc   : > { %v6064_v60 = vsel %vm6063_vm8, %v6062_v55, %v6049_v57 }
 0x5bd   : > { %v6065_v38 = vsel %vm2208_vm2, %v6064_v60, %v6051_v59 }
 0x5be   : > { %v6066_v16 = vsel %vm2045_vm3, %v6065_v38, %v6053_v36 }
 0x5bf   : > { %v6067_v19 = vsel %vm1882_vm4, %v6066_v16, %v6055_v49 }
 0x5c0   : > { %v6068_v32 = vsel %vm1608_vm1, %v6067_v19, %v6057_v44 }
 0x5c1   : > { %6069 = vst [vmem:[%s330_s14] sm:$0xff] %v6068_v32 }
 0x5c2 PF: > { %s19_s30 = sadd.s32 1, %s9025_s30  }
 0x5c3   : > { %p16_p4 = scmp.ge.s32.totalorder %s19_s30, 4  }
 0x5c5   :  { %18 = sbr.rel (!%p16_p4) target bundleno = 1 (0x1), region = 113 }

</bundles_post_ra>
